<compile_context>
chip_gen: v7x
topology: tpu7x:2x2x1
jax: 0.10.0
libtpu: 0.0.40
codegen_flags: <defaults>
</compile_context>

<pallas_src>
import math
import functools

import jax
import jax.numpy as jnp
from jax.experimental import pallas as pl
from jax.experimental.pallas import tpu as pltpu

HEADS = 8
SCALAR_KEY_DIM = 16
SCALAR_VALUE_DIM = 16
POINT_KEY_DIM = 4
POINT_VALUE_DIM = 4
EPS = 1e-8
NEG_MAX = -3.4028234663852886e38  # -finfo(float32).max, matches reference masked_fill


# ---------------------------------------------------------------------------
# Row-tiled linear kernels
# ---------------------------------------------------------------------------
def _matmul_kernel(x_ref, w_ref, o_ref):
    o_ref[...] = jnp.dot(x_ref[...], w_ref[...], preferred_element_type=jnp.float32)


def _matmul_bias_kernel(x_ref, w_ref, b_ref, o_ref):
    o_ref[...] = (jnp.dot(x_ref[...], w_ref[...], preferred_element_type=jnp.float32)
                  + b_ref[...])


def pallas_linear(x, w, b=None):
    """y = x @ w (+ b).  x:(M,K), w:(K,N).  Row-tiled over M, weights resident."""
    M, K = x.shape
    _, N = w.shape
    tm = M if M <= 512 else 256
    grid = (pl.cdiv(M, tm),)
    x_spec = pl.BlockSpec((tm, K), lambda i: (i, 0))
    w_spec = pl.BlockSpec((K, N), lambda i: (0, 0))
    o_spec = pl.BlockSpec((tm, N), lambda i: (i, 0))
    cp = pltpu.CompilerParams(dimension_semantics=("parallel",))
    if b is None:
        return pl.pallas_call(
            _matmul_kernel,
            out_shape=jax.ShapeDtypeStruct((M, N), jnp.float32),
            grid=grid,
            in_specs=[x_spec, w_spec],
            out_specs=o_spec,
            compiler_params=cp,
        )(x, w)
    return pl.pallas_call(
        _matmul_bias_kernel,
        out_shape=jax.ShapeDtypeStruct((M, N), jnp.float32),
        grid=grid,
        in_specs=[x_spec, w_spec, pl.BlockSpec((1, N), lambda i: (0, 0))],
        out_specs=o_spec,
        compiler_params=cp,
    )(x, w, b.reshape(1, N))


# ---------------------------------------------------------------------------
# Fused IPA attention kernel: one (batch, query-tile) per grid step, all heads inside
# ---------------------------------------------------------------------------
def _ipa_attn_kernel(*refs, heads, dqk, dval, d_pair, has_mask):
    # qcat : (1, tq, heads*dqk)   scaled scalar-q | sqrt(2)*scaled point-q | -1
    # kcat : (1, n,  heads*dqk)   scalar-k        | sqrt(2)*scaled point-k | ||k_pt||^2
    # vcat : (1, n,  heads*dval)  scalar-v        | point-v (global frame)
    # pair : (1, tq, n, d_pair)
    # wpb  : (d_pair, heads)      pair_scale pre-folded; per-head bias dropped (softmax-inv.)
    if has_mask:
        qcat_ref, kcat_ref, vcat_ref, pair_ref, mq_ref, mk_ref, wpb_ref, o_ref = refs
    else:
        qcat_ref, kcat_ref, vcat_ref, pair_ref, wpb_ref, o_ref = refs

    pair = pair_ref[0]
    tq = pair.shape[0]
    n = pair.shape[1]

    # pairwise attention bias for all heads at once: (tq*n, Dp) @ (Dp, heads)
    bias_all = jnp.dot(pair.reshape(tq * n, d_pair), wpb_ref[...],
                       preferred_element_type=jnp.float32).reshape(tq, n, heads)

    if has_mask:
        keep = (mq_ref[0] * mk_ref[0]) > 0.5                 # (tq,1)*(1,n) -> (tq,n)

    attn_list = []
    outv_list = []
    for hd in range(heads):
        qh = qcat_ref[0, :, hd * dqk:(hd + 1) * dqk]         # (tq, dqk)
        kh = kcat_ref[0, :, hd * dqk:(hd + 1) * dqk]         # (n,  dqk)
        # scalar logits + 2*point cross-term + (-||k_pt||^2) in ONE MXU matmul per head
        # (all scales and the k-norm correction are folded into the q/k feature columns;
        #  the ||q||^2 row-constant is dropped: softmax-invariant)
        logits = jnp.dot(qh, kh.T, preferred_element_type=jnp.float32)
        logits = logits + bias_all[:, :, hd]
        if has_mask:
            logits = jnp.where(keep, logits, NEG_MAX)

        m = jnp.max(logits, axis=-1, keepdims=True)
        p = jnp.exp(logits - m)
        attn = p * pl.reciprocal(jnp.sum(p, axis=-1, keepdims=True), approx=True)
        attn_list.append(attn)

        vh = vcat_ref[0, :, hd * dval:(hd + 1) * dval]       # (n, dval)
        outv_list.append(jnp.dot(attn, vh, preferred_element_type=jnp.float32))

    out_v = jnp.concatenate(outv_list, axis=-1)              # (tq, heads*dval)

    # pairwise aggregation for all heads as a query-row-batched MXU matmul
    attn_all = jnp.concatenate(attn_list, axis=-1).reshape(tq, heads, n)
    out_pw = jax.lax.dot_general(
        attn_all, pair,
        dimension_numbers=(((2,), (1,)), ((0,), (0,))),
        preferred_element_type=jnp.float32)                  # (tq, heads, Dp)
    out_pw = out_pw.reshape(tq, heads * d_pair)

    # single lane-dense output slab
    o_ref[0] = jnp.concatenate([out_v, out_pw], axis=-1)


def _pick_query_tile(n, heads, dqk, dval, d_pair, w_out):
    """Largest query tile whose double-buffered working set stays within a VMEM budget."""
    budget = 32 << 20
    cands = [n] + [c for c in (512, 256, 128, 64, 32, 16, 8) if c < n and n % c == 0]
    est = 0
    for tq in cands:
        est = 4 * (2 * (tq * heads * dqk + n * heads * dqk + n * heads * dval
                        + tq * n * d_pair + tq * w_out + tq + n)
                   + 3 * tq * n * heads)        # bias / logits / attn temporaries
        if est <= budget:
            return tq, est
    return cands[-1], est


def ipa_attention_core(qcat, kcat, vcat, pairwise, w_pb_scaled,
                       mask_col=None, mask_row=None):
    b, n, _ = qcat.shape
    heads = HEADS
    dqk = qcat.shape[-1] // heads
    dval = vcat.shape[-1] // heads
    Dp = pairwise.shape[-1]
    w_out = heads * dval + heads * Dp
    has_mask = mask_col is not None

    # query-tiling keeps the pairwise block O(tq*n*Dp) instead of O(n^2*Dp)
    tq, est = _pick_query_tile(n, heads, dqk, dval, Dp, w_out)
    nq = n // tq

    kern = functools.partial(_ipa_attn_kernel, heads=heads, dqk=dqk, dval=dval,
                             d_pair=Dp, has_mask=has_mask)

    in_specs = [
        pl.BlockSpec((1, tq, heads * dqk), lambda bi, qi: (bi, qi, 0)),
        pl.BlockSpec((1, n, heads * dqk), lambda bi, qi: (bi, 0, 0)),
        pl.BlockSpec((1, n, heads * dval), lambda bi, qi: (bi, 0, 0)),
        pl.BlockSpec((1, tq, n, Dp), lambda bi, qi: (bi, qi, 0, 0)),
    ]
    args = [qcat, kcat, vcat, pairwise]
    if has_mask:
        in_specs += [pl.BlockSpec((1, tq, 1), lambda bi, qi: (bi, qi, 0)),
                     pl.BlockSpec((1, 1, n), lambda bi, qi: (bi, 0, 0))]
        args += [mask_col, mask_row]
    in_specs += [pl.BlockSpec((Dp, heads), lambda bi, qi: (0, 0))]
    args += [w_pb_scaled]

    cp_kwargs = dict(dimension_semantics=("parallel", "parallel"))
    if est > (16 << 20):
        # TODO(synk): for very long sequences a KV-tiled online-softmax variant would be
        # preferable; here we only raise the scoped limit, staying below v7x's 64 MiB VMEM.
        cp_kwargs["vmem_limit_bytes"] = 48 << 20

    return pl.pallas_call(
        kern,
        out_shape=jax.ShapeDtypeStruct((b, n, w_out), jnp.float32),
        grid=(b, nq),
        in_specs=in_specs,
        out_specs=pl.BlockSpec((1, tq, w_out), lambda bi, qi: (bi, qi, 0)),
        compiler_params=pltpu.CompilerParams(**cp_kwargs),
    )(*args)


# ---------------------------------------------------------------------------
# Fused post-attention block: residual + LN + FF(3) + residual + LN + update head
# ---------------------------------------------------------------------------
def _ipa_block_post_kernel(attn_ref, x_ref, g1_ref, b1n_ref,
                           w1_ref, b1_ref, w2_ref, b2_ref, w3_ref, b3_ref,
                           g2_ref, b2n_ref, wu_ref, bu_ref,
                           xo_ref, upd_ref):
    h0 = attn_ref[...] + x_ref[...]
    mu = jnp.mean(h0, axis=-1, keepdims=True)
    d = h0 - mu
    var = jnp.mean(d * d, axis=-1, keepdims=True)
    h1 = d * jax.lax.rsqrt(var + 1e-5) * g1_ref[...] + b1n_ref[...]

    y = jnp.maximum(jnp.dot(h1, w1_ref[...], preferred_element_type=jnp.float32)
                    + b1_ref[...], 0.0)
    y = jnp.maximum(jnp.dot(y, w2_ref[...], preferred_element_type=jnp.float32)
                    + b2_ref[...], 0.0)
    y = jnp.dot(y, w3_ref[...], preferred_element_type=jnp.float32) + b3_ref[...]

    h2 = y + h1
    mu2 = jnp.mean(h2, axis=-1, keepdims=True)
    d2 = h2 - mu2
    var2 = jnp.mean(d2 * d2, axis=-1, keepdims=True)
    xo = d2 * jax.lax.rsqrt(var2 + 1e-5) * g2_ref[...] + b2n_ref[...]

    xo_ref[...] = xo
    upd_ref[...] = (jnp.dot(xo, wu_ref[...], preferred_element_type=jnp.float32)
                    + bu_ref[...])


def ipa_block_post(attn_out, x, bp, w_upd, b_upd):
    M, D = x.shape
    tm = M if M <= 512 else 256
    grid = (pl.cdiv(M, tm),)
    row = lambda i: (i, 0)
    fix = lambda i: (0, 0)
    return pl.pallas_call(
        _ipa_block_post_kernel,
        out_shape=(jax.ShapeDtypeStruct((M, D), jnp.float32),
                   jax.ShapeDtypeStruct((M, 6), jnp.float32)),
        grid=grid,
        in_specs=[pl.BlockSpec((tm, D), row), pl.BlockSpec((tm, D), row),
                  pl.BlockSpec((1, D), fix), pl.BlockSpec((1, D), fix),
                  pl.BlockSpec((D, D), fix), pl.BlockSpec((1, D), fix),
                  pl.BlockSpec((D, D), fix), pl.BlockSpec((1, D), fix),
                  pl.BlockSpec((D, D), fix), pl.BlockSpec((1, D), fix),
                  pl.BlockSpec((1, D), fix), pl.BlockSpec((1, D), fix),
                  pl.BlockSpec((D, 6), fix), pl.BlockSpec((1, 6), fix)],
        out_specs=(pl.BlockSpec((tm, D), row), pl.BlockSpec((tm, 6), row)),
        compiler_params=pltpu.CompilerParams(dimension_semantics=("parallel",)),
    )(attn_out, x,
      bp['attn_norm_g'].reshape(1, D), bp['attn_norm_b'].reshape(1, D),
      bp['ff_w1'], bp['ff_b1'].reshape(1, D),
      bp['ff_w2'], bp['ff_b2'].reshape(1, D),
      bp['ff_w3'], bp['ff_b3'].reshape(1, D),
      bp['ff_norm_g'].reshape(1, D), bp['ff_norm_b'].reshape(1, D),
      w_upd, b_upd.reshape(1, 6))


# ---------------------------------------------------------------------------
# InvariantPointAttention / IPABlock (glue around the kernels)
# ---------------------------------------------------------------------------
def ipa_forward(p, x, pairwise, rotations, translations, mask=None):
    b, n, D = x.shape
    h = HEADS
    dks, dvs, dkp, dvp = SCALAR_KEY_DIM, SCALAR_VALUE_DIM, POINT_KEY_DIM, POINT_VALUE_DIM
    Dp = pairwise.shape[-1]
    num_logits = 3  # require_pairwise_repr=True
    scalar_scale = (num_logits * dks) ** -0.5
    point_scale = (num_logits * dkp * (9.0 / 2.0)) ** -0.5
    pair_scale = num_logits ** -0.5

    # single fused projection for all six q/k/v scalar + point heads
    xf = x.reshape(b * n, D)
    proj = pallas_linear(xf, p['w_qkv'])          # (b*n, h*(16+16+16+12+12+12))

    off = [0]

    def take(width):
        s = proj[:, off[0]:off[0] + width]
        off[0] += width
        return s

    qs = take(h * dks).reshape(b, n, h, dks)
    ks = take(h * dks).reshape(b, n, h, dks)
    vs = take(h * dvs).reshape(b, n, h, dvs)
    qp = take(h * dkp * 3).reshape(b, n, h, dkp, 3)
    kp = take(h * dkp * 3).reshape(b, n, h, dkp, 3)
    vp = take(h * dvp * 3).reshape(b, n, h, dvp, 3)

    # rigid transform of the points into the global frame (tiny per-residue math)
    trans = translations[:, :, None, None, :]                     # (b,n,1,1,3)
    qp_g = jnp.einsum('bnhdc,bncr->bnhdr', qp, rotations) + trans
    kp_g = jnp.einsum('bnhdc,bncr->bnhdr', kp, rotations) + trans
    vp_g = jnp.einsum('bnhdc,bncr->bnhdr', vp, rotations) + trans

    # fold per-head softplus point weights + scales into q/k points (mathematically exact)
    pw = jax.nn.softplus(p['point_weights'])                      # (h,)
    coef = jnp.sqrt(0.5 * pw * point_scale)
    qp_s = qp_g * coef[None, None, :, None, None]
    kp_s = kp_g * coef[None, None, :, None, None]

    # concat per head: [scaled scalar | sqrt(2)*scaled point | extra column]
    # extra column: q=-1, k=||k_point||^2 so the -||k||^2 logit correction rides inside
    # the single per-head QK matmul (||q||^2 is a row constant -> softmax-invariant).
    sqrt2 = math.sqrt(2.0)
    ones_col = jnp.ones((b, n, h, 1), jnp.float32)
    kn = jnp.sum(kp_s * kp_s, axis=(-2, -1))[..., None]           # (b,n,h,1)
    dqk = dks + dkp * 3 + 1
    qcat = jnp.concatenate([qs * scalar_scale,
                            (sqrt2 * qp_s).reshape(b, n, h, dkp * 3),
                            -ones_col],
                           axis=-1).reshape(b, n, h * dqk)
    kcat = jnp.concatenate([ks,
                            (sqrt2 * kp_s).reshape(b, n, h, dkp * 3),
                            kn],
                           axis=-1).reshape(b, n, h * dqk)
    vcat = jnp.concatenate([vs, vp_g.reshape(b, n, h, dvp * 3)],
                           axis=-1).reshape(b, n, h * (dvs + dvp * 3))

    if mask is not None:
        mf = mask.astype(jnp.float32)
        mask_col = mf.reshape(b, n, 1)
        mask_row = mf.reshape(b, 1, n)
    else:
        mask_col = mask_row = None

    # pair_scale folded into the pairwise-bias weight; the per-head Linear bias b_pb is a
    # constant over keys for each (row, head) and therefore softmax-invariant -> dropped.
    w_pb_scaled = p['w_pb'] * pair_scale

    slab = ipa_attention_core(qcat, kcat, vcat, pairwise, w_pb_scaled,
                              mask_col, mask_row)

    W1 = h * (dvs + dvp * 3)
    ov = slab[..., :W1].reshape(b, n, h, dvs + dvp * 3)
    res_s = ov[..., :dvs].reshape(b, n, h * dvs)
    op_g = ov[..., dvs:].reshape(b, n, h, dvp, 3)
    res_pw = slab[..., W1:]                                        # (b, n, h*Dp)

    # back into the local frame (apply R^T), then invariant norm
    rp = op_g - trans
    rp_local = jnp.einsum('bnhdc,bnrc->bnhdr', rp, rotations)
    rp_norm = jnp.sqrt(jnp.sum(rp_local ** 2, axis=-1) + EPS)

    cat = jnp.concatenate([res_s,
                           rp_local.reshape(b, n, h * dvp * 3),
                           rp_norm.reshape(b, n, h * dvp),
                           res_pw], axis=-1)
    out = pallas_linear(cat.reshape(b * n, -1), p['w_out'], p['b_out'])
    return out.reshape(b, n, D)


def ipa_block_forward(layer, x, pairwise, rotations, translations, mask=None):
    # post_norm=True path of IPABlock, plus the fused (dim -> 6) update head
    b, n, D = x.shape
    bp = layer['block']
    attn_out = ipa_forward(bp['ipa'], x, pairwise, rotations, translations, mask)
    xo, upd = ipa_block_post(attn_out.reshape(b * n, D), x.reshape(b * n, D),
                             bp, layer['w_upd'], layer['b_upd'])
    return xo.reshape(b, n, D), upd.reshape(b, n, 6)


# ---------------------------------------------------------------------------
# quaternion / coordinate helpers (plain JAX glue; tiny per-residue math)
# ---------------------------------------------------------------------------
def quaternion_to_matrix(q):
    r, i, j, k = q[..., 0], q[..., 1], q[..., 2], q[..., 3]
    two_s = 2.0 / jnp.sum(q * q, axis=-1)
    o = jnp.stack([
        1 - two_s * (j * j + k * k), two_s * (i * j - k * r), two_s * (i * k + j * r),
        two_s * (i * j + k * r), 1 - two_s * (i * i + k * k), two_s * (j * k - i * r),
        two_s * (i * k - j * r), two_s * (j * k + i * r), 1 - two_s * (i * i + j * j),
    ], axis=-1)
    return o.reshape(q.shape[:-1] + (3, 3))


def quaternion_multiply(a, b):
    aw, ax, ay, az = (a[..., i] for i in range(4))
    bw, bx, by, bz = (b[..., i] for i in range(4))
    ow = aw * bw - ax * bx - ay * by - az * bz
    ox = aw * bx + ax * bw + ay * bz - az * by
    oy = aw * by - ax * bz + ay * bw + az * bx
    oz = aw * bz + ax * by - ay * bx + az * bw
    q = jnp.stack([ow, ox, oy, oz], axis=-1)
    return jnp.where(q[..., :1] < 0, -q, q)  # standardize (real part >= 0), pytorch3d-style


def get_ideal_coords():
    # TODO(synk): exact IgFold ideal-coordinate constants unavailable; using standard
    # idealized backbone geometry for [N, CA, C, CB].
    return jnp.array([
        [-0.5272, 1.3593, 0.0000],
        [0.0000, 0.0000, 0.0000],
        [1.5233, 0.0000, 0.0000],
        [0.0000, -0.7718, -1.2204],
    ], dtype=jnp.float32)


def place_o_coords(bb):
    # TODO(synk): IgFold's place_o_coords implementation unavailable; place the carbonyl O
    # from C / CA and next residue's N with standard geometry. bb: (b, l, 4, 3).
    def unit(v):
        return v / (jnp.sqrt(jnp.sum(v * v, axis=-1, keepdims=True)) + 1e-8)

    N_at, CA, C = bb[:, :, 0], bb[:, :, 1], bb[:, :, 2]
    n_next = jnp.concatenate([N_at[:, 1:], C[:, -1:] + (C[:, -1:] - CA[:, -1:])], axis=1)
    bisector = unit(unit(CA - C) + unit(n_next - C))
    O = C - 1.231 * bisector
    return jnp.concatenate([bb, O[:, :, None, :]], axis=2)


# ---------------------------------------------------------------------------
# IPATransformer forward
# ---------------------------------------------------------------------------
def ipa_transformer_forward(params, single_repr, pairwise_repr,
                            translations=None, quaternions=None, mask=None):
    x = single_repr
    b, n, _ = x.shape
    if quaternions is None:
        quaternions = jnp.broadcast_to(
            jnp.array([1.0, 0.0, 0.0, 0.0], jnp.float32), (b, n, 4))
    if translations is None:
        translations = jnp.zeros((b, n, 3), jnp.float32)

    for layer in params['layers']:
        rotations = quaternion_to_matrix(quaternions)
        x, upd = ipa_block_forward(layer, x, pairwise_repr, rotations, translations, mask)
        quaternion_update, translation_update = upd[..., :3], upd[..., 3:]
        quaternion_update = jnp.concatenate(
            [jnp.ones((b, n, 1), jnp.float32), quaternion_update], axis=-1)  # F.pad((1,0), 1)
        quaternions = quaternion_multiply(quaternions, quaternion_update)
        translations = translations + jnp.einsum('bnc,bncr->bnr', translation_update, rotations)

    ideal = get_ideal_coords()
    ideal_b = jnp.broadcast_to(ideal[None, None], (b, n, ideal.shape[0], 3))
    rotations = quaternion_to_matrix(quaternions)
    points_global = jnp.einsum('bnac,bncd->bnad', ideal_b, rotations) + translations[:, :, None, :]
    points_global = place_o_coords(points_global)
    return points_global, translations, quaternions


# ---------------------------------------------------------------------------
# deterministic parameter init (synthetic; no checkpoint loading)
# ---------------------------------------------------------------------------
def _lin(key, fan_in, fan_out, scale=None):
    if scale is None:
        scale = 1.0 / math.sqrt(fan_in)
    return jax.random.uniform(key, (fan_in, fan_out), jnp.float32, -scale, scale)


def init_params(key, dim, depth, heads=HEADS):
    Dp = dim  # pairwise_repr_dim defaults to dim
    layers = []
    for _ in range(depth):
        key, *ks = jax.random.split(key, 14)
        w_qkv = jnp.concatenate([
            _lin(ks[0], dim, heads * SCALAR_KEY_DIM),
            _lin(ks[1], dim, heads * SCALAR_KEY_DIM),
            _lin(ks[2], dim, heads * SCALAR_VALUE_DIM),
            _lin(ks[3], dim, heads * POINT_KEY_DIM * 3),
            _lin(ks[4], dim, heads * POINT_KEY_DIM * 3),
            _lin(ks[5], dim, heads * POINT_VALUE_DIM * 3),
        ], axis=1)
        ipa = {
            'w_qkv': w_qkv,
            'point_weights': jnp.full((heads,), math.log(math.expm1(1.0)), jnp.float32),
            'w_pb': _lin(ks[6], Dp, heads),
            # b_pb exists in the torch module; it is a per-head constant over keys and thus
            # softmax-invariant, so the kernel folds it out (kept here for fidelity only).
            'b_pb': jnp.zeros((heads,), jnp.float32),
            'w_out': _lin(ks[7], heads * (SCALAR_VALUE_DIM + Dp + POINT_VALUE_DIM * 4), dim),
            'b_out': jnp.zeros((dim,), jnp.float32),
        }
        block = {
            'ipa': ipa,
            'attn_norm_g': jnp.ones((dim,), jnp.float32),
            'attn_norm_b': jnp.zeros((dim,), jnp.float32),
            'ff_w1': _lin(ks[8], dim, dim), 'ff_b1': jnp.zeros((dim,), jnp.float32),
            'ff_w2': _lin(ks[9], dim, dim), 'ff_b2': jnp.zeros((dim,), jnp.float32),
            'ff_w3': _lin(ks[10], dim, dim), 'ff_b3': jnp.zeros((dim,), jnp.float32),
            'ff_norm_g': jnp.ones((dim,), jnp.float32),
            'ff_norm_b': jnp.zeros((dim,), jnp.float32),
        }
        # NOTE: the reference zero-inits this update head; we use small random values so the
        # quaternion / rotation / translation update math is actually exercised.
        layers.append({
            'block': block,
            'w_upd': _lin(ks[11], dim, 6, scale=0.02),
            'b_upd': jnp.zeros((6,), jnp.float32),
        })
    return {'layers': layers}


if __name__ == "__main__":
    B, N, DIM, DEPTH = 2, 8, 32, 2
    root = jax.random.PRNGKey(0)
    k_params, k_x, k_pair = jax.random.split(root, 3)
    params = init_params(k_params, DIM, DEPTH)
    single_repr = jax.random.normal(k_x, (B, N, DIM), jnp.float32)
    pairwise_repr = jax.random.normal(k_pair, (B, N, N, DIM), jnp.float32)

    fwd = jax.jit(ipa_transformer_forward)
    points_global, translations, quaternions = fwd(params, single_repr, pairwise_repr)
    jax.block_until_ready((points_global, translations, quaternions))

    assert points_global.shape == (B, N, 5, 3)
    assert translations.shape == (B, N, 3)
    assert quaternions.shape == (B, N, 4)
    assert bool(jnp.all(jnp.isfinite(points_global)))
    print("KERNEL_OK")
</pallas_src>

<mosaic_0001>
module attributes {stable_mosaic.version = 11 : i64} {
  func.func @_matmul_kernel(%arg0: i32, %arg1: memref<16x32xf32, #tpu.memory_space<vmem>>, %arg2: memref<32x672xf32, #tpu.memory_space<vmem>>, %arg3: memref<16x672xf32, #tpu.memory_space<vmem>>) attributes {dimension_semantics = [#tpu.dimension_semantics<parallel>], iteration_bounds = array<i64: 1>, scalar_prefetch = 0 : i64, scratch_operands = 0 : i64, tpu.core_type = #tpu.core_type<tc>, window_params = [{transform_indices = @transform_0, window_bounds = array<i64: 16, 32>}, {pipeline_mode = #tpu.pipeline_mode<synchronous>, transform_indices = @transform_1, window_bounds = array<i64: 32, 672>}, {transform_indices = @transform_2, window_bounds = array<i64: 16, 672>}]} {
    %c0 = arith.constant 0 : index
    %c0_0 = arith.constant 0 : index
    %0 = vector.load %arg1[%c0, %c0_0] : memref<16x32xf32, #tpu.memory_space<vmem>>, vector<16x32xf32>
    %c0_1 = arith.constant 0 : index
    %c0_2 = arith.constant 0 : index
    %1 = vector.load %arg2[%c0_1, %c0_2] : memref<32x672xf32, #tpu.memory_space<vmem>>, vector<32x672xf32>
    %cst = arith.constant dense<0.000000e+00> : vector<16x672xf32>
    %2 = tpu.matmul %0, %1, %cst {dimension_numbers = #tpu.dot_dimension_numbers<[1], [0], [0], [1], [0, 0, 1, 1], [], []>} : vector<16x32xf32>, vector<32x672xf32>, vector<16x672xf32> -> vector<16x672xf32>
    %c0_3 = arith.constant 0 : index
    %c0_4 = arith.constant 0 : index
    %3 = vector.load %arg3[%c0_3, %c0_4] : memref<16x672xf32, #tpu.memory_space<vmem>>, vector<16x672xf32>
    tpu.vector_store %arg3[%c0_3, %c0_4], %2 {strides = array<i32>} : memref<16x672xf32, #tpu.memory_space<vmem>>, vector<16x672xf32>,
    return
  }
  func.func @transform_0(%arg0: i32) -> (i32, i32) {
    %c0_i32 = arith.constant 0 : i32
    %c0_i32_0 = arith.constant 0 : i32
    return %arg0, %c0_i32 : i32, i32
  }
  func.func @transform_1(%arg0: i32) -> (i32, i32) {
    %c0_i32 = arith.constant 0 : i32
    %c0_i32_0 = arith.constant 0 : i32
    %c0_i32_1 = arith.constant 0 : i32
    return %c0_i32, %c0_i32_0 : i32, i32
  }
  func.func @transform_2(%arg0: i32) -> (i32, i32) {
    %c0_i32 = arith.constant 0 : i32
    %c0_i32_0 = arith.constant 0 : i32
    return %arg0, %c0_i32 : i32, i32
  }
}

module attributes {stable_mosaic.version = 11 : i64} {
  func.func @_ipa_attn_kernel(%arg0: i32, %arg1: i32, %arg2: memref<1x8x232xf32, #tpu.memory_space<vmem>>, %arg3: memref<1x8x232xf32, #tpu.memory_space<vmem>>, %arg4: memref<1x8x224xf32, #tpu.memory_space<vmem>>, %arg5: memref<1x8x8x32xf32, #tpu.memory_space<vmem>>, %arg6: memref<32x8xf32, #tpu.memory_space<vmem>>, %arg7: memref<1x8x480xf32, #tpu.memory_space<vmem>>) attributes {dimension_semantics = [#tpu.dimension_semantics<parallel>, #tpu.dimension_semantics<parallel>], iteration_bounds = array<i64: 2, 1>, scalar_prefetch = 0 : i64, scratch_operands = 0 : i64, tpu.core_type = #tpu.core_type<tc>, window_params = [{transform_indices = @transform_0, window_bounds = array<i64: 1, 8, 232>}, {transform_indices = @transform_1, window_bounds = array<i64: 1, 8, 232>}, {transform_indices = @transform_2, window_bounds = array<i64: 1, 8, 224>}, {transform_indices = @transform_3, window_bounds = array<i64: 1, 8, 8, 32>}, {pipeline_mode = #tpu.pipeline_mode<synchronous>, transform_indices = @transform_4, window_bounds = array<i64: 32, 8>}, {transform_indices = @transform_5, window_bounds = array<i64: 1, 8, 480>}]} {
    %c0 = arith.constant 0 : index
    %c0_0 = arith.constant 0 : index
    %c0_1 = arith.constant 0 : index
    %c0_2 = arith.constant 0 : index
    %0 = vector.load %arg5[%c0, %c0_0, %c0_1, %c0_2] : memref<1x8x8x32xf32, #tpu.memory_space<vmem>>, vector<1x8x8x32xf32>
    %1 = vector.shape_cast %0 : vector<1x8x8x32xf32> to vector<8x8x32xf32>
    %2 = vector.shape_cast %1 : vector<8x8x32xf32> to vector<64x32xf32>
    %c0_3 = arith.constant 0 : index
    %c0_4 = arith.constant 0 : index
    %3 = vector.load %arg6[%c0_3, %c0_4] : memref<32x8xf32, #tpu.memory_space<vmem>>, vector<32x8xf32>
    %cst = arith.constant dense<0.000000e+00> : vector<64x8xf32>
    %4 = tpu.matmul %2, %3, %cst {dimension_numbers = #tpu.dot_dimension_numbers<[1], [0], [0], [1], [0, 0, 1, 1], [], []>} : vector<64x32xf32>, vector<32x8xf32>, vector<64x8xf32> -> vector<64x8xf32>
    %5 = vector.shape_cast %4 : vector<64x8xf32> to vector<8x8x8xf32>
    %c0_5 = arith.constant 0 : index
    %c0_6 = arith.constant 0 : index
    %c0_7 = arith.constant 0 : index
    %6 = vector.load %arg2[%c0_5, %c0_6, %c0_7] : memref<1x8x232xf32, #tpu.memory_space<vmem>>, vector<1x8x29xf32>
    %7 = vector.shape_cast %6 : vector<1x8x29xf32> to vector<8x29xf32>
    %c0_8 = arith.constant 0 : index
    %c0_9 = arith.constant 0 : index
    %c0_10 = arith.constant 0 : index
    %8 = vector.load %arg3[%c0_8, %c0_9, %c0_10] : memref<1x8x232xf32, #tpu.memory_space<vmem>>, vector<1x8x29xf32>
    %9 = vector.shape_cast %8 : vector<1x8x29xf32> to vector<8x29xf32>
    %10 = tpu.transpose %9, [1, 0] : vector<8x29xf32> -> vector<29x8xf32>
    %cst_11 = arith.constant dense<0.000000e+00> : vector<8x8xf32>
    %11 = tpu.matmul %7, %10, %cst_11 {dimension_numbers = #tpu.dot_dimension_numbers<[1], [0], [0], [1], [0, 0, 1, 1], [], []>} : vector<8x29xf32>, vector<29x8xf32>, vector<8x8xf32> -> vector<8x8xf32>
    %12 = vector.extract_strided_slice %5 {offsets = [0, 0, 0], sizes = [8, 8, 1], strides = [1, 1, 1]} : vector<8x8x8xf32> to vector<8x8x1xf32>
    %13 = vector.shape_cast %12 : vector<8x8x1xf32> to vector<8x8xf32>
    %14 = arith.addf %11, %13 : vector<8x8xf32>
    %cst_12 = arith.constant dense<0xFF800000> : vector<8xf32>
    %15 = vector.multi_reduction <maximumf>, %14, %cst_12 [1] : vector<8x8xf32> to vector<8xf32>
    %16 = vector.shape_cast %15 : vector<8xf32> to vector<8x1xf32>
    %17 = vector.broadcast %16 : vector<8x1xf32> to vector<8x8xf32>
    %18 = arith.subf %14, %17 : vector<8x8xf32>
    %19 = math.exp %18 : vector<8x8xf32>
    %cst_13 = arith.constant dense<0.000000e+00> : vector<8xf32>
    %20 = vector.multi_reduction <add>, %19, %cst_13 [1] : vector<8x8xf32> to vector<8xf32>
    %21 = vector.shape_cast %20 : vector<8xf32> to vector<8x1xf32>
    %22 = tpu.reciprocal %21 {approx = true} : vector<8x1xf32> -> vector<8x1xf32>
    %23 = vector.broadcast %22 : vector<8x1xf32> to vector<8x8xf32>
    %24 = arith.mulf %19, %23 : vector<8x8xf32>
    %c0_14 = arith.constant 0 : index
    %c0_15 = arith.constant 0 : index
    %c0_16 = arith.constant 0 : index
    %25 = vector.load %arg4[%c0_14, %c0_15, %c0_16] : memref<1x8x224xf32, #tpu.memory_space<vmem>>, vector<1x8x28xf32>
    %26 = vector.shape_cast %25 : vector<1x8x28xf32> to vector<8x28xf32>
    %cst_17 = arith.constant dense<0.000000e+00> : vector<8x28xf32>
    %27 = tpu.matmul %24, %26, %cst_17 {dimension_numbers = #tpu.dot_dimension_numbers<[1], [0], [0], [1], [0, 0, 1, 1], [], []>} : vector<8x8xf32>, vector<8x28xf32>, vector<8x28xf32> -> vector<8x28xf32>
    %c0_18 = arith.constant 0 : index
    %c0_19 = arith.constant 0 : index
    %c29 = arith.constant 29 : index
    %28 = vector.load %arg2[%c0_18, %c0_19, %c29] : memref<1x8x232xf32, #tpu.memory_space<vmem>>, vector<1x8x29xf32>
    %29 = vector.shape_cast %28 : vector<1x8x29xf32> to vector<8x29xf32>
    %c0_20 = arith.constant 0 : index
    %c0_21 = arith.constant 0 : index
    %c29_22 = arith.constant 29 : index
    %30 = vector.load %arg3[%c0_20, %c0_21, %c29_22] : memref<1x8x232xf32, #tpu.memory_space<vmem>>, vector<1x8x29xf32>
    %31 = vector.shape_cast %30 : vector<1x8x29xf32> to vector<8x29xf32>
    %32 = tpu.transpose %31, [1, 0] : vector<8x29xf32> -> vector<29x8xf32>
    %cst_23 = arith.constant dense<0.000000e+00> : vector<8x8xf32>
    %33 = tpu.matmul %29, %32, %cst_23 {dimension_numbers = #tpu.dot_dimension_numbers<[1], [0], [0], [1], [0, 0, 1, 1], [], []>} : vector<8x29xf32>, vector<29x8xf32>, vector<8x8xf32> -> vector<8x8xf32>
    %34 = vector.extract_strided_slice %5 {offsets = [0, 0, 1], sizes = [8, 8, 1], strides = [1, 1, 1]} : vector<8x8x8xf32> to vector<8x8x1xf32>
    %35 = vector.shape_cast %34 : vector<8x8x1xf32> to vector<8x8xf32>
    %36 = arith.addf %33, %35 : vector<8x8xf32>
    %cst_24 = arith.constant dense<0xFF800000> : vector<8xf32>
    %37 = vector.multi_reduction <maximumf>, %36, %cst_24 [1] : vector<8x8xf32> to vector<8xf32>
    %38 = vector.shape_cast %37 : vector<8xf32> to vector<8x1xf32>
    %39 = vector.broadcast %38 : vector<8x1xf32> to vector<8x8xf32>
    %40 = arith.subf %36, %39 : vector<8x8xf32>
    %41 = math.exp %40 : vector<8x8xf32>
    %cst_25 = arith.constant dense<0.000000e+00> : vector<8xf32>
    %42 = vector.multi_reduction <add>, %41, %cst_25 [1] : vector<8x8xf32> to vector<8xf32>
    %43 = vector.shape_cast %42 : vector<8xf32> to vector<8x1xf32>
    %44 = tpu.reciprocal %43 {approx = true} : vector<8x1xf32> -> vector<8x1xf32>
    %45 = vector.broadcast %44 : vector<8x1xf32> to vector<8x8xf32>
    %46 = arith.mulf %41, %45 : vector<8x8xf32>
    %c0_26 = arith.constant 0 : index
    %c0_27 = arith.constant 0 : index
    %c28 = arith.constant 28 : index
    %47 = vector.load %arg4[%c0_26, %c0_27, %c28] : memref<1x8x224xf32, #tpu.memory_space<vmem>>, vector<1x8x28xf32>
    %48 = vector.shape_cast %47 : vector<1x8x28xf32> to vector<8x28xf32>
    %cst_28 = arith.constant dense<0.000000e+00> : vector<8x28xf32>
    %49 = tpu.matmul %46, %48, %cst_28 {dimension_numbers = #tpu.dot_dimension_numbers<[1], [0], [0], [1], [0, 0, 1, 1], [], []>} : vector<8x8xf32>, vector<8x28xf32>, vector<8x28xf32> -> vector<8x28xf32>
    %c0_29 = arith.constant 0 : index
    %c0_30 = arith.constant 0 : index
    %c58 = arith.constant 58 : index
    %50 = vector.load %arg2[%c0_29, %c0_30, %c58] : memref<1x8x232xf32, #tpu.memory_space<vmem>>, vector<1x8x29xf32>
    %51 = vector.shape_cast %50 : vector<1x8x29xf32> to vector<8x29xf32>
    %c0_31 = arith.constant 0 : index
    %c0_32 = arith.constant 0 : index
    %c58_33 = arith.constant 58 : index
    %52 = vector.load %arg3[%c0_31, %c0_32, %c58_33] : memref<1x8x232xf32, #tpu.memory_space<vmem>>, vector<1x8x29xf32>
    %53 = vector.shape_cast %52 : vector<1x8x29xf32> to vector<8x29xf32>
    %54 = tpu.transpose %53, [1, 0] : vector<8x29xf32> -> vector<29x8xf32>
    %cst_34 = arith.constant dense<0.000000e+00> : vector<8x8xf32>
    %55 = tpu.matmul %51, %54, %cst_34 {dimension_numbers = #tpu.dot_dimension_numbers<[1], [0], [0], [1], [0, 0, 1, 1], [], []>} : vector<8x29xf32>, vector<29x8xf32>, vector<8x8xf32> -> vector<8x8xf32>
    %56 = vector.extract_strided_slice %5 {offsets = [0, 0, 2], sizes = [8, 8, 1], strides = [1, 1, 1]} : vector<8x8x8xf32> to vector<8x8x1xf32>
    %57 = vector.shape_cast %56 : vector<8x8x1xf32> to vector<8x8xf32>
    %58 = arith.addf %55, %57 : vector<8x8xf32>
    %cst_35 = arith.constant dense<0xFF800000> : vector<8xf32>
    %59 = vector.multi_reduction <maximumf>, %58, %cst_35 [1] : vector<8x8xf32> to vector<8xf32>
    %60 = vector.shape_cast %59 : vector<8xf32> to vector<8x1xf32>
    %61 = vector.broadcast %60 : vector<8x1xf32> to vector<8x8xf32>
    %62 = arith.subf %58, %61 : vector<8x8xf32>
    %63 = math.exp %62 : vector<8x8xf32>
    %cst_36 = arith.constant dense<0.000000e+00> : vector<8xf32>
    %64 = vector.multi_reduction <add>, %63, %cst_36 [1] : vector<8x8xf32> to vector<8xf32>
    %65 = vector.shape_cast %64 : vector<8xf32> to vector<8x1xf32>
    %66 = tpu.reciprocal %65 {approx = true} : vector<8x1xf32> -> vector<8x1xf32>
    %67 = vector.broadcast %66 : vector<8x1xf32> to vector<8x8xf32>
    %68 = arith.mulf %63, %67 : vector<8x8xf32>
    %c0_37 = arith.constant 0 : index
    %c0_38 = arith.constant 0 : index
    %c56 = arith.constant 56 : index
    %69 = vector.load %arg4[%c0_37, %c0_38, %c56] : memref<1x8x224xf32, #tpu.memory_space<vmem>>, vector<1x8x28xf32>
    %70 = vector.shape_cast %69 : vector<1x8x28xf32> to vector<8x28xf32>
    %cst_39 = arith.constant dense<0.000000e+00> : vector<8x28xf32>
    %71 = tpu.matmul %68, %70, %cst_39 {dimension_numbers = #tpu.dot_dimension_numbers<[1], [0], [0], [1], [0, 0, 1, 1], [], []>} : vector<8x8xf32>, vector<8x28xf32>, vector<8x28xf32> -> vector<8x28xf32>
    %c0_40 = arith.constant 0 : index
    %c0_41 = arith.constant 0 : index
    %c87 = arith.constant 87 : index
    %72 = vector.load %arg2[%c0_40, %c0_41, %c87] : memref<1x8x232xf32, #tpu.memory_space<vmem>>, vector<1x8x29xf32>
    %73 = vector.shape_cast %72 : vector<1x8x29xf32> to vector<8x29xf32>
    %c0_42 = arith.constant 0 : index
    %c0_43 = arith.constant 0 : index
    %c87_44 = arith.constant 87 : index
    %74 = vector.load %arg3[%c0_42, %c0_43, %c87_44] : memref<1x8x232xf32, #tpu.memory_space<vmem>>, vector<1x8x29xf32>
    %75 = vector.shape_cast %74 : vector<1x8x29xf32> to vector<8x29xf32>
    %76 = tpu.transpose %75, [1, 0] : vector<8x29xf32> -> vector<29x8xf32>
    %cst_45 = arith.constant dense<0.000000e+00> : vector<8x8xf32>
    %77 = tpu.matmul %73, %76, %cst_45 {dimension_numbers = #tpu.dot_dimension_numbers<[1], [0], [0], [1], [0, 0, 1, 1], [], []>} : vector<8x29xf32>, vector<29x8xf32>, vector<8x8xf32> -> vector<8x8xf32>
    %78 = vector.extract_strided_slice %5 {offsets = [0, 0, 3], sizes = [8, 8, 1], strides = [1, 1, 1]} : vector<8x8x8xf32> to vector<8x8x1xf32>
    %79 = vector.shape_cast %78 : vector<8x8x1xf32> to vector<8x8xf32>
    %80 = arith.addf %77, %79 : vector<8x8xf32>
    %cst_46 = arith.constant dense<0xFF800000> : vector<8xf32>
    %81 = vector.multi_reduction <maximumf>, %80, %cst_46 [1] : vector<8x8xf32> to vector<8xf32>
    %82 = vector.shape_cast %81 : vector<8xf32> to vector<8x1xf32>
    %83 = vector.broadcast %82 : vector<8x1xf32> to vector<8x8xf32>
    %84 = arith.subf %80, %83 : vector<8x8xf32>
    %85 = math.exp %84 : vector<8x8xf32>
    %cst_47 = arith.constant dense<0.000000e+00> : vector<8xf32>
    %86 = vector.multi_reduction <add>, %85, %cst_47 [1] : vector<8x8xf32> to vector<8xf32>
    %87 = vector.shape_cast %86 : vector<8xf32> to vector<8x1xf32>
    %88 = tpu.reciprocal %87 {approx = true} : vector<8x1xf32> -> vector<8x1xf32>
    %89 = vector.broadcast %88 : vector<8x1xf32> to vector<8x8xf32>
    %90 = arith.mulf %85, %89 : vector<8x8xf32>
    %c0_48 = arith.constant 0 : index
    %c0_49 = arith.constant 0 : index
    %c84 = arith.constant 84 : index
    %91 = vector.load %arg4[%c0_48, %c0_49, %c84] : memref<1x8x224xf32, #tpu.memory_space<vmem>>, vector<1x8x28xf32>
    %92 = vector.shape_cast %91 : vector<1x8x28xf32> to vector<8x28xf32>
    %cst_50 = arith.constant dense<0.000000e+00> : vector<8x28xf32>
    %93 = tpu.matmul %90, %92, %cst_50 {dimension_numbers = #tpu.dot_dimension_numbers<[1], [0], [0], [1], [0, 0, 1, 1], [], []>} : vector<8x8xf32>, vector<8x28xf32>, vector<8x28xf32> -> vector<8x28xf32>
    %c0_51 = arith.constant 0 : index
    %c0_52 = arith.constant 0 : index
    %c116 = arith.constant 116 : index
    %94 = vector.load %arg2[%c0_51, %c0_52, %c116] : memref<1x8x232xf32, #tpu.memory_space<vmem>>, vector<1x8x29xf32>
    %95 = vector.shape_cast %94 : vector<1x8x29xf32> to vector<8x29xf32>
    %c0_53 = arith.constant 0 : index
    %c0_54 = arith.constant 0 : index
    %c116_55 = arith.constant 116 : index
    %96 = vector.load %arg3[%c0_53, %c0_54, %c116_55] : memref<1x8x232xf32, #tpu.memory_space<vmem>>, vector<1x8x29xf32>
    %97 = vector.shape_cast %96 : vector<1x8x29xf32> to vector<8x29xf32>
    %98 = tpu.transpose %97, [1, 0] : vector<8x29xf32> -> vector<29x8xf32>
    %cst_56 = arith.constant dense<0.000000e+00> : vector<8x8xf32>
    %99 = tpu.matmul %95, %98, %cst_56 {dimension_numbers = #tpu.dot_dimension_numbers<[1], [0], [0], [1], [0, 0, 1, 1], [], []>} : vector<8x29xf32>, vector<29x8xf32>, vector<8x8xf32> -> vector<8x8xf32>
    %100 = vector.extract_strided_slice %5 {offsets = [0, 0, 4], sizes = [8, 8, 1], strides = [1, 1, 1]} : vector<8x8x8xf32> to vector<8x8x1xf32>
    %101 = vector.shape_cast %100 : vector<8x8x1xf32> to vector<8x8xf32>
    %102 = arith.addf %99, %101 : vector<8x8xf32>
    %cst_57 = arith.constant dense<0xFF800000> : vector<8xf32>
    %103 = vector.multi_reduction <maximumf>, %102, %cst_57 [1] : vector<8x8xf32> to vector<8xf32>
    %104 = vector.shape_cast %103 : vector<8xf32> to vector<8x1xf32>
    %105 = vector.broadcast %104 : vector<8x1xf32> to vector<8x8xf32>
    %106 = arith.subf %102, %105 : vector<8x8xf32>
    %107 = math.exp %106 : vector<8x8xf32>
    %cst_58 = arith.constant dense<0.000000e+00> : vector<8xf32>
    %108 = vector.multi_reduction <add>, %107, %cst_58 [1] : vector<8x8xf32> to vector<8xf32>
    %109 = vector.shape_cast %108 : vector<8xf32> to vector<8x1xf32>
    %110 = tpu.reciprocal %109 {approx = true} : vector<8x1xf32> -> vector<8x1xf32>
    %111 = vector.broadcast %110 : vector<8x1xf32> to vector<8x8xf32>
    %112 = arith.mulf %107, %111 : vector<8x8xf32>
    %c0_59 = arith.constant 0 : index
    %c0_60 = arith.constant 0 : index
    %c112 = arith.constant 112 : index
    %113 = vector.load %arg4[%c0_59, %c0_60, %c112] : memref<1x8x224xf32, #tpu.memory_space<vmem>>, vector<1x8x28xf32>
    %114 = vector.shape_cast %113 : vector<1x8x28xf32> to vector<8x28xf32>
    %cst_61 = arith.constant dense<0.000000e+00> : vector<8x28xf32>
    %115 = tpu.matmul %112, %114, %cst_61 {dimension_numbers = #tpu.dot_dimension_numbers<[1], [0], [0], [1], [0, 0, 1, 1], [], []>} : vector<8x8xf32>, vector<8x28xf32>, vector<8x28xf32> -> vector<8x28xf32>
    %c0_62 = arith.constant 0 : index
    %c0_63 = arith.constant 0 : index
    %c145 = arith.constant 145 : index
    %116 = vector.load %arg2[%c0_62, %c0_63, %c145] : memref<1x8x232xf32, #tpu.memory_space<vmem>>, vector<1x8x29xf32>
    %117 = vector.shape_cast %116 : vector<1x8x29xf32> to vector<8x29xf32>
    %c0_64 = arith.constant 0 : index
    %c0_65 = arith.constant 0 : index
    %c145_66 = arith.constant 145 : index
    %118 = vector.load %arg3[%c0_64, %c0_65, %c145_66] : memref<1x8x232xf32, #tpu.memory_space<vmem>>, vector<1x8x29xf32>
    %119 = vector.shape_cast %118 : vector<1x8x29xf32> to vector<8x29xf32>
    %120 = tpu.transpose %119, [1, 0] : vector<8x29xf32> -> vector<29x8xf32>
    %cst_67 = arith.constant dense<0.000000e+00> : vector<8x8xf32>
    %121 = tpu.matmul %117, %120, %cst_67 {dimension_numbers = #tpu.dot_dimension_numbers<[1], [0], [0], [1], [0, 0, 1, 1], [], []>} : vector<8x29xf32>, vector<29x8xf32>, vector<8x8xf32> -> vector<8x8xf32>
    %122 = vector.extract_strided_slice %5 {offsets = [0, 0, 5], sizes = [8, 8, 1], strides = [1, 1, 1]} : vector<8x8x8xf32> to vector<8x8x1xf32>
    %123 = vector.shape_cast %122 : vector<8x8x1xf32> to vector<8x8xf32>
    %124 = arith.addf %121, %123 : vector<8x8xf32>
    %cst_68 = arith.constant dense<0xFF800000> : vector<8xf32>
    %125 = vector.multi_reduction <maximumf>, %124, %cst_68 [1] : vector<8x8xf32> to vector<8xf32>
    %126 = vector.shape_cast %125 : vector<8xf32> to vector<8x1xf32>
    %127 = vector.broadcast %126 : vector<8x1xf32> to vector<8x8xf32>
    %128 = arith.subf %124, %127 : vector<8x8xf32>
    %129 = math.exp %128 : vector<8x8xf32>
    %cst_69 = arith.constant dense<0.000000e+00> : vector<8xf32>
    %130 = vector.multi_reduction <add>, %129, %cst_69 [1] : vector<8x8xf32> to vector<8xf32>
    %131 = vector.shape_cast %130 : vector<8xf32> to vector<8x1xf32>
    %132 = tpu.reciprocal %131 {approx = true} : vector<8x1xf32> -> vector<8x1xf32>
    %133 = vector.broadcast %132 : vector<8x1xf32> to vector<8x8xf32>
    %134 = arith.mulf %129, %133 : vector<8x8xf32>
    %c0_70 = arith.constant 0 : index
    %c0_71 = arith.constant 0 : index
    %c140 = arith.constant 140 : index
    %135 = vector.load %arg4[%c0_70, %c0_71, %c140] : memref<1x8x224xf32, #tpu.memory_space<vmem>>, vector<1x8x28xf32>
    %136 = vector.shape_cast %135 : vector<1x8x28xf32> to vector<8x28xf32>
    %cst_72 = arith.constant dense<0.000000e+00> : vector<8x28xf32>
    %137 = tpu.matmul %134, %136, %cst_72 {dimension_numbers = #tpu.dot_dimension_numbers<[1], [0], [0], [1], [0, 0, 1, 1], [], []>} : vector<8x8xf32>, vector<8x28xf32>, vector<8x28xf32> -> vector<8x28xf32>
    %c0_73 = arith.constant 0 : index
    %c0_74 = arith.constant 0 : index
    %c174 = arith.constant 174 : index
    %138 = vector.load %arg2[%c0_73, %c0_74, %c174] : memref<1x8x232xf32, #tpu.memory_space<vmem>>, vector<1x8x29xf32>
    %139 = vector.shape_cast %138 : vector<1x8x29xf32> to vector<8x29xf32>
    %c0_75 = arith.constant 0 : index
    %c0_76 = arith.constant 0 : index
    %c174_77 = arith.constant 174 : index
    %140 = vector.load %arg3[%c0_75, %c0_76, %c174_77] : memref<1x8x232xf32, #tpu.memory_space<vmem>>, vector<1x8x29xf32>
    %141 = vector.shape_cast %140 : vector<1x8x29xf32> to vector<8x29xf32>
    %142 = tpu.transpose %141, [1, 0] : vector<8x29xf32> -> vector<29x8xf32>
    %cst_78 = arith.constant dense<0.000000e+00> : vector<8x8xf32>
    %143 = tpu.matmul %139, %142, %cst_78 {dimension_numbers = #tpu.dot_dimension_numbers<[1], [0], [0], [1], [0, 0, 1, 1], [], []>} : vector<8x29xf32>, vector<29x8xf32>, vector<8x8xf32> -> vector<8x8xf32>
    %144 = vector.extract_strided_slice %5 {offsets = [0, 0, 6], sizes = [8, 8, 1], strides = [1, 1, 1]} : vector<8x8x8xf32> to vector<8x8x1xf32>
    %145 = vector.shape_cast %144 : vector<8x8x1xf32> to vector<8x8xf32>
    %146 = arith.addf %143, %145 : vector<8x8xf32>
    %cst_79 = arith.constant dense<0xFF800000> : vector<8xf32>
    %147 = vector.multi_reduction <maximumf>, %146, %cst_79 [1] : vector<8x8xf32> to vector<8xf32>
    %148 = vector.shape_cast %147 : vector<8xf32> to vector<8x1xf32>
    %149 = vector.broadcast %148 : vector<8x1xf32> to vector<8x8xf32>
    %150 = arith.subf %146, %149 : vector<8x8xf32>
    %151 = math.exp %150 : vector<8x8xf32>
    %cst_80 = arith.constant dense<0.000000e+00> : vector<8xf32>
    %152 = vector.multi_reduction <add>, %151, %cst_80 [1] : vector<8x8xf32> to vector<8xf32>
    %153 = vector.shape_cast %152 : vector<8xf32> to vector<8x1xf32>
    %154 = tpu.reciprocal %153 {approx = true} : vector<8x1xf32> -> vector<8x1xf32>
    %155 = vector.broadcast %154 : vector<8x1xf32> to vector<8x8xf32>
    %156 = arith.mulf %151, %155 : vector<8x8xf32>
    %c0_81 = arith.constant 0 : index
    %c0_82 = arith.constant 0 : index
    %c168 = arith.constant 168 : index
    %157 = vector.load %arg4[%c0_81, %c0_82, %c168] : memref<1x8x224xf32, #tpu.memory_space<vmem>>, vector<1x8x28xf32>
    %158 = vector.shape_cast %157 : vector<1x8x28xf32> to vector<8x28xf32>
    %cst_83 = arith.constant dense<0.000000e+00> : vector<8x28xf32>
    %159 = tpu.matmul %156, %158, %cst_83 {dimension_numbers = #tpu.dot_dimension_numbers<[1], [0], [0], [1], [0, 0, 1, 1], [], []>} : vector<8x8xf32>, vector<8x28xf32>, vector<8x28xf32> -> vector<8x28xf32>
    %c0_84 = arith.constant 0 : index
    %c0_85 = arith.constant 0 : index
    %c203 = arith.constant 203 : index
    %160 = vector.load %arg2[%c0_84, %c0_85, %c203] : memref<1x8x232xf32, #tpu.memory_space<vmem>>, vector<1x8x29xf32>
    %161 = vector.shape_cast %160 : vector<1x8x29xf32> to vector<8x29xf32>
    %c0_86 = arith.constant 0 : index
    %c0_87 = arith.constant 0 : index
    %c203_88 = arith.constant 203 : index
    %162 = vector.load %arg3[%c0_86, %c0_87, %c203_88] : memref<1x8x232xf32, #tpu.memory_space<vmem>>, vector<1x8x29xf32>
    %163 = vector.shape_cast %162 : vector<1x8x29xf32> to vector<8x29xf32>
    %164 = tpu.transpose %163, [1, 0] : vector<8x29xf32> -> vector<29x8xf32>
    %cst_89 = arith.constant dense<0.000000e+00> : vector<8x8xf32>
    %165 = tpu.matmul %161, %164, %cst_89 {dimension_numbers = #tpu.dot_dimension_numbers<[1], [0], [0], [1], [0, 0, 1, 1], [], []>} : vector<8x29xf32>, vector<29x8xf32>, vector<8x8xf32> -> vector<8x8xf32>
    %166 = vector.extract_strided_slice %5 {offsets = [0, 0, 7], sizes = [8, 8, 1], strides = [1, 1, 1]} : vector<8x8x8xf32> to vector<8x8x1xf32>
    %167 = vector.shape_cast %166 : vector<8x8x1xf32> to vector<8x8xf32>
    %168 = arith.addf %165, %167 : vector<8x8xf32>
    %cst_90 = arith.constant dense<0xFF800000> : vector<8xf32>
    %169 = vector.multi_reduction <maximumf>, %168, %cst_90 [1] : vector<8x8xf32> to vector<8xf32>
    %170 = vector.shape_cast %169 : vector<8xf32> to vector<8x1xf32>
    %171 = vector.broadcast %170 : vector<8x1xf32> to vector<8x8xf32>
    %172 = arith.subf %168, %171 : vector<8x8xf32>
    %173 = math.exp %172 : vector<8x8xf32>
    %cst_91 = arith.constant dense<0.000000e+00> : vector<8xf32>
    %174 = vector.multi_reduction <add>, %173, %cst_91 [1] : vector<8x8xf32> to vector<8xf32>
    %175 = vector.shape_cast %174 : vector<8xf32> to vector<8x1xf32>
    %176 = tpu.reciprocal %175 {approx = true} : vector<8x1xf32> -> vector<8x1xf32>
    %177 = vector.broadcast %176 : vector<8x1xf32> to vector<8x8xf32>
    %178 = arith.mulf %173, %177 : vector<8x8xf32>
    %c0_92 = arith.constant 0 : index
    %c0_93 = arith.constant 0 : index
    %c196 = arith.constant 196 : index
    %179 = vector.load %arg4[%c0_92, %c0_93, %c196] : memref<1x8x224xf32, #tpu.memory_space<vmem>>, vector<1x8x28xf32>
    %180 = vector.shape_cast %179 : vector<1x8x28xf32> to vector<8x28xf32>
    %cst_94 = arith.constant dense<0.000000e+00> : vector<8x28xf32>
    %181 = tpu.matmul %178, %180, %cst_94 {dimension_numbers = #tpu.dot_dimension_numbers<[1], [0], [0], [1], [0, 0, 1, 1], [], []>} : vector<8x8xf32>, vector<8x28xf32>, vector<8x28xf32> -> vector<8x28xf32>
    %182 = tpu.concatenate %27, %49, %71, %93, %115, %137, %159, %181 in 1 : vector<8x28xf32>, vector<8x28xf32>, vector<8x28xf32>, vector<8x28xf32>, vector<8x28xf32>, vector<8x28xf32>, vector<8x28xf32>, vector<8x28xf32> -> vector<8x224xf32>
    %183 = tpu.concatenate %24, %46, %68, %90, %112, %134, %156, %178 in 1 : vector<8x8xf32>, vector<8x8xf32>, vector<8x8xf32>, vector<8x8xf32>, vector<8x8xf32>, vector<8x8xf32>, vector<8x8xf32>, vector<8x8xf32> -> vector<8x64xf32>
    %184 = vector.shape_cast %183 : vector<8x64xf32> to vector<8x8x8xf32>
    %cst_95 = arith.constant dense<0.000000e+00> : vector<8x8x32xf32>
    %185 = tpu.matmul %184, %1, %cst_95 {dimension_numbers = #tpu.dot_dimension_numbers<[2], [1], [1], [2], [0, 0, 0, 1, 1, 2], [0], [0]>} : vector<8x8x8xf32>, vector<8x8x32xf32>, vector<8x8x32xf32> -> vector<8x8x32xf32>
    %186 = vector.shape_cast %185 : vector<8x8x32xf32> to vector<8x256xf32>
    %187 = tpu.concatenate %182, %186 in 1 : vector<8x224xf32>, vector<8x256xf32> -> vector<8x480xf32>
    %c0_96 = arith.constant 0 : index
    %c0_97 = arith.constant 0 : index
    %c0_98 = arith.constant 0 : index
    %188 = vector.load %arg7[%c0_96, %c0_97, %c0_98] : memref<1x8x480xf32, #tpu.memory_space<vmem>>, vector<1x8x480xf32>
    %189 = vector.shape_cast %188 : vector<1x8x480xf32> to vector<8x480xf32>
    %190 = vector.shape_cast %187 : vector<8x480xf32> to vector<1x8x480xf32>
    tpu.vector_store %arg7[%c0_96, %c0_97, %c0_98], %190 {strides = array<i32>} : memref<1x8x480xf32, #tpu.memory_space<vmem>>, vector<1x8x480xf32>,
    return
  }
  func.func @transform_0(%arg0: i32, %arg1: i32) -> (i32, i32, i32) {
    %c0_i32 = arith.constant 0 : i32
    %c0_i32_0 = arith.constant 0 : i32
    return %arg0, %arg1, %c0_i32 : i32, i32, i32
  }
  func.func @transform_1(%arg0: i32, %arg1: i32) -> (i32, i32, i32) {
    %c0_i32 = arith.constant 0 : i32
    %c0_i32_0 = arith.constant 0 : i32
    %c0_i32_1 = arith.constant 0 : i32
    return %arg0, %c0_i32, %c0_i32_0 : i32, i32, i32
  }
  func.func @transform_2(%arg0: i32, %arg1: i32) -> (i32, i32, i32) {
    %c0_i32 = arith.constant 0 : i32
    %c0_i32_0 = arith.constant 0 : i32
    %c0_i32_1 = arith.constant 0 : i32
    return %arg0, %c0_i32, %c0_i32_0 : i32, i32, i32
  }
  func.func @transform_3(%arg0: i32, %arg1: i32) -> (i32, i32, i32, i32) {
    %c0_i32 = arith.constant 0 : i32
    %c0_i32_0 = arith.constant 0 : i32
    %c0_i32_1 = arith.constant 0 : i32
    return %arg0, %arg1, %c0_i32, %c0_i32_0 : i32, i32, i32, i32
  }
  func.func @transform_4(%arg0: i32, %arg1: i32) -> (i32, i32) {
    %c0_i32 = arith.constant 0 : i32
    %c0_i32_0 = arith.constant 0 : i32
    %c0_i32_1 = arith.constant 0 : i32
    return %c0_i32, %c0_i32_0 : i32, i32
  }
  func.func @transform_5(%arg0: i32, %arg1: i32) -> (i32, i32, i32) {
    %c0_i32 = arith.constant 0 : i32
    %c0_i32_0 = arith.constant 0 : i32
    return %arg0, %arg1, %c0_i32 : i32, i32, i32
  }
}

module attributes {stable_mosaic.version = 11 : i64} {
  func.func @_ipa_block_post_kernel(%arg0: i32, %arg1: memref<16x32xf32, #tpu.memory_space<vmem>>, %arg2: memref<16x32xf32, #tpu.memory_space<vmem>>, %arg3: memref<1x32xf32, #tpu.memory_space<vmem>>, %arg4: memref<1x32xf32, #tpu.memory_space<vmem>>, %arg5: memref<32x32xf32, #tpu.memory_space<vmem>>, %arg6: memref<1x32xf32, #tpu.memory_space<vmem>>, %arg7: memref<32x32xf32, #tpu.memory_space<vmem>>, %arg8: memref<1x32xf32, #tpu.memory_space<vmem>>, %arg9: memref<32x32xf32, #tpu.memory_space<vmem>>, %arg10: memref<1x32xf32, #tpu.memory_space<vmem>>, %arg11: memref<1x32xf32, #tpu.memory_space<vmem>>, %arg12: memref<1x32xf32, #tpu.memory_space<vmem>>, %arg13: memref<32x6xf32, #tpu.memory_space<vmem>>, %arg14: memref<1x6xf32, #tpu.memory_space<vmem>>, %arg15: memref<16x32xf32, #tpu.memory_space<vmem>>, %arg16: memref<16x6xf32, #tpu.memory_space<vmem>>) attributes {dimension_semantics = [#tpu.dimension_semantics<parallel>], iteration_bounds = array<i64: 1>, scalar_prefetch = 0 : i64, scratch_operands = 0 : i64, tpu.core_type = #tpu.core_type<tc>, window_params = [{transform_indices = @transform_0, window_bounds = array<i64: 16, 32>}, {transform_indices = @transform_1, window_bounds = array<i64: 16, 32>}, {pipeline_mode = #tpu.pipeline_mode<synchronous>, transform_indices = @transform_2, window_bounds = array<i64: 1, 32>}, {pipeline_mode = #tpu.pipeline_mode<synchronous>, transform_indices = @transform_3, window_bounds = array<i64: 1, 32>}, {pipeline_mode = #tpu.pipeline_mode<synchronous>, transform_indices = @transform_4, window_bounds = array<i64: 32, 32>}, {pipeline_mode = #tpu.pipeline_mode<synchronous>, transform_indices = @transform_5, window_bounds = array<i64: 1, 32>}, {pipeline_mode = #tpu.pipeline_mode<synchronous>, transform_indices = @transform_6, window_bounds = array<i64: 32, 32>}, {pipeline_mode = #tpu.pipeline_mode<synchronous>, transform_indices = @transform_7, window_bounds = array<i64: 1, 32>}, {pipeline_mode = #tpu.pipeline_mode<synchronous>, transform_indices = @transform_8, window_bounds = array<i64: 32, 32>}, {pipeline_mode = #tpu.pipeline_mode<synchronous>, transform_indices = @transform_9, window_bounds = array<i64: 1, 32>}, {pipeline_mode = #tpu.pipeline_mode<synchronous>, transform_indices = @transform_10, window_bounds = array<i64: 1, 32>}, {pipeline_mode = #tpu.pipeline_mode<synchronous>, transform_indices = @transform_11, window_bounds = array<i64: 1, 32>}, {pipeline_mode = #tpu.pipeline_mode<synchronous>, transform_indices = @transform_12, window_bounds = array<i64: 32, 6>}, {pipeline_mode = #tpu.pipeline_mode<synchronous>, transform_indices = @transform_13, window_bounds = array<i64: 1, 6>}, {transform_indices = @transform_14, window_bounds = array<i64: 16, 32>}, {transform_indices = @transform_15, window_bounds = array<i64: 16, 6>}]} {
    %c0 = arith.constant 0 : index
    %c0_0 = arith.constant 0 : index
    %0 = vector.load %arg1[%c0, %c0_0] : memref<16x32xf32, #tpu.memory_space<vmem>>, vector<16x32xf32>
    %c0_1 = arith.constant 0 : index
    %c0_2 = arith.constant 0 : index
    %1 = vector.load %arg2[%c0_1, %c0_2] : memref<16x32xf32, #tpu.memory_space<vmem>>, vector<16x32xf32>
    %2 = arith.addf %0, %1 : vector<16x32xf32>
    %cst = arith.constant dense<0.000000e+00> : vector<16xf32>
    %3 = vector.multi_reduction <add>, %2, %cst [1] : vector<16x32xf32> to vector<16xf32>
    %4 = vector.shape_cast %3 : vector<16xf32> to vector<16x1xf32>
    %cst_3 = arith.constant 3.200000e+01 : f32
    %5 = vector.broadcast %cst_3 : f32 to vector<16x1xf32>
    %6 = arith.divf %4, %5 : vector<16x1xf32>
    %7 = vector.broadcast %6 : vector<16x1xf32> to vector<16x32xf32>
    %8 = arith.subf %2, %7 : vector<16x32xf32>
    %9 = arith.mulf %8, %8 : vector<16x32xf32>
    %cst_4 = arith.constant dense<0.000000e+00> : vector<16xf32>
    %10 = vector.multi_reduction <add>, %9, %cst_4 [1] : vector<16x32xf32> to vector<16xf32>
    %11 = vector.shape_cast %10 : vector<16xf32> to vector<16x1xf32>
    %cst_5 = arith.constant 3.200000e+01 : f32
    %12 = vector.broadcast %cst_5 : f32 to vector<16x1xf32>
    %13 = arith.divf %11, %12 : vector<16x1xf32>
    %cst_6 = arith.constant 9.99999974E-6 : f32
    %14 = vector.broadcast %cst_6 : f32 to vector<16x1xf32>
    %15 = arith.addf %13, %14 : vector<16x1xf32>
    %16 = math.rsqrt %15 : vector<16x1xf32>
    %17 = vector.broadcast %16 : vector<16x1xf32> to vector<16x32xf32>
    %18 = arith.mulf %8, %17 : vector<16x32xf32>
    %c0_7 = arith.constant 0 : index
    %c0_8 = arith.constant 0 : index
    %19 = vector.load %arg3[%c0_7, %c0_8] : memref<1x32xf32, #tpu.memory_space<vmem>>, vector<1x32xf32>
    %20 = vector.broadcast %19 : vector<1x32xf32> to vector<16x32xf32>
    %21 = arith.mulf %18, %20 : vector<16x32xf32>
    %c0_9 = arith.constant 0 : index
    %c0_10 = arith.constant 0 : index
    %22 = vector.load %arg4[%c0_9, %c0_10] : memref<1x32xf32, #tpu.memory_space<vmem>>, vector<1x32xf32>
    %23 = vector.broadcast %22 : vector<1x32xf32> to vector<16x32xf32>
    %24 = arith.addf %21, %23 : vector<16x32xf32>
    %c0_11 = arith.constant 0 : index
    %c0_12 = arith.constant 0 : index
    %25 = vector.load %arg5[%c0_11, %c0_12] : memref<32x32xf32, #tpu.memory_space<vmem>>, vector<32x32xf32>
    %cst_13 = arith.constant dense<0.000000e+00> : vector<16x32xf32>
    %26 = tpu.matmul %24, %25, %cst_13 {dimension_numbers = #tpu.dot_dimension_numbers<[1], [0], [0], [1], [0, 0, 1, 1], [], []>} : vector<16x32xf32>, vector<32x32xf32>, vector<16x32xf32> -> vector<16x32xf32>
    %c0_14 = arith.constant 0 : index
    %c0_15 = arith.constant 0 : index
    %27 = vector.load %arg6[%c0_14, %c0_15] : memref<1x32xf32, #tpu.memory_space<vmem>>, vector<1x32xf32>
    %28 = vector.broadcast %27 : vector<1x32xf32> to vector<16x32xf32>
    %29 = arith.addf %26, %28 : vector<16x32xf32>
    %cst_16 = arith.constant 0.000000e+00 : f32
    %30 = vector.broadcast %cst_16 : f32 to vector<16x32xf32>
    %31 = arith.maximumf %29, %30 : vector<16x32xf32>
    %c0_17 = arith.constant 0 : index
    %c0_18 = arith.constant 0 : index
    %32 = vector.load %arg7[%c0_17, %c0_18] : memref<32x32xf32, #tpu.memory_space<vmem>>, vector<32x32xf32>
    %cst_19 = arith.constant dense<0.000000e+00> : vector<16x32xf32>
    %33 = tpu.matmul %31, %32, %cst_19 {dimension_numbers = #tpu.dot_dimension_numbers<[1], [0], [0], [1], [0, 0, 1, 1], [], []>} : vector<16x32xf32>, vector<32x32xf32>, vector<16x32xf32> -> vector<16x32xf32>
    %c0_20 = arith.constant 0 : index
    %c0_21 = arith.constant 0 : index
    %34 = vector.load %arg8[%c0_20, %c0_21] : memref<1x32xf32, #tpu.memory_space<vmem>>, vector<1x32xf32>
    %35 = vector.broadcast %34 : vector<1x32xf32> to vector<16x32xf32>
    %36 = arith.addf %33, %35 : vector<16x32xf32>
    %cst_22 = arith.constant 0.000000e+00 : f32
    %37 = vector.broadcast %cst_22 : f32 to vector<16x32xf32>
    %38 = arith.maximumf %36, %37 : vector<16x32xf32>
    %c0_23 = arith.constant 0 : index
    %c0_24 = arith.constant 0 : index
    %39 = vector.load %arg9[%c0_23, %c0_24] : memref<32x32xf32, #tpu.memory_space<vmem>>, vector<32x32xf32>
    %cst_25 = arith.constant dense<0.000000e+00> : vector<16x32xf32>
    %40 = tpu.matmul %38, %39, %cst_25 {dimension_numbers = #tpu.dot_dimension_numbers<[1], [0], [0], [1], [0, 0, 1, 1], [], []>} : vector<16x32xf32>, vector<32x32xf32>, vector<16x32xf32> -> vector<16x32xf32>
    %c0_26 = arith.constant 0 : index
    %c0_27 = arith.constant 0 : index
    %41 = vector.load %arg10[%c0_26, %c0_27] : memref<1x32xf32, #tpu.memory_space<vmem>>, vector<1x32xf32>
    %42 = vector.broadcast %41 : vector<1x32xf32> to vector<16x32xf32>
    %43 = arith.addf %40, %42 : vector<16x32xf32>
    %44 = arith.addf %43, %24 : vector<16x32xf32>
    %cst_28 = arith.constant dense<0.000000e+00> : vector<16xf32>
    %45 = vector.multi_reduction <add>, %44, %cst_28 [1] : vector<16x32xf32> to vector<16xf32>
    %46 = vector.shape_cast %45 : vector<16xf32> to vector<16x1xf32>
    %cst_29 = arith.constant 3.200000e+01 : f32
    %47 = vector.broadcast %cst_29 : f32 to vector<16x1xf32>
    %48 = arith.divf %46, %47 : vector<16x1xf32>
    %49 = vector.broadcast %48 : vector<16x1xf32> to vector<16x32xf32>
    %50 = arith.subf %44, %49 : vector<16x32xf32>
    %51 = arith.mulf %50, %50 : vector<16x32xf32>
    %cst_30 = arith.constant dense<0.000000e+00> : vector<16xf32>
    %52 = vector.multi_reduction <add>, %51, %cst_30 [1] : vector<16x32xf32> to vector<16xf32>
    %53 = vector.shape_cast %52 : vector<16xf32> to vector<16x1xf32>
    %cst_31 = arith.constant 3.200000e+01 : f32
    %54 = vector.broadcast %cst_31 : f32 to vector<16x1xf32>
    %55 = arith.divf %53, %54 : vector<16x1xf32>
    %cst_32 = arith.constant 9.99999974E-6 : f32
    %56 = vector.broadcast %cst_32 : f32 to vector<16x1xf32>
    %57 = arith.addf %55, %56 : vector<16x1xf32>
    %58 = math.rsqrt %57 : vector<16x1xf32>
    %59 = vector.broadcast %58 : vector<16x1xf32> to vector<16x32xf32>
    %60 = arith.mulf %50, %59 : vector<16x32xf32>
    %c0_33 = arith.constant 0 : index
    %c0_34 = arith.constant 0 : index
    %61 = vector.load %arg11[%c0_33, %c0_34] : memref<1x32xf32, #tpu.memory_space<vmem>>, vector<1x32xf32>
    %62 = vector.broadcast %61 : vector<1x32xf32> to vector<16x32xf32>
    %63 = arith.mulf %60, %62 : vector<16x32xf32>
    %c0_35 = arith.constant 0 : index
    %c0_36 = arith.constant 0 : index
    %64 = vector.load %arg12[%c0_35, %c0_36] : memref<1x32xf32, #tpu.memory_space<vmem>>, vector<1x32xf32>
    %65 = vector.broadcast %64 : vector<1x32xf32> to vector<16x32xf32>
    %66 = arith.addf %63, %65 : vector<16x32xf32>
    %c0_37 = arith.constant 0 : index
    %c0_38 = arith.constant 0 : index
    %67 = vector.load %arg15[%c0_37, %c0_38] : memref<16x32xf32, #tpu.memory_space<vmem>>, vector<16x32xf32>
    tpu.vector_store %arg15[%c0_37, %c0_38], %66 {strides = array<i32>} : memref<16x32xf32, #tpu.memory_space<vmem>>, vector<16x32xf32>,
    %c0_39 = arith.constant 0 : index
    %c0_40 = arith.constant 0 : index
    %68 = vector.load %arg13[%c0_39, %c0_40] : memref<32x6xf32, #tpu.memory_space<vmem>>, vector<32x6xf32>
    %cst_41 = arith.constant dense<0.000000e+00> : vector<16x6xf32>
    %69 = tpu.matmul %66, %68, %cst_41 {dimension_numbers = #tpu.dot_dimension_numbers<[1], [0], [0], [1], [0, 0, 1, 1], [], []>} : vector<16x32xf32>, vector<32x6xf32>, vector<16x6xf32> -> vector<16x6xf32>
    %c0_42 = arith.constant 0 : index
    %c0_43 = arith.constant 0 : index
    %70 = vector.load %arg14[%c0_42, %c0_43] : memref<1x6xf32, #tpu.memory_space<vmem>>, vector<1x6xf32>
    %71 = vector.broadcast %70 : vector<1x6xf32> to vector<16x6xf32>
    %72 = arith.addf %69, %71 : vector<16x6xf32>
    %c0_44 = arith.constant 0 : index
    %c0_45 = arith.constant 0 : index
    %73 = vector.load %arg16[%c0_44, %c0_45] : memref<16x6xf32, #tpu.memory_space<vmem>>, vector<16x6xf32>
    tpu.vector_store %arg16[%c0_44, %c0_45], %72 {strides = array<i32>} : memref<16x6xf32, #tpu.memory_space<vmem>>, vector<16x6xf32>,
    return
  }
  func.func @transform_0(%arg0: i32) -> (i32, i32) {
    %c0_i32 = arith.constant 0 : i32
    %c0_i32_0 = arith.constant 0 : i32
    return %arg0, %c0_i32 : i32, i32
  }
  func.func @transform_1(%arg0: i32) -> (i32, i32) {
    %c0_i32 = arith.constant 0 : i32
    %c0_i32_0 = arith.constant 0 : i32
    return %arg0, %c0_i32 : i32, i32
  }
  func.func @transform_2(%arg0: i32) -> (i32, i32) {
    %c0_i32 = arith.constant 0 : i32
    %c0_i32_0 = arith.constant 0 : i32
    %c0_i32_1 = arith.constant 0 : i32
    return %c0_i32, %c0_i32_0 : i32, i32
  }
  func.func @transform_3(%arg0: i32) -> (i32, i32) {
    %c0_i32 = arith.constant 0 : i32
    %c0_i32_0 = arith.constant 0 : i32
    %c0_i32_1 = arith.constant 0 : i32
    return %c0_i32, %c0_i32_0 : i32, i32
  }
  func.func @transform_4(%arg0: i32) -> (i32, i32) {
    %c0_i32 = arith.constant 0 : i32
    %c0_i32_0 = arith.constant 0 : i32
    %c0_i32_1 = arith.constant 0 : i32
    return %c0_i32, %c0_i32_0 : i32, i32
  }
  func.func @transform_5(%arg0: i32) -> (i32, i32) {
    %c0_i32 = arith.constant 0 : i32
    %c0_i32_0 = arith.constant 0 : i32
    %c0_i32_1 = arith.constant 0 : i32
    return %c0_i32, %c0_i32_0 : i32, i32
  }
  func.func @transform_6(%arg0: i32) -> (i32, i32) {
    %c0_i32 = arith.constant 0 : i32
    %c0_i32_0 = arith.constant 0 : i32
    %c0_i32_1 = arith.constant 0 : i32
    return %c0_i32, %c0_i32_0 : i32, i32
  }
  func.func @transform_7(%arg0: i32) -> (i32, i32) {
    %c0_i32 = arith.constant 0 : i32
    %c0_i32_0 = arith.constant 0 : i32
    %c0_i32_1 = arith.constant 0 : i32
    return %c0_i32, %c0_i32_0 : i32, i32
  }
  func.func @transform_8(%arg0: i32) -> (i32, i32) {
    %c0_i32 = arith.constant 0 : i32
    %c0_i32_0 = arith.constant 0 : i32
    %c0_i32_1 = arith.constant 0 : i32
    return %c0_i32, %c0_i32_0 : i32, i32
  }
  func.func @transform_9(%arg0: i32) -> (i32, i32) {
    %c0_i32 = arith.constant 0 : i32
    %c0_i32_0 = arith.constant 0 : i32
    %c0_i32_1 = arith.constant 0 : i32
    return %c0_i32, %c0_i32_0 : i32, i32
  }
  func.func @transform_10(%arg0: i32) -> (i32, i32) {
    %c0_i32 = arith.constant 0 : i32
    %c0_i32_0 = arith.constant 0 : i32
    %c0_i32_1 = arith.constant 0 : i32
    return %c0_i32, %c0_i32_0 : i32, i32
  }
  func.func @transform_11(%arg0: i32) -> (i32, i32) {
    %c0_i32 = arith.constant 0 : i32
    %c0_i32_0 = arith.constant 0 : i32
    %c0_i32_1 = arith.constant 0 : i32
    return %c0_i32, %c0_i32_0 : i32, i32
  }
  func.func @transform_12(%arg0: i32) -> (i32, i32) {
    %c0_i32 = arith.constant 0 : i32
    %c0_i32_0 = arith.constant 0 : i32
    %c0_i32_1 = arith.constant 0 : i32
    return %c0_i32, %c0_i32_0 : i32, i32
  }
  func.func @transform_13(%arg0: i32) -> (i32, i32) {
    %c0_i32 = arith.constant 0 : i32
    %c0_i32_0 = arith.constant 0 : i32
    %c0_i32_1 = arith.constant 0 : i32
    return %c0_i32, %c0_i32_0 : i32, i32
  }
  func.func @transform_14(%arg0: i32) -> (i32, i32) {
    %c0_i32 = arith.constant 0 : i32
    %c0_i32_0 = arith.constant 0 : i32
    return %arg0, %c0_i32 : i32, i32
  }
  func.func @transform_15(%arg0: i32) -> (i32, i32) {
    %c0_i32 = arith.constant 0 : i32
    %c0_i32_0 = arith.constant 0 : i32
    return %arg0, %c0_i32 : i32, i32
  }
}

module attributes {stable_mosaic.version = 11 : i64} {
  func.func @_matmul_bias_kernel(%arg0: i32, %arg1: memref<16x512xf32, #tpu.memory_space<vmem>>, %arg2: memref<512x32xf32, #tpu.memory_space<vmem>>, %arg3: memref<1x32xf32, #tpu.memory_space<vmem>>, %arg4: memref<16x32xf32, #tpu.memory_space<vmem>>) attributes {dimension_semantics = [#tpu.dimension_semantics<parallel>], iteration_bounds = array<i64: 1>, scalar_prefetch = 0 : i64, scratch_operands = 0 : i64, tpu.core_type = #tpu.core_type<tc>, window_params = [{transform_indices = @transform_0, window_bounds = array<i64: 16, 512>}, {pipeline_mode = #tpu.pipeline_mode<synchronous>, transform_indices = @transform_1, window_bounds = array<i64: 512, 32>}, {pipeline_mode = #tpu.pipeline_mode<synchronous>, transform_indices = @transform_2, window_bounds = array<i64: 1, 32>}, {transform_indices = @transform_3, window_bounds = array<i64: 16, 32>}]} {
    %c0 = arith.constant 0 : index
    %c0_0 = arith.constant 0 : index
    %0 = vector.load %arg1[%c0, %c0_0] : memref<16x512xf32, #tpu.memory_space<vmem>>, vector<16x512xf32>
    %c0_1 = arith.constant 0 : index
    %c0_2 = arith.constant 0 : index
    %1 = vector.load %arg2[%c0_1, %c0_2] : memref<512x32xf32, #tpu.memory_space<vmem>>, vector<512x32xf32>
    %cst = arith.constant dense<0.000000e+00> : vector<16x32xf32>
    %2 = tpu.matmul %0, %1, %cst {dimension_numbers = #tpu.dot_dimension_numbers<[1], [0], [0], [1], [0, 0, 1, 1], [], []>} : vector<16x512xf32>, vector<512x32xf32>, vector<16x32xf32> -> vector<16x32xf32>
    %c0_3 = arith.constant 0 : index
    %c0_4 = arith.constant 0 : index
    %3 = vector.load %arg3[%c0_3, %c0_4] : memref<1x32xf32, #tpu.memory_space<vmem>>, vector<1x32xf32>
    %4 = vector.broadcast %3 : vector<1x32xf32> to vector<16x32xf32>
    %5 = arith.addf %2, %4 : vector<16x32xf32>
    %c0_5 = arith.constant 0 : index
    %c0_6 = arith.constant 0 : index
    %6 = vector.load %arg4[%c0_5, %c0_6] : memref<16x32xf32, #tpu.memory_space<vmem>>, vector<16x32xf32>
    tpu.vector_store %arg4[%c0_5, %c0_6], %5 {strides = array<i32>} : memref<16x32xf32, #tpu.memory_space<vmem>>, vector<16x32xf32>,
    return
  }
  func.func @transform_0(%arg0: i32) -> (i32, i32) {
    %c0_i32 = arith.constant 0 : i32
    %c0_i32_0 = arith.constant 0 : i32
    return %arg0, %c0_i32 : i32, i32
  }
  func.func @transform_1(%arg0: i32) -> (i32, i32) {
    %c0_i32 = arith.constant 0 : i32
    %c0_i32_0 = arith.constant 0 : i32
    %c0_i32_1 = arith.constant 0 : i32
    return %c0_i32, %c0_i32_0 : i32, i32
  }
  func.func @transform_2(%arg0: i32) -> (i32, i32) {
    %c0_i32 = arith.constant 0 : i32
    %c0_i32_0 = arith.constant 0 : i32
    %c0_i32_1 = arith.constant 0 : i32
    return %c0_i32, %c0_i32_0 : i32, i32
  }
  func.func @transform_3(%arg0: i32) -> (i32, i32) {
    %c0_i32 = arith.constant 0 : i32
    %c0_i32_0 = arith.constant 0 : i32
    return %arg0, %c0_i32 : i32, i32
  }
}

module attributes {stable_mosaic.version = 11 : i64} {
  func.func @_matmul_kernel(%arg0: i32, %arg1: memref<16x32xf32, #tpu.memory_space<vmem>>, %arg2: memref<32x672xf32, #tpu.memory_space<vmem>>, %arg3: memref<16x672xf32, #tpu.memory_space<vmem>>) attributes {dimension_semantics = [#tpu.dimension_semantics<parallel>], iteration_bounds = array<i64: 1>, scalar_prefetch = 0 : i64, scratch_operands = 0 : i64, tpu.core_type = #tpu.core_type<tc>, window_params = [{transform_indices = @transform_0, window_bounds = array<i64: 16, 32>}, {pipeline_mode = #tpu.pipeline_mode<synchronous>, transform_indices = @transform_1, window_bounds = array<i64: 32, 672>}, {transform_indices = @transform_2, window_bounds = array<i64: 16, 672>}]} {
    %c0 = arith.constant 0 : index
    %c0_0 = arith.constant 0 : index
    %0 = vector.load %arg1[%c0, %c0_0] : memref<16x32xf32, #tpu.memory_space<vmem>>, vector<16x32xf32>
    %c0_1 = arith.constant 0 : index
    %c0_2 = arith.constant 0 : index
    %1 = vector.load %arg2[%c0_1, %c0_2] : memref<32x672xf32, #tpu.memory_space<vmem>>, vector<32x672xf32>
    %cst = arith.constant dense<0.000000e+00> : vector<16x672xf32>
    %2 = tpu.matmul %0, %1, %cst {dimension_numbers = #tpu.dot_dimension_numbers<[1], [0], [0], [1], [0, 0, 1, 1], [], []>} : vector<16x32xf32>, vector<32x672xf32>, vector<16x672xf32> -> vector<16x672xf32>
    %c0_3 = arith.constant 0 : index
    %c0_4 = arith.constant 0 : index
    %3 = vector.load %arg3[%c0_3, %c0_4] : memref<16x672xf32, #tpu.memory_space<vmem>>, vector<16x672xf32>
    tpu.vector_store %arg3[%c0_3, %c0_4], %2 {strides = array<i32>} : memref<16x672xf32, #tpu.memory_space<vmem>>, vector<16x672xf32>,
    return
  }
  func.func @transform_0(%arg0: i32) -> (i32, i32) {
    %c0_i32 = arith.constant 0 : i32
    %c0_i32_0 = arith.constant 0 : i32
    return %arg0, %c0_i32 : i32, i32
  }
  func.func @transform_1(%arg0: i32) -> (i32, i32) {
    %c0_i32 = arith.constant 0 : i32
    %c0_i32_0 = arith.constant 0 : i32
    %c0_i32_1 = arith.constant 0 : i32
    return %c0_i32, %c0_i32_0 : i32, i32
  }
  func.func @transform_2(%arg0: i32) -> (i32, i32) {
    %c0_i32 = arith.constant 0 : i32
    %c0_i32_0 = arith.constant 0 : i32
    return %arg0, %c0_i32 : i32, i32
  }
}

module attributes {stable_mosaic.version = 11 : i64} {
  func.func @_ipa_block_post_kernel(%arg0: i32, %arg1: memref<16x32xf32, #tpu.memory_space<vmem>>, %arg2: memref<16x32xf32, #tpu.memory_space<vmem>>, %arg3: memref<1x32xf32, #tpu.memory_space<vmem>>, %arg4: memref<1x32xf32, #tpu.memory_space<vmem>>, %arg5: memref<32x32xf32, #tpu.memory_space<vmem>>, %arg6: memref<1x32xf32, #tpu.memory_space<vmem>>, %arg7: memref<32x32xf32, #tpu.memory_space<vmem>>, %arg8: memref<1x32xf32, #tpu.memory_space<vmem>>, %arg9: memref<32x32xf32, #tpu.memory_space<vmem>>, %arg10: memref<1x32xf32, #tpu.memory_space<vmem>>, %arg11: memref<1x32xf32, #tpu.memory_space<vmem>>, %arg12: memref<1x32xf32, #tpu.memory_space<vmem>>, %arg13: memref<32x6xf32, #tpu.memory_space<vmem>>, %arg14: memref<1x6xf32, #tpu.memory_space<vmem>>, %arg15: memref<16x32xf32, #tpu.memory_space<vmem>>, %arg16: memref<16x6xf32, #tpu.memory_space<vmem>>) attributes {dimension_semantics = [#tpu.dimension_semantics<parallel>], iteration_bounds = array<i64: 1>, scalar_prefetch = 0 : i64, scratch_operands = 0 : i64, tpu.core_type = #tpu.core_type<tc>, window_params = [{transform_indices = @transform_0, window_bounds = array<i64: 16, 32>}, {transform_indices = @transform_1, window_bounds = array<i64: 16, 32>}, {pipeline_mode = #tpu.pipeline_mode<synchronous>, transform_indices = @transform_2, window_bounds = array<i64: 1, 32>}, {pipeline_mode = #tpu.pipeline_mode<synchronous>, transform_indices = @transform_3, window_bounds = array<i64: 1, 32>}, {pipeline_mode = #tpu.pipeline_mode<synchronous>, transform_indices = @transform_4, window_bounds = array<i64: 32, 32>}, {pipeline_mode = #tpu.pipeline_mode<synchronous>, transform_indices = @transform_5, window_bounds = array<i64: 1, 32>}, {pipeline_mode = #tpu.pipeline_mode<synchronous>, transform_indices = @transform_6, window_bounds = array<i64: 32, 32>}, {pipeline_mode = #tpu.pipeline_mode<synchronous>, transform_indices = @transform_7, window_bounds = array<i64: 1, 32>}, {pipeline_mode = #tpu.pipeline_mode<synchronous>, transform_indices = @transform_8, window_bounds = array<i64: 32, 32>}, {pipeline_mode = #tpu.pipeline_mode<synchronous>, transform_indices = @transform_9, window_bounds = array<i64: 1, 32>}, {pipeline_mode = #tpu.pipeline_mode<synchronous>, transform_indices = @transform_10, window_bounds = array<i64: 1, 32>}, {pipeline_mode = #tpu.pipeline_mode<synchronous>, transform_indices = @transform_11, window_bounds = array<i64: 1, 32>}, {pipeline_mode = #tpu.pipeline_mode<synchronous>, transform_indices = @transform_12, window_bounds = array<i64: 32, 6>}, {pipeline_mode = #tpu.pipeline_mode<synchronous>, transform_indices = @transform_13, window_bounds = array<i64: 1, 6>}, {transform_indices = @transform_14, window_bounds = array<i64: 16, 32>}, {transform_indices = @transform_15, window_bounds = array<i64: 16, 6>}]} {
    %c0 = arith.constant 0 : index
    %c0_0 = arith.constant 0 : index
    %0 = vector.load %arg1[%c0, %c0_0] : memref<16x32xf32, #tpu.memory_space<vmem>>, vector<16x32xf32>
    %c0_1 = arith.constant 0 : index
    %c0_2 = arith.constant 0 : index
    %1 = vector.load %arg2[%c0_1, %c0_2] : memref<16x32xf32, #tpu.memory_space<vmem>>, vector<16x32xf32>
    %2 = arith.addf %0, %1 : vector<16x32xf32>
    %cst = arith.constant dense<0.000000e+00> : vector<16xf32>
    %3 = vector.multi_reduction <add>, %2, %cst [1] : vector<16x32xf32> to vector<16xf32>
    %4 = vector.shape_cast %3 : vector<16xf32> to vector<16x1xf32>
    %cst_3 = arith.constant 3.200000e+01 : f32
    %5 = vector.broadcast %cst_3 : f32 to vector<16x1xf32>
    %6 = arith.divf %4, %5 : vector<16x1xf32>
    %7 = vector.broadcast %6 : vector<16x1xf32> to vector<16x32xf32>
    %8 = arith.subf %2, %7 : vector<16x32xf32>
    %9 = arith.mulf %8, %8 : vector<16x32xf32>
    %cst_4 = arith.constant dense<0.000000e+00> : vector<16xf32>
    %10 = vector.multi_reduction <add>, %9, %cst_4 [1] : vector<16x32xf32> to vector<16xf32>
    %11 = vector.shape_cast %10 : vector<16xf32> to vector<16x1xf32>
    %cst_5 = arith.constant 3.200000e+01 : f32
    %12 = vector.broadcast %cst_5 : f32 to vector<16x1xf32>
    %13 = arith.divf %11, %12 : vector<16x1xf32>
    %cst_6 = arith.constant 9.99999974E-6 : f32
    %14 = vector.broadcast %cst_6 : f32 to vector<16x1xf32>
    %15 = arith.addf %13, %14 : vector<16x1xf32>
    %16 = math.rsqrt %15 : vector<16x1xf32>
    %17 = vector.broadcast %16 : vector<16x1xf32> to vector<16x32xf32>
    %18 = arith.mulf %8, %17 : vector<16x32xf32>
    %c0_7 = arith.constant 0 : index
    %c0_8 = arith.constant 0 : index
    %19 = vector.load %arg3[%c0_7, %c0_8] : memref<1x32xf32, #tpu.memory_space<vmem>>, vector<1x32xf32>
    %20 = vector.broadcast %19 : vector<1x32xf32> to vector<16x32xf32>
    %21 = arith.mulf %18, %20 : vector<16x32xf32>
    %c0_9 = arith.constant 0 : index
    %c0_10 = arith.constant 0 : index
    %22 = vector.load %arg4[%c0_9, %c0_10] : memref<1x32xf32, #tpu.memory_space<vmem>>, vector<1x32xf32>
    %23 = vector.broadcast %22 : vector<1x32xf32> to vector<16x32xf32>
    %24 = arith.addf %21, %23 : vector<16x32xf32>
    %c0_11 = arith.constant 0 : index
    %c0_12 = arith.constant 0 : index
    %25 = vector.load %arg5[%c0_11, %c0_12] : memref<32x32xf32, #tpu.memory_space<vmem>>, vector<32x32xf32>
    %cst_13 = arith.constant dense<0.000000e+00> : vector<16x32xf32>
    %26 = tpu.matmul %24, %25, %cst_13 {dimension_numbers = #tpu.dot_dimension_numbers<[1], [0], [0], [1], [0, 0, 1, 1], [], []>} : vector<16x32xf32>, vector<32x32xf32>, vector<16x32xf32> -> vector<16x32xf32>
    %c0_14 = arith.constant 0 : index
    %c0_15 = arith.constant 0 : index
    %27 = vector.load %arg6[%c0_14, %c0_15] : memref<1x32xf32, #tpu.memory_space<vmem>>, vector<1x32xf32>
    %28 = vector.broadcast %27 : vector<1x32xf32> to vector<16x32xf32>
    %29 = arith.addf %26, %28 : vector<16x32xf32>
    %cst_16 = arith.constant 0.000000e+00 : f32
    %30 = vector.broadcast %cst_16 : f32 to vector<16x32xf32>
    %31 = arith.maximumf %29, %30 : vector<16x32xf32>
    %c0_17 = arith.constant 0 : index
    %c0_18 = arith.constant 0 : index
    %32 = vector.load %arg7[%c0_17, %c0_18] : memref<32x32xf32, #tpu.memory_space<vmem>>, vector<32x32xf32>
    %cst_19 = arith.constant dense<0.000000e+00> : vector<16x32xf32>
    %33 = tpu.matmul %31, %32, %cst_19 {dimension_numbers = #tpu.dot_dimension_numbers<[1], [0], [0], [1], [0, 0, 1, 1], [], []>} : vector<16x32xf32>, vector<32x32xf32>, vector<16x32xf32> -> vector<16x32xf32>
    %c0_20 = arith.constant 0 : index
    %c0_21 = arith.constant 0 : index
    %34 = vector.load %arg8[%c0_20, %c0_21] : memref<1x32xf32, #tpu.memory_space<vmem>>, vector<1x32xf32>
    %35 = vector.broadcast %34 : vector<1x32xf32> to vector<16x32xf32>
    %36 = arith.addf %33, %35 : vector<16x32xf32>
    %cst_22 = arith.constant 0.000000e+00 : f32
    %37 = vector.broadcast %cst_22 : f32 to vector<16x32xf32>
    %38 = arith.maximumf %36, %37 : vector<16x32xf32>
    %c0_23 = arith.constant 0 : index
    %c0_24 = arith.constant 0 : index
    %39 = vector.load %arg9[%c0_23, %c0_24] : memref<32x32xf32, #tpu.memory_space<vmem>>, vector<32x32xf32>
    %cst_25 = arith.constant dense<0.000000e+00> : vector<16x32xf32>
    %40 = tpu.matmul %38, %39, %cst_25 {dimension_numbers = #tpu.dot_dimension_numbers<[1], [0], [0], [1], [0, 0, 1, 1], [], []>} : vector<16x32xf32>, vector<32x32xf32>, vector<16x32xf32> -> vector<16x32xf32>
    %c0_26 = arith.constant 0 : index
    %c0_27 = arith.constant 0 : index
    %41 = vector.load %arg10[%c0_26, %c0_27] : memref<1x32xf32, #tpu.memory_space<vmem>>, vector<1x32xf32>
    %42 = vector.broadcast %41 : vector<1x32xf32> to vector<16x32xf32>
    %43 = arith.addf %40, %42 : vector<16x32xf32>
    %44 = arith.addf %43, %24 : vector<16x32xf32>
    %cst_28 = arith.constant dense<0.000000e+00> : vector<16xf32>
    %45 = vector.multi_reduction <add>, %44, %cst_28 [1] : vector<16x32xf32> to vector<16xf32>
    %46 = vector.shape_cast %45 : vector<16xf32> to vector<16x1xf32>
    %cst_29 = arith.constant 3.200000e+01 : f32
    %47 = vector.broadcast %cst_29 : f32 to vector<16x1xf32>
    %48 = arith.divf %46, %47 : vector<16x1xf32>
    %49 = vector.broadcast %48 : vector<16x1xf32> to vector<16x32xf32>
    %50 = arith.subf %44, %49 : vector<16x32xf32>
    %51 = arith.mulf %50, %50 : vector<16x32xf32>
    %cst_30 = arith.constant dense<0.000000e+00> : vector<16xf32>
    %52 = vector.multi_reduction <add>, %51, %cst_30 [1] : vector<16x32xf32> to vector<16xf32>
    %53 = vector.shape_cast %52 : vector<16xf32> to vector<16x1xf32>
    %cst_31 = arith.constant 3.200000e+01 : f32
    %54 = vector.broadcast %cst_31 : f32 to vector<16x1xf32>
    %55 = arith.divf %53, %54 : vector<16x1xf32>
    %cst_32 = arith.constant 9.99999974E-6 : f32
    %56 = vector.broadcast %cst_32 : f32 to vector<16x1xf32>
    %57 = arith.addf %55, %56 : vector<16x1xf32>
    %58 = math.rsqrt %57 : vector<16x1xf32>
    %59 = vector.broadcast %58 : vector<16x1xf32> to vector<16x32xf32>
    %60 = arith.mulf %50, %59 : vector<16x32xf32>
    %c0_33 = arith.constant 0 : index
    %c0_34 = arith.constant 0 : index
    %61 = vector.load %arg11[%c0_33, %c0_34] : memref<1x32xf32, #tpu.memory_space<vmem>>, vector<1x32xf32>
    %62 = vector.broadcast %61 : vector<1x32xf32> to vector<16x32xf32>
    %63 = arith.mulf %60, %62 : vector<16x32xf32>
    %c0_35 = arith.constant 0 : index
    %c0_36 = arith.constant 0 : index
    %64 = vector.load %arg12[%c0_35, %c0_36] : memref<1x32xf32, #tpu.memory_space<vmem>>, vector<1x32xf32>
    %65 = vector.broadcast %64 : vector<1x32xf32> to vector<16x32xf32>
    %66 = arith.addf %63, %65 : vector<16x32xf32>
    %c0_37 = arith.constant 0 : index
    %c0_38 = arith.constant 0 : index
    %67 = vector.load %arg15[%c0_37, %c0_38] : memref<16x32xf32, #tpu.memory_space<vmem>>, vector<16x32xf32>
    tpu.vector_store %arg15[%c0_37, %c0_38], %66 {strides = array<i32>} : memref<16x32xf32, #tpu.memory_space<vmem>>, vector<16x32xf32>,
    %c0_39 = arith.constant 0 : index
    %c0_40 = arith.constant 0 : index
    %68 = vector.load %arg13[%c0_39, %c0_40] : memref<32x6xf32, #tpu.memory_space<vmem>>, vector<32x6xf32>
    %cst_41 = arith.constant dense<0.000000e+00> : vector<16x6xf32>
    %69 = tpu.matmul %66, %68, %cst_41 {dimension_numbers = #tpu.dot_dimension_numbers<[1], [0], [0], [1], [0, 0, 1, 1], [], []>} : vector<16x32xf32>, vector<32x6xf32>, vector<16x6xf32> -> vector<16x6xf32>
    %c0_42 = arith.constant 0 : index
    %c0_43 = arith.constant 0 : index
    %70 = vector.load %arg14[%c0_42, %c0_43] : memref<1x6xf32, #tpu.memory_space<vmem>>, vector<1x6xf32>
    %71 = vector.broadcast %70 : vector<1x6xf32> to vector<16x6xf32>
    %72 = arith.addf %69, %71 : vector<16x6xf32>
    %c0_44 = arith.constant 0 : index
    %c0_45 = arith.constant 0 : index
    %73 = vector.load %arg16[%c0_44, %c0_45] : memref<16x6xf32, #tpu.memory_space<vmem>>, vector<16x6xf32>
    tpu.vector_store %arg16[%c0_44, %c0_45], %72 {strides = array<i32>} : memref<16x6xf32, #tpu.memory_space<vmem>>, vector<16x6xf32>,
    return
  }
  func.func @transform_0(%arg0: i32) -> (i32, i32) {
    %c0_i32 = arith.constant 0 : i32
    %c0_i32_0 = arith.constant 0 : i32
    return %arg0, %c0_i32 : i32, i32
  }
  func.func @transform_1(%arg0: i32) -> (i32, i32) {
    %c0_i32 = arith.constant 0 : i32
    %c0_i32_0 = arith.constant 0 : i32
    return %arg0, %c0_i32 : i32, i32
  }
  func.func @transform_2(%arg0: i32) -> (i32, i32) {
    %c0_i32 = arith.constant 0 : i32
    %c0_i32_0 = arith.constant 0 : i32
    %c0_i32_1 = arith.constant 0 : i32
    return %c0_i32, %c0_i32_0 : i32, i32
  }
  func.func @transform_3(%arg0: i32) -> (i32, i32) {
    %c0_i32 = arith.constant 0 : i32
    %c0_i32_0 = arith.constant 0 : i32
    %c0_i32_1 = arith.constant 0 : i32
    return %c0_i32, %c0_i32_0 : i32, i32
  }
  func.func @transform_4(%arg0: i32) -> (i32, i32) {
    %c0_i32 = arith.constant 0 : i32
    %c0_i32_0 = arith.constant 0 : i32
    %c0_i32_1 = arith.constant 0 : i32
    return %c0_i32, %c0_i32_0 : i32, i32
  }
  func.func @transform_5(%arg0: i32) -> (i32, i32) {
    %c0_i32 = arith.constant 0 : i32
    %c0_i32_0 = arith.constant 0 : i32
    %c0_i32_1 = arith.constant 0 : i32
    return %c0_i32, %c0_i32_0 : i32, i32
  }
  func.func @transform_6(%arg0: i32) -> (i32, i32) {
    %c0_i32 = arith.constant 0 : i32
    %c0_i32_0 = arith.constant 0 : i32
    %c0_i32_1 = arith.constant 0 : i32
    return %c0_i32, %c0_i32_0 : i32, i32
  }
  func.func @transform_7(%arg0: i32) -> (i32, i32) {
    %c0_i32 = arith.constant 0 : i32
    %c0_i32_0 = arith.constant 0 : i32
    %c0_i32_1 = arith.constant 0 : i32
    return %c0_i32, %c0_i32_0 : i32, i32
  }
  func.func @transform_8(%arg0: i32) -> (i32, i32) {
    %c0_i32 = arith.constant 0 : i32
    %c0_i32_0 = arith.constant 0 : i32
    %c0_i32_1 = arith.constant 0 : i32
    return %c0_i32, %c0_i32_0 : i32, i32
  }
  func.func @transform_9(%arg0: i32) -> (i32, i32) {
    %c0_i32 = arith.constant 0 : i32
    %c0_i32_0 = arith.constant 0 : i32
    %c0_i32_1 = arith.constant 0 : i32
    return %c0_i32, %c0_i32_0 : i32, i32
  }
  func.func @transform_10(%arg0: i32) -> (i32, i32) {
    %c0_i32 = arith.constant 0 : i32
    %c0_i32_0 = arith.constant 0 : i32
    %c0_i32_1 = arith.constant 0 : i32
    return %c0_i32, %c0_i32_0 : i32, i32
  }
  func.func @transform_11(%arg0: i32) -> (i32, i32) {
    %c0_i32 = arith.constant 0 : i32
    %c0_i32_0 = arith.constant 0 : i32
    %c0_i32_1 = arith.constant 0 : i32
    return %c0_i32, %c0_i32_0 : i32, i32
  }
  func.func @transform_12(%arg0: i32) -> (i32, i32) {
    %c0_i32 = arith.constant 0 : i32
    %c0_i32_0 = arith.constant 0 : i32
    %c0_i32_1 = arith.constant 0 : i32
    return %c0_i32, %c0_i32_0 : i32, i32
  }
  func.func @transform_13(%arg0: i32) -> (i32, i32) {
    %c0_i32 = arith.constant 0 : i32
    %c0_i32_0 = arith.constant 0 : i32
    %c0_i32_1 = arith.constant 0 : i32
    return %c0_i32, %c0_i32_0 : i32, i32
  }
  func.func @transform_14(%arg0: i32) -> (i32, i32) {
    %c0_i32 = arith.constant 0 : i32
    %c0_i32_0 = arith.constant 0 : i32
    return %arg0, %c0_i32 : i32, i32
  }
  func.func @transform_15(%arg0: i32) -> (i32, i32) {
    %c0_i32 = arith.constant 0 : i32
    %c0_i32_0 = arith.constant 0 : i32
    return %arg0, %c0_i32 : i32, i32
  }
}

</mosaic_0001>

<bundles_post_ra>
// kernel: ipa_transformer_forward.8
= control target key start
LH: loop header
LB: loop body
LE: loop exit
PB: predicated region body
PF: predicated region fallthrough
CT: control target
= control target key end

     0   :  { %7 = vsyncpa [#allocation3], 0  ;;  %s368_s9 = smov [#allocation2]   ;;  %s455_s0 = inlined_call_operand.vmem [shape: f32[16,32], index: 0, kind: input, shape index: {}]   ;;  %s456_s1 = inlined_call_operand.hbm [shape: f32[32,672], index: 1, kind: input, shape index: {}]   ;;  %s457_s2 = inlined_call_operand.vmem [shape: f32[16,672], index: 2, kind: output, shape index: {}]  }
   0x1   :  { %s15_s10 = sshll.u32 %s368_s9, 4  ;;  %s344_s13 = scalar_lea.hbm %s456_s1, 3072  ;;  %s16_s10 = int_to_ptr.vmem [resolvable:$true] %s15_s10 }
   0x2   :  { %p345_p0 = scmp.ne.s32.totalorder %s456_s1, %s344_s13  ;;  %p348_p1 = scmp.lt.u32.totalorder %s344_s13, %s456_s1 }
   0x4   :  { %p350_p2 = pnand %p348_p1, %p345_p0 }
   0x6   :  { %353 = shalt.err (!%p350_p2)
}
   0x7   :  { %s354_s18 = scalar_lea.vmem %s16_s10, 3072  ;;  %p359_p4 = scmp.lt.s32.totalorder %s16_s10, %s16_s10 }
   0x8   :  { %p355_p3 = scmp.ne.s32.totalorder %s16_s10, %s354_s18  ;;  %p360_p5 = scmp.lt.s32.totalorder %s354_s18, %s354_s18 }
   0xa   :  { %p361_p6 = por %p360_p5, %p359_p4 }
   0xc   :  { %p362_p7 = pnand %p361_p6, %p355_p3 }
   0xe   :  { %365 = shalt.err (!%p362_p7)
}
   0xf   :  { %s369_s19 = smov 768   ;;  %s370_s20 = smov 48  }
  0x10   :  { %21 = dma.hbm_to_vmem [thread:$0]  %s456_s1, 3072, %s16_s10, [#allocation3], %s369_s19, %s369_s19, %s370_s20  }
  0x11   :  { %366 = dma.done.wait [#allocation3], 3072  }
  0x12   :  { %367 = vsyncadd [#allocation3], 4294964224  ;;  %v371_v0 = vmov 0.0   ;;  %v28_v1 = vld [vmem:[#allocation2 + $0x8] sm:$0xff]  ;;  %v34_v2 = vld [vmem:[#allocation2 + $0x38] sm:$0xff]  ;;  %vm51_vm0 = vcmask 261120  }
  0x13   :  { %122 = vmatprep.mubr.f32.mxu0 %v371_v0  ;;  %199 = vmatprep.mubr.f32.mxu1 %v371_v0  ;;  %v30_v3 = vld [vmem:[#allocation2 + $0x18] sm:$0xff]  ;;  %v312_v4 = vpack.c.bf16 %v34_v2, %v28_v1  ;;  %v36_v5 = vld [vmem:[#allocation2 + $0x48] sm:$0xff]  ;;  %v27_v6 = vld [vmem:[#allocation2] sm:$0xff] }
  0x14   :  { %v33_v7 = vld [vmem:[#allocation2 + $0x30] sm:$0xff]  ;;  %v320_v8 = vpack.c.bf16 %v36_v5, %v30_v3  ;;  %v35_v11 = vld [vmem:[#allocation2 + $0x40] sm:$0xff]  ;;  %v40_v12 = vld [vmem:[#allocation2 + $0x68] sm:$0xff] }
  0x15   :  { %v314_v9 = vpack.c.bf16 %v33_v7, %v27_v6  ;;  %v29_v10 = vld [vmem:[#allocation2 + $0x10] sm:$0xff]  ;;  %313 = vmatprep.subr.bf16.mxu0 %v312_v4  ;;  %v46_v14 = vld [vmem:[#allocation2 + $0x98] sm:$0xff]  ;;  %v48_v16 = vld [vmem:[#allocation2 + $0xa8] sm:$0xff] }
  0x16   :  { %v322_v13 = vpack.c.bf16 %v35_v11, %v29_v10  ;;  %v42_v15 = vld [vmem:[#allocation2 + $0x78] sm:$0xff]  ;;  %321 = vmatprep.subr.bf16.mxu1 %v320_v8  ;;  %v316_v17 = vpack.c.bf16 %v46_v14, %v40_v12  ;;  %v39_v19 = vld [vmem:[#allocation2 + $0x60] sm:$0xff]  ;;  %v45_v20 = vld [vmem:[#allocation2 + $0x90] sm:$0xff] }
  0x17   :  { %315 = vmatpush1.bf16.msra.mxu0 %v314_v9  ;;  %v324_v18 = vpack.c.bf16 %v48_v16, %v42_v15  ;;  %v41_v21 = vld [vmem:[#allocation2 + $0x70] sm:$0xff]  ;;  %v318_v22 = vpack.c.bf16 %v45_v20, %v39_v19  ;;  %v47_v23 = vld [vmem:[#allocation2 + $0xa0] sm:$0xff]  ;;  %v32_v24 = vld [vmem:[#allocation2 + $0x28] sm:$0xff] }
  0x18   :  { %323 = vmatpush1.bf16.msra.mxu1 %v322_v13  ;;  %317 = vmatprep.subr.bf16.mxu0 %v316_v17  ;;  %v326_v25 = vpack.c.bf16 %v47_v23, %v41_v21  ;;  %v38_v26 = vld [vmem:[#allocation2 + $0x58] sm:$0xff]  ;;  %v31_v27 = vld [vmem:[#allocation2 + $0x20] sm:$0xff]  ;;  %v37_v28 = vld [vmem:[#allocation2 + $0x50] sm:$0xff] }
  0x19   :  { %325 = vmatprep.subr.bf16.mxu1 %v324_v18  ;;  %v328_v29 = vpack.c.bf16 %v38_v26, %v32_v24  ;;  %v44_v30 = vld [vmem:[#allocation2 + $0x88] sm:$0xff]  ;;  %v50_v31 = vld [vmem:[#allocation2 + $0xb8] sm:$0xff]  ;;  %v25_v32 = vld [vmem:[%s455_s0] sm:$0xff]  ;;  %v330_v33 = vpack.c.bf16 %v37_v28, %v31_v27 }
  0x1a   :  { %v43_v34 = vld [vmem:[#allocation2 + $0x80] sm:$0xff]  ;;  %v49_v35 = vld [vmem:[#allocation2 + $0xb0] sm:$0xff]  ;;  %v332_v36 = vpack.c.bf16 %v50_v31, %v44_v30  ;;  %v26_v37 = vld [vmem:[%s455_s0 + $0x8] sm:$0xff] }
  0x1b   :  { %319 = vmatpush1.bf16.msra.mxu0 %v318_v22  ;;  %v334_v38 = vpack.c.bf16 %v49_v35, %v43_v34 }
  0x1c   :  { %327 = vmatpush1.bf16.msra.mxu1 %v326_v25  ;;  %329 = vmatprep.subr.bf16.mxu0 %v328_v29 }
  0x1d   :  { %336 = vmatprep.subr.bf16.mxu1 %v328_v29 }
  0x1e   :  { %306 = vmatmul.mubr.msk.f32.vlgmr.msra.gmra.mrb[0].mxu0 %vm51_vm0, %v25_v32 }
  0x1f   :  { %308 = vmatmul.mubr.msk.f32.vlgmr.msra.gmra.mrb[0].mxu1 %vm51_vm0, %v25_v32  ;;  %331 = vmatpush1.bf16.msra.mxu0 %v330_v33 }
  0x20   :  { %338 = vmatpush1.bf16.msra.mxu1 %v330_v33  ;;  %128 = vmatprep.mubr.f32.mxu0 %v371_v0 }
  0x21   :  { %205 = vmatprep.mubr.f32.mxu1 %v371_v0  ;;  %333 = vmatprep.subr.bf16.mxu0 %v332_v36 }
  0x22   :  { %307 = vmatmul.mubr.msk.f32.gmra.mrb[2].mxu0 %vm51_vm0, %v26_v37  ;;  %337 = vmatprep.subr.bf16.mxu1 %v332_v36 }
  0x23   :  { %309 = vmatmul.mubr.msk.f32.gmra.mrb[2].mxu1 %vm51_vm0, %v26_v37  ;;  %335 = vmatpush1.bf16.msra.mxu0 %v334_v38 }
  0x24   :  { %339 = vmatpush1.bf16.msra.mxu1 %v334_v38  ;;  %276 = vmatprep.mubr.f32.mxu0 %v371_v0 }
  0x25   :  { %282 = vmatprep.mubr.f32.mxu1 %v371_v0 }
  0x26   :  { %310 = vmatmul.mubr.msk.f32.vlgmr.msra.gmra.mrb[4].mxu0 %vm51_vm0, %v25_v32 }
  0x27   :  { %311 = vmatmul.mubr.msk.f32.vlgmr.msra.gmra.mrb[4].mxu1 %vm51_vm0, %v26_v37 }
  0xf1   :  { %v124_v39 = vpop.f32.mrb[0].mxu0 }
  0xf2   :  { %289 = vst [vmem:[%s457_s2] sm:$0xff] %v124_v39  ;;  %v201_v40 = vpop.f32.mrb[0].mxu1  ;;  %v126_v41 = vpop.f32.mrb[1].mxu0 }
  0xf3   :  { %291 = vst [vmem:[%s457_s2 + $0x10] sm:$0xff] %v201_v40  ;;  %290 = vst [vmem:[%s457_s2 + $0x8] sm:$0xff] %v126_v41  ;;  %v203_v42 = vpop.f32.mrb[1].mxu1 }
  0xf4   :  { %292 = vst [vmem:[%s457_s2 + $0x18] sm:$0xff] %v203_v42 }
  0xf5   :  { %v130_v43 = vpop.f32.mrb[2].mxu0 }
  0xf6   :  { %295 = vst [vmem:[%s457_s2 + $0x30] sm:$0xff] %v130_v43  ;;  %v207_v44 = vpop.f32.mrb[2].mxu1  ;;  %v132_v45 = vpop.f32.mrb[3].mxu0 }
  0xf7   :  { %297 = vst [vmem:[%s457_s2 + $0x40] sm:$0xff] %v207_v44  ;;  %296 = vst [vmem:[%s457_s2 + $0x38] sm:$0xff] %v132_v45  ;;  %v209_v46 = vpop.f32.mrb[3].mxu1 }
  0xf8   :  { %298 = vst [vmem:[%s457_s2 + $0x48] sm:$0xff] %v209_v46 }
  0xf9   :  { %v278_v47 = vpop.f32.mrb[4].mxu0 }
  0xfa   :  { %293 = vst [vmem:[%s457_s2 + $0x20] sm:$0xff] %v278_v47  ;;  %v284_v48 = vpop.f32.mrb[4].mxu1  ;;  %v280_v49 = vpop.f32.mrb[5].mxu0 }
  0xfb   :  { %299 = vst [vmem:[%s457_s2 + $0x50] sm:$0xff] %v284_v48  ;;  %294 = vst.msk [vmem:[%s457_s2 + $0x28] sm:$0xff] %vm51_vm0, %v280_v49  ;;  %v286_v50 = vpop.f32.mrb[5].mxu1 }
  0xfc   :  { %300 = vst.msk [vmem:[%s457_s2 + $0x58] sm:$0xff] %vm51_vm0, %v286_v50 }
  0xfd   :  { %305 = vsyncpa [#allocation3], 1 }

// kernel: ipa_transformer_forward.10
= control target key start
LH: loop header
LB: loop body
LE: loop exit
PB: predicated region body
PF: predicated region fallthrough
CT: control target
= control target key end

     0   :  { %vm243_vm0 = vcmask 261120   ;;  %s636_s1 = inlined_call_operand.vmem [shape: f32[512,32], index: 1, kind: input, shape index: {}]   ;;  %s637_s0 = inlined_call_operand.vmem [shape: f32[16,512], index: 0, kind: input, shape index: {}]   ;;  %s638_s2 = inlined_call_operand.vmem [shape: f32[1,32], index: 2, kind: input, shape index: {}]   ;;  %s639_s3 = inlined_call_operand.vmem [shape: f32[16,32], index: 3, kind: output, shape index: {}]  }
   0x1   :  { %v38_v0 = vld [vmem:[%s636_s1 + $0x80] sm:$0xff]  ;;  %v39_v1 = vld [vmem:[%s636_s1 + $0x88] sm:$0xff]  ;;  %v40_v11 = vld [vmem:[%s636_s1 + $0x90] sm:$0xff] }
   0x2   :  { %v22_v2 = vld [vmem:[%s636_s1] sm:$0xff]  ;;  %v327_v3 = vpack.c.bf16 %v39_v1, %v38_v0  ;;  %v23_v4 = vld [vmem:[%s636_s1 + $0x8] sm:$0xff]  ;;  %v41_v13 = vld [vmem:[%s636_s1 + $0x98] sm:$0xff] }
   0x3   :  { %v70_v5 = vld [vmem:[%s636_s1 + $0x180] sm:$0xff]  ;;  %v71_v6 = vld [vmem:[%s636_s1 + $0x188] sm:$0xff]  ;;  %v329_v7 = vpack.c.bf16 %v23_v4, %v22_v2  ;;  %v24_v14 = vld [vmem:[%s636_s1 + $0x10] sm:$0xff]  ;;  %v331_v16 = vpack.c.bf16 %v41_v13, %v40_v11 }
   0x4   :  { %v359_v8 = vpack.c.bf16 %v71_v6, %v70_v5  ;;  %v54_v9 = vld [vmem:[%s636_s1 + $0x100] sm:$0xff]  ;;  %v55_v10 = vld [vmem:[%s636_s1 + $0x108] sm:$0xff]  ;;  %328 = vmatprep.subr.bf16.mxu0 %v327_v3  ;;  %v25_v15 = vld [vmem:[%s636_s1 + $0x18] sm:$0xff] }
   0x5   :  { %v361_v12 = vpack.c.bf16 %v55_v10, %v54_v9  ;;  %330 = vmatpush3.bf16.msra.mxu0 %v329_v7  ;;  %v333_v17 = vpack.c.bf16 %v25_v15, %v24_v14  ;;  %v72_v18 = vld [vmem:[%s636_s1 + $0x190] sm:$0xff]  ;;  %v73_v19 = vld [vmem:[%s636_s1 + $0x198] sm:$0xff]  ;;  %v42_v23 = vld [vmem:[%s636_s1 + $0xa0] sm:$0xff] }
   0x6   :  { %360 = vmatprep.subr.bf16.mxu1 %v359_v8  ;;  %v56_v20 = vld [vmem:[%s636_s1 + $0x110] sm:$0xff]  ;;  %v363_v21 = vpack.c.bf16 %v73_v19, %v72_v18  ;;  %v57_v22 = vld [vmem:[%s636_s1 + $0x118] sm:$0xff]  ;;  %v43_v24 = vld [vmem:[%s636_s1 + $0xa8] sm:$0xff]  ;;  %332 = vmatprep.subr.bf16.mxu0 %v331_v16 }
   0x7   :  { %362 = vmatpush3.bf16.msra.mxu1 %v361_v12  ;;  %v365_v25 = vpack.c.bf16 %v57_v22, %v56_v20  ;;  %v335_v26 = vpack.c.bf16 %v43_v24, %v42_v23  ;;  %v26_v27 = vld [vmem:[%s636_s1 + $0x20] sm:$0xff]  ;;  %v27_v28 = vld [vmem:[%s636_s1 + $0x28] sm:$0xff]  ;;  %v44_v35 = vld [vmem:[%s636_s1 + $0xb0] sm:$0xff] }
   0x8   :  { %v74_v29 = vld [vmem:[%s636_s1 + $0x1a0] sm:$0xff]  ;;  %364 = vmatprep.subr.bf16.mxu1 %v363_v21  ;;  %v75_v30 = vld [vmem:[%s636_s1 + $0x1a8] sm:$0xff]  ;;  %v337_v33 = vpack.c.bf16 %v27_v28, %v26_v27  ;;  %v45_v36 = vld [vmem:[%s636_s1 + $0xb8] sm:$0xff] }
   0x9   :  { %v58_v31 = vld [vmem:[%s636_s1 + $0x120] sm:$0xff]  ;;  %v59_v32 = vld [vmem:[%s636_s1 + $0x128] sm:$0xff]  ;;  %334 = vmatpush3.bf16.msra.mxu0 %v333_v17  ;;  %v367_v34 = vpack.c.bf16 %v75_v30, %v74_v29  ;;  %v28_v37 = vld [vmem:[%s636_s1 + $0x30] sm:$0xff]  ;;  %v339_v39 = vpack.c.bf16 %v45_v36, %v44_v35 }
   0xa   :  { %336 = vmatprep.subr.bf16.mxu0 %v335_v26  ;;  %v369_v38 = vpack.c.bf16 %v59_v32, %v58_v31  ;;  %v29_v40 = vld [vmem:[%s636_s1 + $0x38] sm:$0xff]  ;;  %v76_v41 = vld [vmem:[%s636_s1 + $0x1b0] sm:$0xff]  ;;  %v46_v46 = vld [vmem:[%s636_s1 + $0xc0] sm:$0xff] }
   0xb   :  { %366 = vmatpush3.bf16.msra.mxu1 %v365_v25  ;;  %v77_v42 = vld [vmem:[%s636_s1 + $0x1b8] sm:$0xff]  ;;  %v60_v44 = vld [vmem:[%s636_s1 + $0x130] sm:$0xff]  ;;  %v47_v47 = vld [vmem:[%s636_s1 + $0xc8] sm:$0xff]  ;;  %v341_v48 = vpack.c.bf16 %v29_v40, %v28_v37 }
   0xc   :  { %368 = vmatprep.subr.bf16.mxu1 %v367_v34  ;;  %v371_v43 = vpack.c.bf16 %v77_v42, %v76_v41  ;;  %v61_v45 = vld [vmem:[%s636_s1 + $0x138] sm:$0xff]  ;;  %v78_v49 = vld [vmem:[%s636_s1 + $0x1c0] sm:$0xff]  ;;  %v79_v50 = vld [vmem:[%s636_s1 + $0x1c8] sm:$0xff]  ;;  %v343_v52 = vpack.c.bf16 %v47_v47, %v46_v46 }
   0xd   :  { %338 = vmatpush3.bf16.msra.mxu0 %v337_v33  ;;  %v373_v51 = vpack.c.bf16 %v61_v45, %v60_v44  ;;  %v30_v53 = vld [vmem:[%s636_s1 + $0x40] sm:$0xff]  ;;  %v31_v54 = vld [vmem:[%s636_s1 + $0x48] sm:$0xff]  ;;  %v375_v56 = vpack.c.bf16 %v79_v50, %v78_v49  ;;  %v48_v58 = vld [vmem:[%s636_s1 + $0xd0] sm:$0xff] }
   0xe   :  { %340 = vmatprep.subr.bf16.mxu0 %v339_v39  ;;  %v62_v55 = vld [vmem:[%s636_s1 + $0x140] sm:$0xff]  ;;  %v63_v57 = vld [vmem:[%s636_s1 + $0x148] sm:$0xff]  ;;  %v49_v59 = vld [vmem:[%s636_s1 + $0xd8] sm:$0xff]  ;;  %v345_v62 = vpack.c.bf16 %v31_v54, %v30_v53 }
   0xf   :  { %370 = vmatpush3.bf16.msra.mxu1 %v369_v38  ;;  %v80_v60 = vld [vmem:[%s636_s1 + $0x1d0] sm:$0xff]  ;;  %v81_v61 = vld [vmem:[%s636_s1 + $0x1d8] sm:$0xff]  ;;  %v377_v63 = vpack.c.bf16 %v63_v57, %v62_v55  ;;  %v347_v0 = vpack.c.bf16 %v49_v59, %v48_v58  ;;  %v50_v6 = vld [vmem:[%s636_s1 + $0xe0] sm:$0xff] }
  0x10   :  { %372 = vmatprep.subr.bf16.mxu1 %v371_v43  ;;  %v32_v1 = vld [vmem:[%s636_s1 + $0x50] sm:$0xff]  ;;  %v33_v2 = vld [vmem:[%s636_s1 + $0x58] sm:$0xff]  ;;  %v379_v4 = vpack.c.bf16 %v81_v61, %v80_v60  ;;  %v51_v7 = vld [vmem:[%s636_s1 + $0xe8] sm:$0xff] }
  0x11   :  { %342 = vmatpush3.bf16.msra.mxu0 %v341_v48  ;;  %v64_v3 = vld [vmem:[%s636_s1 + $0x150] sm:$0xff]  ;;  %v65_v5 = vld [vmem:[%s636_s1 + $0x158] sm:$0xff]  ;;  %v82_v8 = vld [vmem:[%s636_s1 + $0x1e0] sm:$0xff]  ;;  %v349_v10 = vpack.c.bf16 %v33_v2, %v32_v1  ;;  %v351_v14 = vpack.c.bf16 %v51_v7, %v50_v6 }
  0x12   :  { %344 = vmatprep.subr.bf16.mxu0 %v343_v52  ;;  %v83_v9 = vld [vmem:[%s636_s1 + $0x1e8] sm:$0xff]  ;;  %v34_v11 = vld [vmem:[%s636_s1 + $0x60] sm:$0xff]  ;;  %v381_v13 = vpack.c.bf16 %v65_v5, %v64_v3  ;;  %v52_v19 = vld [vmem:[%s636_s1 + $0xf0] sm:$0xff] }
  0x13   :  { %374 = vmatpush3.bf16.msra.mxu1 %v373_v51  ;;  %v35_v12 = vld [vmem:[%s636_s1 + $0x68] sm:$0xff]  ;;  %v66_v15 = vld [vmem:[%s636_s1 + $0x160] sm:$0xff]  ;;  %v383_v18 = vpack.c.bf16 %v83_v9, %v82_v8  ;;  %v53_v20 = vld [vmem:[%s636_s1 + $0xf8] sm:$0xff] }
  0x14   :  { %376 = vmatprep.subr.bf16.mxu1 %v375_v56  ;;  %v67_v16 = vld [vmem:[%s636_s1 + $0x168] sm:$0xff]  ;;  %v17_v21 = vld [vmem:[%s637_s0 + $0x18] sm:$0xff]  ;;  %v84_v22 = vld [vmem:[%s636_s1 + $0x1f0] sm:$0xff]  ;;  %v353_v24 = vpack.c.bf16 %v35_v12, %v34_v11  ;;  %v355_v26 = vpack.c.bf16 %v53_v20, %v52_v19 }
  0x15   :  { %346 = vmatpush3.bf16.msra.mxu0 %v345_v62  ;;  %v15_v17 = vld [vmem:[%s637_s0 + $0x8] sm:$0xff]  ;;  %v85_v23 = vld [vmem:[%s636_s1 + $0x1f8] sm:$0xff]  ;;  %232 = vmatprep.mubr.f32.mxu1 %v17_v21  ;;  %v385_v25 = vpack.c.bf16 %v67_v16, %v66_v15  ;;  %v36_v27 = vld [vmem:[%s636_s1 + $0x70] sm:$0xff] }
  0x16   :  { %348 = vmatprep.subr.bf16.mxu0 %v347_v0  ;;  %157 = vmatprep.mubr.f32.mxu0 %v15_v17  ;;  %v37_v28 = vld [vmem:[%s636_s1 + $0x78] sm:$0xff]  ;;  %v387_v29 = vpack.c.bf16 %v85_v23, %v84_v22  ;;  %v68_v30 = vld [vmem:[%s636_s1 + $0x170] sm:$0xff]  ;;  %v14_v34 = vld [vmem:[%s637_s0] sm:$0xff] }
  0x17   :  { %378 = vmatpush3.bf16.msra.mxu1 %v377_v63  ;;  %v69_v31 = vld [vmem:[%s636_s1 + $0x178] sm:$0xff]  ;;  %v357_v32 = vpack.c.bf16 %v37_v28, %v36_v27  ;;  %v16_v35 = vld [vmem:[%s637_s0 + $0x10] sm:$0xff]  ;;  %v19_v36 = vld [vmem:[%s637_s0 + $0x28] sm:$0xff] }
  0x18   :  { %380 = vmatprep.subr.bf16.mxu1 %v379_v4  ;;  %v389_v33 = vpack.c.bf16 %v69_v31, %v68_v30  ;;  %v21_v37 = vld [vmem:[%s637_s0 + $0x38] sm:$0xff]  ;;  %v18_v38 = vld [vmem:[%s637_s0 + $0x20] sm:$0xff]  ;;  %v20_v39 = vld [vmem:[%s637_s0 + $0x30] sm:$0xff] }
  0x19   :  { %350 = vmatpush3.bf16.msra.mxu0 %v349_v10  ;;  %v250_v41 = vld [vmem:[%s638_s2] ss:$0 sm:$0xff] }
  0x1a   :  { %352 = vmatprep.subr.bf16.mxu0 %v351_v14 }
  0x1b   :  { %382 = vmatpush3.bf16.msra.mxu1 %v381_v13 }
  0x1c   :  { %384 = vmatprep.subr.bf16.mxu1 %v383_v18 }
  0x1d   :  { %354 = vmatpush3.bf16.msra.mxu0 %v353_v24 }
  0x1e   :  { %356 = vmatprep.subr.bf16.mxu0 %v355_v26 }
  0x1f   :  { %386 = vmatpush3.bf16.msra.mxu1 %v385_v25 }
  0x20   :  { %388 = vmatprep.subr.bf16.mxu1 %v387_v29 }
  0x21   :  { %358 = vmatpush3.bf16.msra.mxu0 %v357_v32 }
  0x23   :  { %390 = vmatpush3.bf16.msra.mxu1 %v389_v33 }
  0x24   :  { %158 = vmatmul.mubr.f32.vlgmr.msra.gmra.mrb[0].mxu0 %v14_v34 }
  0x25   :  { %162 = vmatprep.mubr.f32.mxu0 %v19_v36 }
  0x26   :  { %233 = vmatmul.mubr.f32.vlgmr.msra.gmra.mrb[0].mxu1 %v16_v35 }
  0x27   :  { %237 = vmatprep.mubr.f32.mxu1 %v21_v37 }
  0x28   :  { %163 = vmatmul.mubr.f32.gmra.mrb[2].mxu0 %v18_v38 }
  0x2a   :  { %238 = vmatmul.mubr.f32.gmra.mrb[2].mxu1 %v20_v39 }
  0xf7   :  { %v283_v40 = vpop.f32.mrb[0].mxu0 }
  0xf8   :  { %v284_v42 = vpop.f32.mrb[1].mxu0 }
  0xf9   :  { %v321_v43 = vpop.f32.mrb[0].mxu1  ;;  %v285_v44 = vadd.f32 %v284_v42, %v283_v40 }
  0xfa   :  { %v322_v45 = vpop.f32.mrb[1].mxu1 }
  0xfb   :  { %v323_v46 = vadd.f32 %v322_v45, %v321_v43  ;;  %v160_v47 = vadd.f32 %v285_v44, %v250_v41  ;;  %v286_v48 = vpop.f32.mrb[2].mxu0 }
  0xfc   :  { %v287_v49 = vpop.f32.mrb[3].mxu0 }
  0xfd   :  { %v324_v50 = vpop.f32.mrb[2].mxu1  ;;  %v235_v51 = vadd.f32 %v323_v46, %v160_v47  ;;  %v288_v52 = vadd.f32 %v287_v49, %v286_v48 }
  0xfe   :  { %v325_v53 = vpop.f32.mrb[3].mxu1 }
  0xff   :  { %v326_v54 = vadd.f32 %v325_v53, %v324_v50  ;;  %244 = vst.msk [vmem:[%s639_s3] sm:$0xff] %vm243_vm0, %v235_v51  ;;  %v165_v55 = vadd.f32 %v288_v52, %v250_v41 }
 0x101   :  { %v240_v56 = vadd.f32 %v326_v54, %v165_v55 }
 0x103   :  { %245 = vst.msk [vmem:[%s639_s3 + $0x8] sm:$0xff] %vm243_vm0, %v240_v56 }

// kernel: ipa_transformer_forward.9
= control target key start
LH: loop header
LB: loop body
LE: loop exit
PB: predicated region body
PF: predicated region fallthrough
CT: control target
= control target key end

     0   :  { %s3989_s18 = smov 0   ;;  %s3991_s19 = smov 0   ;;  %s4735_s0 = inlined_call_operand.vmem [shape: f32[2,8,232], index: 0, kind: input, shape index: {}]   ;;  %s4736_s1 = inlined_call_operand.vmem [shape: f32[2,8,232], index: 1, kind: input, shape index: {}]   ;;  %s4737_s2 = inlined_call_operand.vmem [shape: f32[2,8,224], index: 2, kind: input, shape index: {}]   ;;  %s4738_s3 = inlined_call_operand.vmem [shape: f32[2,8,8,32], index: 3, kind: input, shape index: {}]   ;;  %s4739_s4 = inlined_call_operand.vmem [shape: f32[32,8], index: 4, kind: input, shape index: {}]   ;;  %s4740_s5 = inlined_call_operand.vmem [shape: f32[2,8,480], index: 5, kind: output, shape index: {}]  }
   0x1   :  { %s3993_s20 = smov 0  }
   0x2 LB: > { %s27_s21 = sadd.s32 1, %s3912_s19  ;;  %p3486_p0 = scmp.ge.s32.totalorder %s3916_s20, 1  ;;  %s3916_s20 = sphi %s3993_s20, %s15_s20   ;;  %s3912_s19 = sphi %s3991_s19, %s4742_s19   ;;  %s3908_s18 = sphi %s3989_s18, %s4741_s18  }
   0x3   : > { %p29_p1 = scmp.ge.s32.totalorder %s27_s21, 2  ;;  %p244_p2 = scmp.lt.s32.totalorder %s3916_s20, 3 }
   0x5   : > { %s4744_s21 = smov (%p29_p1, %s27_s21), 0  ;;  %p245_p3 = pnand %p3486_p0, %p244_p2 }
   0x6   : > { %v345_v0 = vld [vmem:[%s4739_s4] sm:$0xff] (!%p245_p3)  ;;  %v346_v1 = vld [vmem:[%s4739_s4 + $0x8] sm:$0xff] (!%p245_p3)  ;;  %v347_v2 = vld [vmem:[%s4739_s4 + $0x10] sm:$0xff] (!%p245_p3)  ;;  %p299_p4 = scmp.lt.s32.totalorder (!%p245_p3), %s3908_s18, 1  ;;  %v3918_v5 = vmov (!%p245_p3), 0.0   ;;  %vm3919_vm0 = vmmov (!%p245_p3), 0   ;;  %v513_v29 = vlaneseq (!%p245_p3) }
   0x7   : > { %248 = sbr.rel (%p245_p3) target bundleno = 2508 (0x9cc), region = 40  ;;  %v3744_v3 = vpack.c.bf16 (!%p245_p3), %v346_v1, %v345_v0  ;;  %v348_v4 = vld [vmem:[%s4739_s4 + $0x18] sm:$0xff] (!%p245_p3)  ;;  %3624 = vmatprep.subr.mxu1 (!%p245_p3), %v3918_v5  ;;  %3626 = vmatprep.mubr.msk.f32.mxu1 (!%p245_p3), %vm3919_vm0, %v3918_v5  ;;  %v3920_v7 = vmov (!%p245_p3), 0   ;;  %vm349_vm1 = vcmask (!%p245_p3), 261120   ;;  %vm562_vm2 = vcmask (!%p245_p3), 236544   ;;  %s3922_s16 = smov (!%p245_p3), 99  }
   0x8   : > { %v3748_v6 = vpack.c.bf16 (!%p245_p3), %v348_v4, %v347_v2  ;;  %3817 = vset.pattern.permute.xlu0 (!%p245_p3), %v3920_v7  ;;  %3818 = vset.pattern.permute.xlu1 (!%p245_p3), %v3920_v7  ;;  %v3921_v28 = vmov (!%p245_p3), 1   ;;  %v514_v30 = vand.u32 (!%p245_p3), 127, %v513_v29  ;;  %v4104_v31 = vshrl.u32 (!%p245_p3), %v513_v29, 7  ;;  %s3924_s24 = smov (!%p245_p3), 100   ;;  %s3925_s25 = smov (!%p245_p3), 70  }
   0x9   : > { %3745 = vmatprep.subr.bf16.mxu0 (!%p245_p3), %v3744_v3  ;;  %vm547_vm3 = vcmask (!%p245_p3), 1041409   ;;  %vm549_vm4 = vcmask (!%p245_p3), 1042434   ;;  %vm551_vm5 = vcmask (!%p245_p3), 1043459   ;;  %vm553_vm6 = vcmask (!%p245_p3), 1044484   ;;  %s3926_s26 = smov (!%p245_p3), 41   ;;  %s3927_s27 = smov (!%p245_p3), 12  }
   0xa   : > { %3747 = vmatpush3.bf16.msra.mxu0 (!%p245_p3), %v3744_v3  ;;  %v4107_v33 = vsub.s32 (!%p245_p3), %v514_v30, %v4104_v31  ;;  %vm555_vm7 = vcmask (!%p245_p3), 1045509   ;;  %vm557_vm8 = vcmask (!%p245_p3), 1046534   ;;  %vm559_vm9 = vcmask (!%p245_p3), 1047559   ;;  %s3928_s28 = smov (!%p245_p3), 111   ;;  %s3929_s29 = smov (!%p245_p3), 82  }
   0xb   : > { %3749 = vmatprep.subr.bf16.mxu0 (!%p245_p3), %v3748_v6  ;;  %vm639_vm10 = vcmask (!%p245_p3), 64512   ;;  %vm1423_vm11 = vcmask (!%p245_p3), 97280   ;;  %s3937_s7 = smov (!%p245_p3), 16   ;;  %s3938_s8 = smov (!%p245_p3), 24   ;;  %vm1589_vm12 = vcmask (!%p245_p3), 130048   ;;  %vm2416_vm13 = vcmask (!%p245_p3), 195584  }
   0xc   : > { %s3939_s10 = smov (!%p245_p3), 32   ;;  %s3940_s11 = smov (!%p245_p3), 40   ;;  %vm2389_vm14 = vcmask (!%p245_p3), 326656   ;;  %vm2420_vm15 = vcmask (!%p245_p3), 392192  }
   0xd   : > { %s3942_s13 = smov (!%p245_p3), 72   ;;  %s3943_s14 = smov (!%p245_p3), 56  }
   0xe   : > { %s4746_s18 = smov (!%p299_p4, %s3908_s18), 1  ;;  %3751 = vmatpush3.bf16.msra.mxu0 %v3748_v6  ;;  %v3923_v6 = vmov 2   ;;  %s3946_s17 = smov 112  }
   0xf   : > { %s3542_s30 = sshll.u32 %s4746_s18, 6  ;;  %s4026_s6 = sshll.u32 %s4746_s18, 4  ;;  %3649 = vmatprep.subr.mxu0 %v3918_v5 }
  0x10   : > { %s4031_s9 = scalar_lea.vmem %s4738_s3, %s3542_s30  ;;  %s4037_s12 = scalar_lea.vmem %s4736_s1, %s4026_s6 }
  0x11   : > { %v4040_v8 = vld [vmem:[%s4031_s9] sm:$0xff]  ;;  %s4046_s15 = scalar_lea.vmem %s4735_s0, %s4026_s6  ;;  %v338_v9 = vld [vmem:[%s4031_s9 + $0x8] sm:$0xff]  ;;  %v339_v11 = vld [vmem:[%s4031_s9 + $0x10] sm:$0xff]  ;;  %s4136_s23 = scalar_lea.vmem %s4737_s2, %s4026_s6 }
  0x12   : > { %3612 = vmatprep.mubr.msk.f32.mxu0 %vm349_vm1, %v4040_v8  ;;  %v4052_v10 = vld [vmem:[%s4037_s12] sm:$0xff]  ;;  %v340_v13 = vld [vmem:[%s4031_s9 + $0x18] sm:$0xff]  ;;  %v342_v15 = vld [vmem:[%s4031_s9 + $0x28] sm:$0xff]  ;;  %s3930_s30 = smov 53   ;;  %s3936_s6 = smov 8  }
  0x13   : > { %3625 = vmatpush3.xpose.msk.msra.mxu1 %vm562_vm2, %v4052_v10  ;;  %v4058_v12 = vld [vmem:[%s4046_s15] sm:$0xff]  ;;  %3613 = vmatmul.mubr.msk.f32.vlgmr.msra.gmra.mrb[0].mxu0 %vm349_vm1, %v338_v9  ;;  %v343_v16 = vld [vmem:[%s4031_s9 + $0x30] sm:$0xff]  ;;  %v344_v17 = vld [vmem:[%s4031_s9 + $0x38] sm:$0xff]  ;;  %s3947_s22 = smov 120  }
  0x14   : > { %3629 = vmatprep.subr.mxu1 %v3918_v5  ;;  %3615 = vmatprep.mubr.msk.f32.mxu0 %vm349_vm1, %v339_v11  ;;  %v341_v14 = vld [vmem:[%s4031_s9 + $0x20] sm:$0xff] }
  0x15   : > { %v4139_v63 = vld [vmem:[%s4136_s23] sm:$0xff] }
  0x16   : > { %3627 = vmatmul.mubr.msk.f32.vlgmr.msra.gmra.mrb[0].mxu1 %vm562_vm2, %v4058_v12 }
  0x17   : > { %3631 = vmatprep.mubr.msk.f32.mxu1 %vm3919_vm0, %v3918_v5  ;;  %3616 = vmatmul.mubr.msk.f32.gmra.mrb[2].mxu0 %vm349_vm1, %v340_v13 }
  0x18   : > { %3618 = vmatprep.mubr.msk.f32.mxu0 %vm349_vm1, %v341_v14  ;;  %3630 = vmatpush3.msra.mxu1 %v4139_v63 }
  0x19   : > { %3634 = vmatprep.subr.mxu1 %v3918_v5 }
  0x1b   : > { %3619 = vmatmul.mubr.msk.f32.gmra.mrb[4].mxu0 %vm349_vm1, %v342_v15 }
  0x1c   : > { %3621 = vmatprep.mubr.msk.f32.mxu0 %vm349_vm1, %v343_v16 }
  0x1f   : > { %3622 = vmatmul.mubr.msk.f32.gmra.mrb[6].mxu0 %vm349_vm1, %v344_v17 }
  0x20   : > { %3651 = vmatprep.mubr.msk.f32.mxu0 %vm3919_vm0, %v3918_v5 }
  0xe6   : > { %v4080_v18 = vpop.f32.mrb[0].mxu0 }
  0xe7   : > { %493 = vperm.xlu0 %3817, %v4080_v18   ;;  %v4083_v19 = vpop.f32.mrb[1].mxu0 }
  0xe9   : > { %v635_v26 = vpop.f32.mrb[0].mxu1 }
  0xea   : > { %v4085_v20 = vpop.f32.mrb[2].mxu0  ;;  %v3628_v27 = vpop.f32.mrb[1].mxu1 }
  0xeb   : > { %490 = vperm.xlu0 %3817, %v4083_v19   ;;  %499 = vperm.xlu1 %3818, %v4085_v20   ;;  %v4089_v21 = vpop.f32.mrb[3].mxu0 }
  0xee   : > { %v4091_v22 = vpop.f32.mrb[4].mxu0 }
  0xef   : > { %496 = vperm.xlu1 %3818, %v4089_v21   ;;  %v4094_v23 = vpop.f32.mrb[5].mxu0 }
  0xf0   : > { %502 = vperm.xlu0 %3817, %v4094_v23  }
  0xf2   : > { %v4097_v24 = vpop.f32.mrb[6].mxu0 }
  0xf3   : > { %505 = vperm.xlu1 %3818, %v4091_v22   ;;  %v4100_v25 = vpop.f32.mrb[7].mxu0 }
  0xf4   : > { %508 = vperm.xlu0 %3817, %v4100_v25  }
  0xf7   : > { %511 = vperm.xlu1 %3818, %v4097_v24  }
  0xf8   : > { %3819 = vset.pattern.permute.xlu0 %v3921_v28 }
  0xfb   : > { %3820 = vset.pattern.permute.xlu1 %v3921_v28 }
 0x166   : > { %v494_v32 = vpop.permute.xlu0 %493 }
 0x167   : > { %v522_v37 = vrot.slane %v494_v32, %v4107_v33 }
 0x16a   : > { %v491_v34 = vpop.permute.xlu0 %490  ;;  %v500_v35 = vpop.permute.xlu1 %499 }
 0x16b   : > { %v518_v36 = vrot.slane %v491_v34, %v4107_v33  ;;  %v530_v42 = vrot.slane %v500_v35, %v4107_v33 }
 0x16d   : > { %v548_v41 = vsel %vm547_vm3, %v522_v37, %v518_v36 }
 0x16e   : > { %v497_v38 = vpop.permute.xlu1 %496 }
 0x16f   : > { %v526_v39 = vrot.slane %v497_v38, %v4107_v33  ;;  %v503_v40 = vpop.permute.xlu0 %502 }
 0x170   : > { %v534_v43 = vrot.slane %v503_v40, %v4107_v33 }
 0x171   : > { %v550_v44 = vsel %vm549_vm4, %v526_v39, %v548_v41 }
 0x172   : > { %v552_v45 = vsel %vm551_vm5, %v530_v42, %v550_v44  ;;  %v506_v46 = vpop.permute.xlu1 %505 }
 0x173   : > { %v554_v47 = vsel %vm553_vm6, %v534_v43, %v552_v45  ;;  %v538_v48 = vrot.slane %v506_v46, %v4107_v33  ;;  %v509_v49 = vpop.permute.xlu0 %508 }
 0x174   : > { %v542_v50 = vrot.slane %v509_v49, %v4107_v33  ;;  %v4187_v49 = vld [vmem:[%s4037_s12 + $0x8] sm:$0xff]  ;;  %s3941_s12 = smov 48  }
 0x175   : > { %v556_v51 = vsel %vm555_vm7, %v538_v48, %v554_v47 }
 0x176   : > { %v512_v52 = vpop.permute.xlu1 %511  ;;  %v558_v54 = vsel %vm557_vm8, %v542_v50, %v556_v51  ;;  %v1414_v50 = vld [vmem:[%s4046_s15 + $0x8] sm:$0xff]  ;;  %v3931_v51 = vmov 3   ;;  %s3944_s15 = smov 44  }
 0x177   : > { %v546_v53 = vrot.slane %v512_v52, %v4107_v33  ;;  %v3932_v52 = vmov 4  }
 0x179   : > { %v560_v55 = vsel %vm559_vm9, %v546_v53, %v558_v54  ;;  %v3933_v53 = vmov 5   ;;  %v3934_v54 = vmov 6  }
 0x17a   : > { %v636_v56 = vadd.f32 %v635_v26, %v560_v55 }
 0x17c   : > { %v640_v57 = vsel %vm639_vm10, %v636_v56, -inf }
 0x17d   : > { %641 = vmax.xlane.f32.xlu0 %v640_v57 }
 0x193   : > { %727 = vrot.lane.b32.xlu0 %v4052_v10, %s3922_s16 }
 0x197   : > { %730 = vperm.xlu0 %3819, %v4083_v19  }
 0x19b   : > { %739 = vperm.xlu0 %3819, %v4085_v20  }
 0x19f   : > { %745 = vperm.xlu0 %3819, %v4091_v22  }
 0x1a3   : > { %751 = vperm.xlu0 %3819, %v4097_v24  }
 0x1a7   : > { %3821 = vset.pattern.permute.xlu0 %v3923_v6 }
 0x1a8   : > { %879 = vrot.lane.b32.xlu0 %v4139_v63, %s3924_s24  ;;  %s3949_s24 = smov 104  }
 0x20a   : > { %v642_v58 = vpop.xlane.xlu0 %641 }
 0x20b   : > { %v643_v59 = vsub.f32 %v636_v56, %v642_v58  ;;  %v3935_v56 = vmov 7  }
 0x20d   : > { %v644_v60 = vmul.f32 1.442695, %v643_v59 }
 0x20e   : > { %v728_v3 = vpop.permute.xlu0 %727 }
 0x20f   : > { %3855 = vpow2.f32 %v644_v60 }
 0x216   : > { %v731_v9 = vpop.permute.xlu0 %730 }
 0x217   : > { %v756_v17 = vrot.slane %v731_v9, %v4107_v33 }
 0x219   : > { %v3856_v61 = vpop.eup %3855 }
 0x21a   : > { %v646_v62 = vsel %vm639_vm10, %v3856_v61, 0.0  ;;  %v740_v13 = vpop.permute.xlu0 %739 }
 0x21b   : > { %647 = vadd.xlane.f32.xlu1 %v646_v62  ;;  %v768_v30 = vrot.slane %v740_v13, %v4107_v33 }
 0x21e   : > { %v746_v27 = vpop.permute.xlu0 %745 }
 0x21f   : > { %v776_v37 = vrot.slane %v746_v27, %v4107_v33 }
 0x222   : > { %v752_v38 = vpop.permute.xlu0 %751 }
 0x223   : > { %v784_v43 = vrot.slane %v752_v38, %v4107_v33 }
 0x226   : > { %v880_v55 = vpop.permute.xlu0 %879 }
 0x22c   : > { %725 = vrot.lane.b32.xlu1 %v4058_v12, %s3922_s16  ;;  %s3945_s16 = smov 116  }
 0x230   : > { %733 = vperm.xlu1 %3820, %v4080_v18  }
 0x234   : > { %736 = vperm.xlu1 %3820, %v4089_v21  }
 0x238   : > { %742 = vperm.xlu1 %3820, %v4094_v23  }
 0x23c   : > { %748 = vperm.xlu1 %3820, %v4100_v25  }
 0x240   : > { %3822 = vset.pattern.permute.xlu1 %v3923_v6 }
 0x2a8   : > { %v648_v0 = vpop.xlane.xlu1 %647 }
 0x2a9   : > { %3857 = vrcp.f32 %v648_v0 }
 0x2ac   : > { %v726_v4 = vpop.permute.xlu1 %725 }
 0x2b0   : > { %v734_v7 = vpop.permute.xlu1 %733 }
 0x2b1   : > { %v760_v14 = vrot.slane %v734_v7, %v4107_v33 }
 0x2b3   : > { %v3858_v1 = vpop.eup %3857  ;;  %v785_v26 = vsel %vm547_vm3, %v760_v14, %v756_v17 }
 0x2b4   : > { %v4147_v2 = vmul.f32 %v3858_v1, %v3856_v61  ;;  %v737_v11 = vpop.permute.xlu1 %736 }
 0x2b5   : > { %v764_v16 = vrot.slane %v737_v11, %v4107_v33 }
 0x2b6   : > { %3632 = vmatmul.mubr.msk.f32.vlgmr.msra.gmra.mrb[2].mxu1 %vm639_vm10, %v4147_v2 }
 0x2b7   : > { %3635 = vmatpush3.xpose.msk.msra.mxu1 %vm562_vm2, %v728_v3  ;;  %3636 = vmatprep.mubr.msk.f32.mxu1 %vm3919_vm0, %v3918_v5  ;;  %v786_v28 = vsel %vm549_vm4, %v764_v16, %v785_v26 }
 0x2b8   : > { %3639 = vmatprep.subr.mxu1 %v3918_v5  ;;  %v743_v15 = vpop.permute.xlu1 %742  ;;  %v787_v34 = vsel %vm551_vm5, %v768_v30, %v786_v28 }
 0x2b9   : > { %v772_v29 = vrot.slane %v743_v15, %v4107_v33 }
 0x2ba   : > { %3637 = vmatmul.mubr.msk.f32.vlgmr.msra.gmra.mrb[4].mxu1 %vm562_vm2, %v726_v4 }
 0x2bb   : > { %3641 = vmatprep.mubr.msk.f32.mxu1 %vm3919_vm0, %v3918_v5  ;;  %v788_v35 = vsel %vm553_vm6, %v772_v29, %v787_v34  ;;  %3640 = vmatpush3.msra.mxu1 %v880_v55 }
 0x2bc   : > { %v749_v32 = vpop.permute.xlu1 %748  ;;  %v789_v40 = vsel %vm555_vm7, %v776_v37, %v788_v35  ;;  %3644 = vmatprep.subr.mxu1 %v3918_v5 }
 0x2bd   : > { %v780_v36 = vrot.slane %v749_v32, %v4107_v33 }
 0x2bf   : > { %v790_v42 = vsel %vm557_vm8, %v780_v36, %v789_v40 }
 0x2c0   : > { %v791_v44 = vsel %vm559_vm9, %v784_v43, %v790_v42 }
 0x389   : > { %v4171_v39 = vpop.f32.mrb[2].mxu1 }
 0x38a   : > { %v3633_v41 = vpop.f32.mrb[3].mxu1 }
 0x38d   : > { %v863_v45 = vpop.f32.mrb[4].mxu1 }
 0x38e   : > { %v4178_v46 = vadd.f32 %v863_v45, %v791_v44  ;;  %v3638_v47 = vpop.f32.mrb[5].mxu1 }
 0x390   : > { %v867_v48 = vsel %vm639_vm10, %v4178_v46, -inf }
 0x391   : > { %868 = vmax.xlane.f32.xlu1 %v867_v48 }
 0x3a2   : > { %957 = vrot.lane.b32.xlu1 %v4052_v10, %s3925_s25 }
 0x3a6   : > { %955 = vrot.lane.b32.xlu1 %v4058_v12, %s3925_s25  ;;  %s3950_s25 = smov 80  }
 0x3aa   : > { %1184 = vrot.lane.b32.xlu1 %v4058_v12, %s3926_s26 }
 0x3ae   : > { %1429 = vrot.lane.b32.xlu1 %v4187_v49, %s3927_s27 }
 0x3b2   : > { %1421 = vrot.lane.b32.xlu1 %v1414_v50, %s3927_s27 }
 0x3b6   : > { %1665 = vrot.lane.b32.xlu1 %v1414_v50, %s3928_s28 }
 0x3ba   : > { %1894 = vrot.lane.b32.xlu1 %v1414_v50, %s3929_s29 }
 0x3be   : > { %2123 = vrot.lane.b32.xlu1 %v1414_v50, %s3930_s30 }
 0x3c2   : > { %963 = vperm.xlu1 %3822, %v4080_v18  }
 0x3c6   : > { %966 = vperm.xlu1 %3822, %v4089_v21  }
 0x3ca   : > { %3823 = vset.pattern.permute.xlu1 %v3931_v51 }
 0x3cb   : > { %1192 = vperm.xlu1 %3823, %v4080_v18  }
 0x3cf   : > { %3824 = vset.pattern.permute.xlu1 %v3923_v6 }
 0x3d0   : > { %969 = vperm.xlu1 %3824, %v4085_v20  }
 0x3d4   : > { %3825 = vset.pattern.permute.xlu1 %v3932_v52 }
 0x3d5   : > { %1433 = vperm.xlu1 %3825, %v4083_v19  }
 0x3d9   : > { %3826 = vset.pattern.permute.xlu1 %v3923_v6 }
 0x3da   : > { %972 = vperm.xlu1 %3826, %v4094_v23  }
 0x3de   : > { %3827 = vset.pattern.permute.xlu1 %v3931_v51 }
 0x3df   : > { %1198 = vperm.xlu1 %3827, %v4085_v20  }
 0x3e3   : > { %3828 = vset.pattern.permute.xlu1 %v3933_v53 }
 0x3e4   : > { %1670 = vperm.xlu1 %3828, %v4083_v19  }
 0x3e8   : > { %3831 = vset.pattern.permute.xlu1 %v3923_v6 }
 0x3e9   : > { %975 = vperm.xlu1 %3831, %v4091_v22  }
 0x3ed   : > { %3832 = vset.pattern.permute.xlu1 %v3931_v51 }
 0x3ee   : > { %1201 = vperm.xlu1 %3832, %v4094_v23  }
 0x3f2   : > { %3833 = vset.pattern.permute.xlu1 %v3933_v53 }
 0x3f3   : > { %1676 = vperm.xlu1 %3833, %v4089_v21  }
 0x3f7   : > { %3834 = vset.pattern.permute.xlu1 %v3934_v54 }
 0x3f8   : > { %1899 = vperm.xlu1 %3834, %v4083_v19  }
 0x3fc   : > { %3835 = vset.pattern.permute.xlu1 %v3923_v6 }
 0x3fd   : > { %978 = vperm.xlu1 %3835, %v4100_v25  }
 0x401   : > { %3836 = vset.pattern.permute.xlu1 %v3931_v51 }
 0x402   : > { %1204 = vperm.xlu1 %3836, %v4091_v22  }
 0x406   : > { %3837 = vset.pattern.permute.xlu1 %v3933_v53 }
 0x407   : > { %1679 = vperm.xlu1 %3837, %v4085_v20  }
 0x40b   : > { %3838 = vset.pattern.permute.xlu1 %v3934_v54 }
 0x40c   : > { %1905 = vperm.xlu1 %3838, %v4089_v21  }
 0x410   : > { %3839 = vset.pattern.permute.xlu1 %v3935_v56 }
 0x411   : > { %2131 = vperm.xlu1 %3839, %v4080_v18  }
 0x415   : > { %3840 = vset.pattern.permute.xlu1 %v3923_v6 }
 0x416   : > { %981 = vperm.xlu1 %3840, %v4097_v24  }
 0x41a   : > { %3842 = vset.pattern.permute.xlu1 %v3932_v52 }
 0x41b   : > { %1448 = vperm.xlu1 %3842, %v4091_v22  }
 0x41e   : > { %v869_v57 = vpop.xlane.xlu1 %868 }
 0x41f   : > { %v870_v58 = vsub.f32 %v4178_v46, %v869_v57  ;;  %3843 = vset.pattern.permute.xlu1 %v3933_v53 }
 0x420   : > { %1682 = vperm.xlu1 %3843, %v4094_v23  }
 0x421   : > { %v871_v59 = vmul.f32 1.442695, %v870_v58 }
 0x423   : > { %3859 = vpow2.f32 %v871_v59 }
 0x424   : > { %3844 = vset.pattern.permute.xlu1 %v3935_v56 }
 0x425   : > { %2134 = vperm.xlu1 %3844, %v4089_v21  }
 0x429   : > { %3845 = vset.pattern.permute.xlu1 %v3931_v51 }
 0x42a   : > { %1210 = vperm.xlu1 %3845, %v4097_v24  }
 0x42d   : > { %v4240_v60 = vpop.eup %3859 }
 0x42e   : > { %3847 = vset.pattern.permute.xlu1 %v3933_v53  ;;  %v873_v61 = vsel %vm639_vm10, %v4240_v60, 0.0 }
 0x42f   : > { %1685 = vperm.xlu1 %3847, %v4091_v22   ;;  %874 = vadd.xlane.f32.xlu0 %v873_v61 }
 0x433   : > { %3848 = vset.pattern.permute.xlu1 %v3934_v54 }
 0x434   : > { %1911 = vperm.xlu1 %3848, %v4094_v23  }
 0x438   : > { %3849 = vset.pattern.permute.xlu1 %v3932_v52 }
 0x439   : > { %1454 = vperm.xlu1 %3849, %v4097_v24  }
 0x43d   : > { %3850 = vset.pattern.permute.xlu1 %v3933_v53 }
 0x43e   : > { %1688 = vperm.xlu1 %3850, %v4100_v25  }
 0x442   : > { %3851 = vset.pattern.permute.xlu1 %v3935_v56 }
 0x443   : > { %2140 = vperm.xlu1 %3851, %v4094_v23  }
 0x445   : > { %1186 = vrot.lane.b32.xlu0 %v4052_v10, %s3926_s26  ;;  %s3951_s26 = smov 88  }
 0x447   : > { %3852 = vset.pattern.permute.xlu1 %v3933_v53 }
 0x448   : > { %1691 = vperm.xlu1 %3852, %v4097_v24  }
 0x449   : > { %1427 = vrot.lane.b32.xlu0 %v4052_v10, %s3927_s27  ;;  %v958_v10 = vpop.permute.xlu1 %957 }
 0x44c   : > { %3853 = vset.pattern.permute.xlu1 %v3935_v56 }
 0x44d   : > { %2143 = vperm.xlu1 %3853, %v4091_v22   ;;  %1419 = vrot.lane.b32.xlu0 %v4058_v12, %s3927_s27  ;;  %v956_v12 = vpop.permute.xlu1 %955 }
 0x451   : > { %2146 = vperm.xlu1 %3853, %v4100_v25   ;;  %1667 = vrot.lane.b32.xlu0 %v4187_v49, %s3928_s28  ;;  %v1185_v62 = vpop.permute.xlu1 %1184  ;;  %s3952_s28 = smov 28  }
 0x455   : > { %1896 = vrot.lane.b32.xlu0 %v4187_v49, %s3929_s29  ;;  %v1430_v0 = vpop.permute.xlu1 %1429  ;;  %s3953_s29 = smov 60  }
 0x459   : > { %2125 = vrot.lane.b32.xlu0 %v4187_v49, %s3930_s30  ;;  %v1422_v1 = vpop.permute.xlu1 %1421  ;;  %s3543_s30 = sshll.u32 %s4746_s18, 5  ;;  %s3957_s18 = smov 68  }
 0x45d   : > { %960 = vperm.xlu0 %3821, %v4083_v19   ;;  %v1666_v3 = vpop.permute.xlu1 %1665 }
 0x461   : > { %3829 = vset.pattern.permute.xlu0 %v3933_v53 }
 0x462   : > { %1673 = vperm.xlu0 %3829, %v4080_v18  }
 0x466   : > { %3830 = vset.pattern.permute.xlu0 %v3931_v51 }
 0x467   : > { %1189 = vperm.xlu0 %3830, %v4083_v19  }
 0x46b   : > { %1195 = vperm.xlu0 %3830, %v4089_v21  }
 0x46f   : > { %1207 = vperm.xlu0 %3830, %v4100_v25  }
 0x473   : > { %3841 = vset.pattern.permute.xlu0 %v3932_v52 }
 0x474   : > { %1436 = vperm.xlu0 %3841, %v4080_v18  }
 0x478   : > { %1439 = vperm.xlu0 %3841, %v4089_v21   ;;  %v1895_v21 = vpop.permute.xlu1 %1894 }
 0x47c   : > { %1442 = vperm.xlu0 %3841, %v4085_v20  }
 0x480   : > { %1445 = vperm.xlu0 %3841, %v4094_v23   ;;  %v2124_v23 = vpop.permute.xlu1 %2123 }
 0x484   : > { %1451 = vperm.xlu0 %3841, %v4100_v25   ;;  %v4293_v4 = vpop.permute.xlu1 %963 }
 0x488   : > { %3846 = vset.pattern.permute.xlu0 %v3934_v54 }
 0x489   : > { %1902 = vperm.xlu0 %3846, %v4080_v18   ;;  %v4296_v18 = vpop.permute.xlu1 %966 }
 0x48d   : > { %1908 = vperm.xlu0 %3846, %v4085_v20  }
 0x491   : > { %1914 = vperm.xlu0 %3846, %v4091_v22   ;;  %v4298_v22 = vpop.permute.xlu1 %1192 }
 0x495   : > { %1917 = vperm.xlu0 %3846, %v4100_v25   ;;  %v4300_v6 = vpop.permute.xlu1 %969 }
 0x499   : > { %1920 = vperm.xlu0 %3846, %v4097_v24   ;;  %v4302_v25 = vpop.permute.xlu1 %1433 }
 0x49d   : > { %3854 = vset.pattern.permute.xlu0 %v3935_v56  ;;  %v4304_v11 = vpop.permute.xlu1 %972 }
 0x49e   : > { %2128 = vperm.xlu0 %3854, %v4083_v19  }
 0x4a2   : > { %2137 = vperm.xlu0 %3854, %v4085_v20   ;;  %v4306_v20 = vpop.permute.xlu1 %1198 }
 0x4a6   : > { %2149 = vperm.xlu0 %3854, %v4097_v24   ;;  %v1671_v16 = vpop.permute.xlu1 %1670 }
 0x4a7   : > { %v1696_v36 = vrot.slane %v1671_v16, %v4107_v33 }
 0x4aa   : > { %v4327_v27 = vpop.permute.xlu1 %975 }
 0x4ae   : > { %v4336_v30 = vpop.permute.xlu1 %1201 }
 0x4b2   : > { %v1677_v34 = vpop.permute.xlu1 %1676 }
 0x4b3   : > { %v1704_v38 = vrot.slane %v1677_v34, %v4107_v33  ;;  %v1231_v34 = vrot.slane %v4336_v30, %v4107_v33 }
 0x4b6   : > { %v4360_v42 = vpop.permute.xlu1 %1899 }
 0x4ba   : > { %v979_v43 = vpop.permute.xlu1 %978 }
 0x4bc   : > { %v875_v7 = vpop.xlane.xlu0 %874 }
 0x4bd   : > { %3861 = vrcp.f32 %v875_v7 }
 0x4be   : > { %v4362_v44 = vpop.permute.xlu1 %1204 }
 0x4c0   : > { %v1187_v9 = vpop.permute.xlu0 %1186 }
 0x4c2   : > { %v4364_v46 = vpop.permute.xlu1 %1679 }
 0x4c4   : > { %v1428_v19 = vpop.permute.xlu0 %1427 }
 0x4c5   : > { %v1431_v26 = vsel %vm1423_vm11, %v1428_v19, %v1430_v0 }
 0x4c7   : > { %v3862_v13 = vpop.eup %3861 }
 0x4c8   : > { %v4309_v14 = vmul.f32 %v3862_v13, %v4240_v60  ;;  %v1420_v24 = vpop.permute.xlu0 %1419 }
 0x4c9   : > { %v1424_v28 = vsel %vm1423_vm11, %v1420_v24, %v1422_v1  ;;  %v990_v1 = vrot.slane %v4293_v4, %v4107_v33  ;;  %v1219_v24 = vrot.slane %v4298_v22, %v4107_v33  ;;  %v998_v4 = vrot.slane %v4300_v6, %v4107_v33 }
 0x4ca   : > { %3642 = vmatmul.mubr.msk.f32.vlgmr.msra.gmra.mrb[6].mxu1 %vm639_vm10, %v4309_v14  ;;  %v1006_v6 = vrot.slane %v4327_v27, %v4107_v33  ;;  %v1459_v27 = vrot.slane %v4302_v25, %v4107_v33 }
 0x4cb   : > { %3645 = vmatpush3.xpose.msk.msra.mxu1 %vm562_vm2, %v958_v10  ;;  %3646 = vmatprep.mubr.msk.f32.mxu1 %vm3919_vm0, %v3918_v5 }
 0x4cc   : > { %3654 = vmatprep.subr.mxu1 %v3918_v5  ;;  %v1668_v15 = vpop.permute.xlu0 %1667 }
 0x4ce   : > { %3647 = vmatmul.mubr.msk.f32.vlgmr.msra.gmra.mrb[8].mxu1 %vm562_vm2, %v956_v12 }
 0x4cf   : > { %3655 = vmatpush3.xpose.msk.msra.mxu1 %vm562_vm2, %v1187_v9  ;;  %3656 = vmatprep.mubr.msk.f32.mxu1 %vm3919_vm0, %v3918_v5 }
 0x4d0   : > { %3664 = vmatprep.subr.mxu1 %v3918_v5  ;;  %v1897_v17 = vpop.permute.xlu0 %1896 }
 0x4d2   : > { %3657 = vmatmul.mubr.msk.f32.vlgmr.msra.gmra.mrb[10].mxu1 %vm562_vm2, %v1185_v62 }
 0x4d3   : > { %3665 = vmatpush3.xpose.msk.msra.mxu1 %vm562_vm2, %v1431_v26  ;;  %3666 = vmatprep.mubr.msk.f32.mxu1 %vm3919_vm0, %v3918_v5 }
 0x4d4   : > { %3674 = vmatprep.subr.mxu1 %v3918_v5  ;;  %v2126_v29 = vpop.permute.xlu0 %2125 }
 0x4d6   : > { %3667 = vmatmul.mubr.msk.f32.vlgmr.msra.gmra.mrb[12].mxu1 %vm562_vm2, %v1424_v28 }
 0x4d7   : > { %3675 = vmatpush3.xpose.msk.msra.mxu1 %vm562_vm2, %v1668_v15  ;;  %3676 = vmatprep.mubr.msk.f32.mxu1 %vm3919_vm0, %v3918_v5 }
 0x4d8   : > { %3684 = vmatprep.subr.mxu1 %v3918_v5 }
 0x4da   : > { %3677 = vmatmul.mubr.msk.f32.vlgmr.msra.gmra.mrb[14].mxu1 %vm562_vm2, %v1666_v3 }
 0x4db   : > { %3685 = vmatpush3.xpose.msk.msra.mxu1 %vm562_vm2, %v1897_v17  ;;  %3686 = vmatprep.mubr.msk.f32.mxu1 %vm3919_vm0, %v3918_v5  ;;  %v1002_v17 = vrot.slane %v4304_v11, %v4107_v33 }
 0x4dc   : > { %v961_v32 = vpop.permute.xlu0 %960  ;;  %3694 = vmatprep.subr.mxu1 %v3918_v5 }
 0x4dd   : > { %v986_v0 = vrot.slane %v961_v32, %v4107_v33 }
 0x4de   : > { %3687 = vmatmul.mubr.msk.f32.vlgmr.msra.gmra.mrb[16].mxu1 %vm562_vm2, %v1895_v21 }
 0x4df   : > { %3695 = vmatpush3.xpose.msk.msra.mxu1 %vm562_vm2, %v2126_v29  ;;  %3696 = vmatprep.mubr.msk.f32.mxu1 %vm3919_vm0, %v3918_v5  ;;  %v1015_v21 = vsel %vm547_vm3, %v990_v1, %v986_v0  ;;  %v1227_v29 = vrot.slane %v4306_v20, %v4107_v33  ;;  %v1708_v1 = vrot.slane %v4364_v46, %v4107_v33 }
 0x4e0   : > { %3704 = vmatprep.subr.mxu1 %v3918_v5 }
 0x4e1   : > { %v1674_v35 = vpop.permute.xlu0 %1673 }
 0x4e2   : > { %v1700_v37 = vrot.slane %v1674_v35, %v4107_v33  ;;  %3697 = vmatmul.mubr.msk.f32.vlgmr.msra.gmra.mrb[18].mxu1 %vm562_vm2, %v2124_v23  ;;  %v994_v23 = vrot.slane %v4296_v18, %v4107_v33  ;;  %vm2382_vm2 = vcmask 457728  }
 0x4e3   : > { %3705 = vmatpush3.msra.mxu1 %v4040_v8  ;;  %3706 = vmatprep.mubr.msk.f32.mxu1 %vm3919_vm0, %v3918_v5  ;;  %v4366_v8 = vpop.permute.xlu1 %1905 }
 0x4e4   : > { %v1725_v40 = vsel %vm547_vm3, %v1700_v37, %v1696_v36  ;;  %3714 = vmatprep.subr.mxu1 %v3918_v5  ;;  %v1016_v19 = vsel %vm549_vm4, %v994_v23, %v1015_v21  ;;  %v1010_v37 = vrot.slane %v979_v43, %v4107_v33 }
 0x4e5   : > { %v4358_v41 = vsel %vm549_vm4, %v1704_v38, %v1725_v40  ;;  %v1017_v16 = vsel %vm551_vm5, %v998_v4, %v1016_v19 }
 0x4e6   : > { %v1190_v45 = vpop.permute.xlu0 %1189  ;;  %v1018_v22 = vsel %vm553_vm6, %v1002_v17, %v1017_v16 }
 0x4e7   : > { %v4370_v49 = vpop.permute.xlu1 %2131  ;;  %v1215_v9 = vrot.slane %v1190_v45, %v4107_v33  ;;  %v1019_v36 = vsel %vm555_vm7, %v1006_v6, %v1018_v22  ;;  %v1235_v45 = vrot.slane %v4362_v44, %v4107_v33 }
 0x4e9   : > { %v1244_v18 = vsel %vm547_vm3, %v1219_v24, %v1215_v9 }
 0x4ea   : > { %v1196_v47 = vpop.permute.xlu0 %1195 }
 0x4eb   : > { %v4372_v51 = vpop.permute.xlu1 %981  ;;  %v1223_v13 = vrot.slane %v1196_v47, %v4107_v33 }
 0x4ec   : > { %v1014_v25 = vrot.slane %v4372_v51, %v4107_v33 }
 0x4ed   : > { %v1245_v26 = vsel %vm549_vm4, %v1223_v13, %v1244_v18 }
 0x4ee   : > { %v4368_v48 = vpop.permute.xlu0 %1207  ;;  %v1246_v32 = vsel %vm551_vm5, %v1227_v29, %v1245_v26 }
 0x4ef   : > { %v4374_v53 = vpop.permute.xlu1 %1448  ;;  %v1247_v40 = vsel %vm553_vm6, %v1231_v34, %v1246_v32 }
 0x4f0   : > { %v1479_v17 = vrot.slane %v4374_v53, %v4107_v33 }
 0x4f3   : > { %v1437_v50 = vpop.permute.xlu0 %1436  ;;  %v4376_v55 = vpop.permute.xlu1 %1682 }
 0x4f4   : > { %v1463_v11 = vrot.slane %v1437_v50, %v4107_v33  ;;  %v1239_v50 = vrot.slane %v4368_v48, %v4107_v33  ;;  %v1712_v21 = vrot.slane %v4376_v55, %v4107_v33 }
 0x4f6   : > { %v1488_v44 = vsel %vm547_vm3, %v1463_v11, %v1459_v27 }
 0x4f7   : > { %v1440_v52 = vpop.permute.xlu0 %1439  ;;  %v4378_v57 = vpop.permute.xlu1 %2134 }
 0x4f8   : > { %v1467_v20 = vrot.slane %v1440_v52, %v4107_v33  ;;  %v1020_v52 = vsel %vm557_vm8, %v1010_v37, %v1019_v36 }
 0x4f9   : > { %v1021_v19 = vsel %vm559_vm9, %v1014_v25, %v1020_v52 }
 0x4fa   : > { %v1489_v48 = vsel %vm549_vm4, %v1467_v20, %v1488_v44 }
 0x4fb   : > { %v1443_v54 = vpop.permute.xlu0 %1442  ;;  %v4382_v59 = vpop.permute.xlu1 %1210 }
 0x4fc   : > { %v1471_v30 = vrot.slane %v1443_v54, %v4107_v33  ;;  %v1248_v54 = vsel %vm555_vm7, %v1235_v45, %v1247_v40  ;;  %v1243_v26 = vrot.slane %v4382_v59, %v4107_v33  ;;  %v1933_v45 = vrot.slane %v4366_v8, %v4107_v33 }
 0x4fd   : > { %v1249_v18 = vsel %vm557_vm8, %v1239_v50, %v1248_v54 }
 0x4fe   : > { %v1490_v9 = vsel %vm551_vm5, %v1471_v30, %v1489_v48  ;;  %v1250_v59 = vsel %vm559_vm9, %v1243_v26, %v1249_v18 }
 0x4ff   : > { %v1446_v56 = vpop.permute.xlu0 %1445  ;;  %v4386_v61 = vpop.permute.xlu1 %1685 }
 0x500   : > { %v1475_v43 = vrot.slane %v1446_v56, %v4107_v33  ;;  %v1727_v56 = vsel %vm551_vm5, %v1708_v1, %v4358_v41  ;;  %v2158_v41 = vrot.slane %v4370_v49, %v4107_v33  ;;  %v1716_v22 = vrot.slane %v4386_v61, %v4107_v33 }
 0x501   : > { %v1728_v49 = vsel %vm553_vm6, %v1712_v21, %v1727_v56 }
 0x502   : > { %v1491_v13 = vsel %vm553_vm6, %v1475_v43, %v1490_v9  ;;  %v1729_v27 = vsel %vm555_vm7, %v1716_v22, %v1728_v49 }
 0x503   : > { %v4380_v58 = vpop.permute.xlu0 %1451  ;;  %v4390_v12 = vpop.permute.xlu1 %1911 }
 0x504   : > { %v1483_v24 = vrot.slane %v4380_v58, %v4107_v33  ;;  %v1925_v58 = vrot.slane %v4360_v42, %v4107_v33  ;;  %v2162_v42 = vrot.slane %v4378_v57, %v4107_v33  ;;  %v1941_v21 = vrot.slane %v4390_v12, %v4107_v33 }
 0x507   : > { %v4397_v3 = vpop.permute.xlu1 %1454 }
 0x508   : > { %v4384_v60 = vpop.permute.xlu0 %1902  ;;  %v1487_v37 = vrot.slane %v4397_v3, %v4107_v33 }
 0x509   : > { %v1929_v29 = vrot.slane %v4384_v60, %v4107_v33  ;;  %v1492_v60 = vsel %vm555_vm7, %v1479_v17, %v1491_v13 }
 0x50a   : > { %v1493_v36 = vsel %vm557_vm8, %v1483_v24, %v1492_v60 }
 0x50b   : > { %v4411_v15 = vpop.permute.xlu1 %1688  ;;  %v1494_v43 = vsel %vm559_vm9, %v1487_v37, %v1493_v36 }
 0x50c   : > { %v4388_v10 = vpop.permute.xlu0 %1908  ;;  %v1720_v57 = vrot.slane %v4411_v15, %v4107_v33 }
 0x50d   : > { %v1937_v40 = vrot.slane %v4388_v10, %v4107_v33 }
 0x50e   : > { %v1730_v15 = vsel %vm557_vm8, %v1720_v57, %v1729_v27 }
 0x50f   : > { %v4428_v35 = vpop.permute.xlu1 %2140 }
 0x510   : > { %v4392_v62 = vpop.permute.xlu0 %1914  ;;  %v2170_v10 = vrot.slane %v4428_v35, %v4107_v33 }
 0x511   : > { %v1945_v54 = vrot.slane %v4392_v62, %v4107_v33 }
 0x513   : > { %v1692_v23 = vpop.permute.xlu1 %1691 }
 0x514   : > { %v4402_v7 = vpop.permute.xlu0 %1917  ;;  %v1724_v25 = vrot.slane %v1692_v23, %v4107_v33 }
 0x515   : > { %v1949_v48 = vrot.slane %v4402_v7, %v4107_v33 }
 0x517   : > { %v2144_v20 = vpop.permute.xlu1 %2143 }
 0x518   : > { %v4418_v28 = vpop.permute.xlu0 %1920  ;;  %v2174_v9 = vrot.slane %v2144_v20, %v4107_v33 }
 0x519   : > { %v1953_v23 = vrot.slane %v4418_v28, %v4107_v33 }
 0x51d   : > { %v2129_v38 = vpop.permute.xlu0 %2128 }
 0x51e   : > { %v2154_v46 = vrot.slane %v2129_v38, %v4107_v33  ;;  %v1954_v38 = vsel %vm547_vm3, %v1929_v29, %v1925_v58 }
 0x51f   : > { %v1955_v52 = vsel %vm549_vm4, %v1933_v45, %v1954_v38 }
 0x520   : > { %v2183_v32 = vsel %vm547_vm3, %v2158_v41, %v2154_v46  ;;  %v1956_v44 = vsel %vm551_vm5, %v1937_v40, %v1955_v52  ;;  %v2147_v46 = vpop.permute.xlu1 %2146  ;;  %vm2384_vm3 = vcmask 687104  }
 0x521   : > { %v2138_v4 = vpop.permute.xlu0 %2137  ;;  %v2184_v30 = vsel %vm549_vm4, %v2162_v42, %v2183_v32  ;;  %vm2386_vm4 = vcmask 916480  }
 0x522   : > { %v2166_v53 = vrot.slane %v2138_v4, %v4107_v33 }
 0x524   : > { %v2185_v3 = vsel %vm551_vm5, %v2166_v53, %v2184_v30  ;;  %vm2391_vm5 = vcmask 556032  }
 0x525   : > { %v2186_v35 = vsel %vm553_vm6, %v2170_v10, %v2185_v3  ;;  %v2150_v12 = vpop.permute.xlu0 %2149 }
 0x526   : > { %v2187_v4 = vsel %vm555_vm7, %v2174_v9, %v2186_v35  ;;  %v2182_v28 = vrot.slane %v2150_v12, %v4107_v33 }
 0x59d   : > { %v4440_v47 = vpop.f32.mrb[6].mxu1 }
 0x59e   : > { %v3643_v0 = vpop.f32.mrb[7].mxu1 }
 0x5a1   : > { %v1093_v51 = vpop.f32.mrb[8].mxu1 }
 0x5a2   : > { %v4463_v55 = vadd.f32 %v1093_v51, %v1021_v19  ;;  %v3648_v16 = vpop.f32.mrb[9].mxu1  ;;  %v1731_v19 = vsel %vm559_vm9, %v1724_v25, %v1730_v15  ;;  %v1957_v51 = vsel %vm553_vm6, %v1941_v21, %v1956_v44  ;;  %vm3326_vm6 = vcmask 523264  }
 0x5a3   : > { %v1958_v7 = vsel %vm555_vm7, %v1945_v54, %v1957_v51  ;;  %v2178_v16 = vrot.slane %v2147_v46, %v4107_v33  ;;  %vm3328_vm7 = vcmask 785408  }
 0x5a4   : > { %v1097_v6 = vsel %vm639_vm10, %v4463_v55, -inf  ;;  %v1959_v41 = vsel %vm557_vm8, %v1949_v48, %v1958_v7 }
 0x5a5   : > { %1098 = vmax.xlane.f32.xlu1 %v1097_v6  ;;  %v1322_v34 = vpop.f32.mrb[10].mxu1  ;;  %v1960_v17 = vsel %vm559_vm9, %v1953_v23, %v1959_v41  ;;  %v2188_v22 = vsel %vm557_vm8, %v2178_v16, %v2187_v4 }
 0x5a6   : > { %v4487_v11 = vadd.f32 %v1322_v34, %v1250_v59  ;;  %v3658_v61 = vpop.f32.mrb[11].mxu1  ;;  %v2189_v49 = vsel %vm559_vm9, %v2182_v28, %v2188_v22 }
 0x5a8   : > { %v1326_v50 = vsel %vm639_vm10, %v4487_v11, -inf }
 0x5a9   : > { %1327 = vmax.xlane.f32.xlu0 %v1326_v50  ;;  %v1566_v0 = vpop.f32.mrb[12].mxu1 }
 0x5aa   : > { %v1567_v8 = vadd.f32 %v1566_v0, %v1494_v43  ;;  %v3668_v1 = vpop.f32.mrb[13].mxu1 }
 0x5ac   : > { %v1570_v56 = vsel %vm639_vm10, %v1567_v8, -inf }
 0x5ad   : > { %1571 = vmax.xlane.f32.xlu1 %v1570_v56  ;;  %v1803_v62 = vpop.f32.mrb[14].mxu1 }
 0x5ae   : > { %v1804_v13 = vadd.f32 %v1803_v62, %v1731_v19  ;;  %v3678_v24 = vpop.f32.mrb[15].mxu1 }
 0x5b0   : > { %v1807_v18 = vsel %vm639_vm10, %v1804_v13, -inf }
 0x5b1   : > { %1808 = vmax.xlane.f32.xlu0 %v1807_v18  ;;  %v2032_v26 = vpop.f32.mrb[16].mxu1 }
 0x5b2   : > { %v2033_v29 = vadd.f32 %v2032_v26, %v1960_v17  ;;  %v3688_v58 = vpop.f32.mrb[17].mxu1  ;;  %v1582_v26 = vld [vmem:[%s4136_s23 + $0x8] sm:$0xff]  ;;  %s3948_s23 = smov 96  }
 0x5b4   : > { %v2036_v6 = vsel %vm639_vm10, %v2033_v29, -inf }
 0x5b5   : > { %2037 = vmax.xlane.f32.xlu1 %v2036_v6  ;;  %v2261_v32 = vpop.f32.mrb[18].mxu1 }
 0x5b6   : > { %v2262_v53 = vadd.f32 %v2261_v32, %v2189_v49  ;;  %v3698_v59 = vpop.f32.mrb[19].mxu1 }
 0x5b8   : > { %v2265_v34 = vsel %vm639_vm10, %v2262_v53, -inf }
 0x5b9   : > { %2266 = vmax.xlane.f32.xlu0 %v2265_v34 }
 0x632   : > { %v1099_v33 = vpop.xlane.xlu1 %1098 }
 0x633   : > { %v1100_v60 = vsub.f32 %v4463_v55, %v1099_v33 }
 0x635   : > { %v1101_v42 = vmul.f32 1.442695, %v1100_v60 }
 0x636   : > { %v1328_v61 = vpop.xlane.xlu0 %1327 }
 0x637   : > { %3863 = vpow2.f32 %v1101_v42  ;;  %v1329_v36 = vsub.f32 %v4487_v11, %v1328_v61 }
 0x639   : > { %v1330_v37 = vmul.f32 1.442695, %v1329_v36 }
 0x63a   : > { %v1572_v20 = vpop.xlane.xlu1 %1571 }
 0x63b   : > { %3865 = vpow2.f32 %v1330_v37  ;;  %v1573_v38 = vsub.f32 %v1567_v8, %v1572_v20 }
 0x63d   : > { %v1574_v40 = vmul.f32 1.442695, %v1573_v38 }
 0x63e   : > { %v1809_v27 = vpop.xlane.xlu0 %1808 }
 0x63f   : > { %3867 = vpow2.f32 %v1574_v40  ;;  %v1810_v45 = vsub.f32 %v1804_v13, %v1809_v27 }
 0x641   : > { %v3864_v57 = vpop.eup %3863  ;;  %v1811_v30 = vmul.f32 1.442695, %v1810_v45 }
 0x642   : > { %v2038_v50 = vpop.xlane.xlu1 %2037  ;;  %v1103_v3 = vsel %vm639_vm10, %v3864_v57, 0.0 }
 0x643   : > { %3869 = vpow2.f32 %v1811_v30  ;;  %v2039_v55 = vsub.f32 %v2033_v29, %v2038_v50  ;;  %1104 = vadd.xlane.f32.xlu1 %v1103_v3 }
 0x645   : > { %v3866_v43 = vpop.eup %3865  ;;  %v2040_v0 = vmul.f32 1.442695, %v2039_v55 }
 0x646   : > { %v2267_v10 = vpop.xlane.xlu0 %2266  ;;  %v1332_v11 = vsel %vm639_vm10, %v3866_v43, 0.0 }
 0x647   : > { %3871 = vpow2.f32 %v2040_v0  ;;  %v2268_v52 = vsub.f32 %v2262_v53, %v2267_v10  ;;  %1333 = vadd.xlane.f32.xlu0 %v1332_v11 }
 0x649   : > { %v3868_v8 = vpop.eup %3867  ;;  %v2269_v1 = vmul.f32 1.442695, %v2268_v52 }
 0x64a   : > { %v1576_v15 = vsel %vm639_vm10, %v3868_v8, 0.0 }
 0x64b   : > { %3873 = vpow2.f32 %v2269_v1  ;;  %1577 = vadd.xlane.f32.xlu1 %v1576_v15 }
 0x64d   : > { %v3870_v25 = vpop.eup %3869 }
 0x64e   : > { %v1813_v44 = vsel %vm639_vm10, %v3870_v25, 0.0 }
 0x64f   : > { %1814 = vadd.xlane.f32.xlu0 %v1813_v44 }
 0x651   : > { %v3872_v54 = vpop.eup %3871 }
 0x652   : > { %v2042_v21 = vsel %vm639_vm10, %v3872_v54, 0.0 }
 0x653   : > { %2043 = vadd.xlane.f32.xlu1 %v2042_v21 }
 0x655   : > { %v3874_v48 = vpop.eup %3873 }
 0x656   : > { %v2271_v35 = vsel %vm639_vm10, %v3874_v48, 0.0 }
 0x657   : > { %2272 = vadd.xlane.f32.xlu0 %v2271_v35 }
 0x664   : > { %2393 = vrot.lane.b32.xlu1 %v4309_v14, %s3936_s6 }
 0x6d0   : > { %v1105_v56 = vpop.xlane.xlu1 %1104 }
 0x6d1   : > { %3875 = vrcp.f32 %v1105_v56 }
 0x6d4   : > { %v1334_v9 = vpop.xlane.xlu0 %1333 }
 0x6d5   : > { %3877 = vrcp.f32 %v1334_v9 }
 0x6d8   : > { %v1578_v46 = vpop.xlane.xlu1 %1577 }
 0x6d9   : > { %3879 = vrcp.f32 %v1578_v46 }
 0x6db   : > { %v3876_v23 = vpop.eup %3875 }
 0x6dc   : > { %v1815_v19 = vpop.xlane.xlu0 %1814  ;;  %v1107_v62 = vmul.f32 %v3876_v23, %v3864_v57  ;;  %v3954_v57 = vmov 1983009808  }
 0x6dd   : > { %3881 = vrcp.f32 %v1815_v19  ;;  %v2448_v30 = vunpack.c.l.s4 %v3954_v57 }
 0x6de   : > { %2396 = vrot.lane.b32.xlu0 %v1107_v62, %s3937_s7 }
 0x6df   : > { %v3878_v51 = vpop.eup %3877  ;;  %v2449_v55 = vunpack.c.0.s8 %v2448_v30 }
 0x6e0   : > { %v2044_v12 = vpop.xlane.xlu1 %2043  ;;  %v4545_v13 = vmul.f32 %v3878_v51, %v3866_v43  ;;  %v3955_v43 = vmov 1934713408  }
 0x6e1   : > { %3883 = vrcp.f32 %v2044_v12  ;;  %v2512_v0 = vunpack.c.l.s4 %v3955_v43 }
 0x6e2   : > { %2399 = vrot.lane.b32.xlu1 %v4545_v13, %s3938_s8  ;;  %s4684_s8 = scalar_lea.vmem %s4740_s5, %s3543_s30 }
 0x6e3   : > { %v3880_v14 = vpop.eup %3879 }
 0x6e4   : > { %v2273_v24 = vpop.xlane.xlu0 %2272  ;;  %v4548_v7 = vmul.f32 %v3880_v14, %v3868_v8  ;;  %v2394_v29 = vpop.permute.xlu1 %2393  ;;  %v4610_v8 = vsub.s32 %v2449_v55, %v4104_v31 }
 0x6e5   : > { %3885 = vrcp.f32 %v2273_v24  ;;  %v2414_v49 = vsel %vm639_vm10, %v4147_v2, %v2394_v29 }
 0x6e6   : > { %2402 = vrot.lane.b32.xlu1 %v4548_v7, %s3939_s10 }
 0x6e7   : > { %v3882_v4 = vpop.eup %3881 }
 0x6e8   : > { %v4552_v16 = vmul.f32 %v3882_v4, %v3870_v25 }
 0x6ea   : > { %2405 = vrot.lane.b32.xlu0 %v4552_v16, %s3940_s11 }
 0x6eb   : > { %v3884_v18 = vpop.eup %3883 }
 0x6ec   : > { %v4556_v41 = vmul.f32 %v3884_v18, %v3872_v54 }
 0x6ee   : > { %2408 = vrot.lane.b32.xlu1 %v4556_v41, %s3941_s12 }
 0x6ef   : > { %v3886_v28 = vpop.eup %3885 }
 0x6f0   : > { %v4559_v17 = vmul.f32 %v3886_v28, %v3874_v48 }
 0x6f2   : > { %1108 = vrot.lane.b32.xlu1 %v4139_v63, %s3942_s13  ;;  %2411 = vrot.lane.b32.xlu0 %v4559_v17, %s3943_s14 }
 0x6f6   : > { %1337 = vrot.lane.b32.xlu0 %v4139_v63, %s3944_s15  ;;  %1585 = vrot.lane.b32.xlu1 %v4139_v63, %s3937_s7 }
 0x6fa   : > { %1587 = vrot.lane.b32.xlu0 %v1582_v26, %s3937_s7  ;;  %1818 = vrot.lane.b32.xlu1 %v1582_v26, %s3945_s16 }
 0x750   : > { %v2397_v22 = vpop.permute.xlu0 %2396 }
 0x751   : > { %v2415_v32 = vsel %vm1589_vm12, %v2414_v49, %v2397_v22 }
 0x754   : > { %v2400_v58 = vpop.permute.xlu1 %2399 }
 0x755   : > { %v2417_v63 = vsel %vm2416_vm13, %v2415_v32, %v2400_v58  ;;  %v3888_v32 = vld [vmem:[%s4031_s9 + $0x10] sm:$0xff] }
 0x758   : > { %v2403_v6 = vpop.permute.xlu1 %2402 }
 0x759   : > { %v2418_v34 = vsel %vm349_vm1, %v2417_v63, %v2403_v6 }
 0x75c   : > { %v2406_v53 = vpop.permute.xlu0 %2405 }
 0x75d   : > { %v2419_v33 = vsel %vm2389_vm14, %v2418_v34, %v2406_v53  ;;  %v3889_v53 = vld [vmem:[%s4031_s9 + $0x18] sm:$0xff] }
 0x760   : > { %v2409_v59 = vpop.permute.xlu1 %2408 }
 0x761   : > { %v2421_v60 = vsel %vm2420_vm15, %v2419_v33, %v2409_v59 }
 0x764   : > { %v1109_v42 = vpop.permute.xlu1 %1108  ;;  %v2412_v61 = vpop.permute.xlu0 %2411 }
 0x765   : > { %v4576_v36 = vsel %vm2382_vm2, %v2421_v60, %v2412_v61  ;;  %3650 = vmatpush3.msra.mxu0 %v1109_v42  ;;  %v3890_v42 = vld [vmem:[%s4031_s9 + $0x20] sm:$0xff]  ;;  %v3891_v61 = vld [vmem:[%s4031_s9 + $0x28] sm:$0xff] }
 0x766   : > { %3652 = vmatmul.mubr.msk.f32.vlgmr.msra.gmra.mrb[8].mxu0 %vm639_vm10, %v1107_v62  ;;  %2427 = vrot.lane.b32.xlu1 %v4576_v36, %s3946_s17 }
 0x767   : > { %2424 = vrot.lane.b32.xlu0 %v4576_v36, %s3947_s22  ;;  %3659 = vmatprep.subr.mxu0 %v3918_v5 }
 0x768   : > { %v1338_v2 = vpop.permute.xlu0 %1337  ;;  %3661 = vmatprep.mubr.msk.f32.mxu0 %vm3919_vm0, %v3918_v5  ;;  %v1586_v37 = vpop.permute.xlu1 %1585 }
 0x769   : > { %3660 = vmatpush3.msra.mxu0 %v1338_v2 }
 0x76a   : > { %2433 = vrot.lane.b32.xlu1 %v4576_v36, %s3948_s23  ;;  %3662 = vmatmul.mubr.msk.f32.vlgmr.msra.gmra.mrb[10].mxu0 %vm639_vm10, %v4545_v13 }
 0x76b   : > { %2430 = vrot.lane.b32.xlu0 %v4576_v36, %s3949_s24  ;;  %3669 = vmatprep.subr.mxu0 %v3918_v5 }
 0x76c   : > { %v1588_v20 = vpop.permute.xlu0 %1587  ;;  %3671 = vmatprep.mubr.msk.f32.mxu0 %vm3919_vm0, %v3918_v5  ;;  %v1819_v40 = vpop.permute.xlu1 %1818 }
 0x76d   : > { %v1590_v38 = vsel %vm1589_vm12, %v1586_v37, %v1588_v20 }
 0x76e   : > { %2439 = vrot.lane.b32.xlu1 %v4576_v36, %s3950_s25  ;;  %3670 = vmatpush3.msra.mxu0 %v1590_v38  ;;  %v3892_v38 = vld [vmem:[%s4031_s9 + $0x30] sm:$0xff] }
 0x76f   : > { %2436 = vrot.lane.b32.xlu0 %v4576_v36, %s3951_s26  ;;  %3672 = vmatmul.mubr.msk.f32.vlgmr.msra.gmra.mrb[12].mxu0 %vm639_vm10, %v4548_v7 }
 0x770   : > { %3679 = vmatprep.subr.mxu0 %v3918_v5  ;;  %3681 = vmatprep.mubr.msk.f32.mxu0 %vm3919_vm0, %v3918_v5 }
 0x771   : > { %3680 = vmatpush3.msra.mxu0 %v1819_v40  ;;  %v3893_v40 = vld [vmem:[%s4031_s9 + $0x38] sm:$0xff] }
 0x772   : > { %2047 = vrot.lane.b32.xlu1 %v1582_v26, %s3951_s26  ;;  %3689 = vmatprep.subr.mxu0 %v3918_v5 }
 0x773   : > { %2442 = vrot.lane.b32.xlu0 %v4576_v36, %s3942_s13  ;;  %3682 = vmatmul.mubr.msk.f32.vlgmr.msra.gmra.mrb[14].mxu0 %vm639_vm10, %v4552_v16 }
 0x774   : > { %3691 = vmatprep.mubr.msk.f32.mxu0 %vm3919_vm0, %v3918_v5 }
 0x776   : > { %2353 = vrot.lane.b32.xlu1 %v4440_v47, %s3952_s28  ;;  %v2513_v47 = vunpack.c.0.s8 %v2512_v0 }
 0x777   : > { %2276 = vrot.lane.b32.xlu0 %v1582_v26, %s3953_s29 }
 0x778   : > { %v4619_v56 = vsub.s32 %v2513_v47, %v4104_v31 }
 0x7d8   : > { %v2428_v27 = vpop.permute.xlu1 %2427 }
 0x7d9   : > { %v2425_v45 = vpop.permute.xlu0 %2424  ;;  %v2445_v1 = vcombine.low %v4576_v36, %v2428_v27  ;;  %v2446_v51 = vcombine.high %v4576_v36, %v2428_v27 }
 0x7db   : > { %v2453_v21 = vrot.slane %v2445_v1, %v4610_v8  ;;  %v2460_v28 = vrot.slane %v2446_v51, %v4610_v8 }
 0x7dc   : > { %v2434_v50 = vpop.permute.xlu1 %2433 }
 0x7dd   : > { %v2431_v3 = vpop.permute.xlu0 %2430 }
 0x7de   : > { %v2461_v10 = vcombine.low %v2425_v45, %v2431_v3  ;;  %v2462_v9 = vcombine.high %v2425_v45, %v2431_v3 }
 0x7e0   : > { %v2440_v11 = vpop.permute.xlu1 %2439  ;;  %v2469_v15 = vrot.slane %v2461_v10, %v4610_v8  ;;  %v2476_v31 = vrot.slane %v2462_v9, %v4610_v8 }
 0x7e1   : > { %v2437_v52 = vpop.permute.xlu0 %2436  ;;  %v2477_v25 = vcombine.low %v2434_v50, %v2440_v11  ;;  %v2478_v23 = vcombine.high %v2434_v50, %v2440_v11 }
 0x7e2   : > { %v2509_v46 = vcombine.low %v2453_v21, %v2469_v15  ;;  %v2510_v7 = vcombine.high %v2453_v21, %v2469_v15  ;;  %v2525_v6 = vcombine.low %v2460_v28, %v2476_v31  ;;  %v2526_v33 = vcombine.high %v2460_v28, %v2476_v31 }
 0x7e3   : > { %v2485_v19 = vrot.slane %v2477_v25, %v4610_v8  ;;  %v2492_v16 = vrot.slane %v2478_v23, %v4610_v8 }
 0x7e4   : > { %v2048_v44 = vpop.permute.xlu1 %2047  ;;  %v2517_v4 = vrot.slane %v2509_v46, %v4619_v56  ;;  %v2524_v22 = vrot.slane %v2510_v7, %v4619_v56  ;;  %v2533_v60 = vrot.slane %v2525_v6, %v4619_v56  ;;  %v2540_v20 = vrot.slane %v2526_v33, %v4619_v56 }
 0x7e5   : > { %v2443_v54 = vpop.permute.xlu0 %2442  ;;  %3690 = vmatpush3.msra.mxu0 %v2048_v44 }
 0x7e6   : > { %v2493_v48 = vcombine.low %v2437_v52, %v2443_v54  ;;  %v2494_v35 = vcombine.high %v2437_v52, %v2443_v54  ;;  %3692 = vmatmul.mubr.msk.f32.vlgmr.msra.gmra.mrb[16].mxu0 %vm639_vm10, %v4556_v41  ;;  %3699 = vmatprep.subr.mxu0 %v3918_v5  ;;  %v3887_v41 = vld [vmem:[%s4031_s9 + $0x8] sm:$0xff]  ;;  %s3956_s9 = smov 84  }
 0x7e7   : > { %3701 = vmatprep.mubr.msk.f32.mxu0 %vm3919_vm0, %v3918_v5 }
 0x7e8   : > { %v2501_v62 = vrot.slane %v2493_v48, %v4610_v8  ;;  %v2508_v13 = vrot.slane %v2494_v35, %v4610_v8  ;;  %v2354_v10 = vpop.permute.xlu1 %2353 }
 0x7e9   : > { %v2277_v12 = vpop.permute.xlu0 %2276 }
 0x7ea   : > { %v2541_v14 = vcombine.low %v2485_v19, %v2501_v62  ;;  %v2542_v24 = vcombine.high %v2485_v19, %v2501_v62  ;;  %3700 = vmatpush3.msra.mxu0 %v2277_v12  ;;  %v2557_v26 = vcombine.low %v2492_v16, %v2508_v13  ;;  %v2558_v49 = vcombine.high %v2492_v16, %v2508_v13 }
 0x7eb   : > { %3702 = vmatmul.mubr.msk.f32.vlgmr.msra.gmra.mrb[18].mxu0 %vm639_vm10, %v4559_v17  ;;  %3709 = vmatprep.subr.mxu0 %v3918_v5 }
 0x7ec   : > { %v2549_v18 = vrot.slane %v2541_v14, %v4619_v56  ;;  %3710 = vmatpush3.msra.mxu0 %v3887_v41  ;;  %3711 = vmatprep.mubr.msk.f32.mxu0 %vm3919_vm0, %v3918_v5  ;;  %v2556_v17 = vrot.slane %v2542_v24, %v4619_v56  ;;  %v2565_v59 = vrot.slane %v2557_v26, %v4619_v56 }
 0x7ed   : > { %3719 = vmatprep.subr.mxu0 %v3918_v5  ;;  %v2572_v36 = vrot.slane %v2558_v49, %v4619_v56 }
 0x7ee   : > { %v2573_v29 = vcombine.low %v2517_v4, %v2549_v18  ;;  %v2574_v58 = vcombine.high %v2517_v4, %v2549_v18  ;;  %v2575_v63 = vcombine.low %v2524_v22, %v2556_v17  ;;  %v2576_v34 = vcombine.high %v2524_v22, %v2556_v17 }
 0x7ef   : > { %v2577_v2 = vcombine.low %v2533_v60, %v2565_v59  ;;  %v2578_v37 = vcombine.high %v2533_v60, %v2565_v59  ;;  %v2579_v27 = vcombine.low %v2540_v20, %v2572_v36  ;;  %v2580_v45 = vcombine.high %v2540_v20, %v2572_v36 }
 0x7f0   : > { %3707 = vmatmul.mubr.msk.f32.vlgmr.msra.gmra.mrb[20].mxu1 %vm639_vm10, %v2573_v29  ;;  %3712 = vmatmul.mubr.msk.f32.vlgmr.msra.gmra.mrb[20].mxu0 %vm639_vm10, %v2574_v58 }
 0x7f1   : > { %3715 = vmatpush3.msra.mxu1 %v3888_v32  ;;  %3720 = vmatpush3.msra.mxu0 %v3889_v53 }
 0x7f2   : > { %3716 = vmatprep.mubr.msk.f32.mxu1 %vm3919_vm0, %v3918_v5  ;;  %3721 = vmatprep.mubr.msk.f32.mxu0 %vm3919_vm0, %v3918_v5 }
 0x7f3   : > { %3724 = vmatprep.subr.mxu1 %v3918_v5  ;;  %3729 = vmatprep.subr.mxu0 %v3918_v5 }
 0x7f4   : > { %3717 = vmatmul.mubr.msk.f32.vlgmr.msra.gmra.mrb[22].mxu1 %vm639_vm10, %v2575_v63  ;;  %3722 = vmatmul.mubr.msk.f32.vlgmr.msra.gmra.mrb[22].mxu0 %vm639_vm10, %v2576_v34 }
 0x7f5   : > { %3725 = vmatpush3.msra.mxu1 %v3890_v42  ;;  %3730 = vmatpush3.msra.mxu0 %v3891_v61 }
 0x7f6   : > { %3726 = vmatprep.mubr.msk.f32.mxu1 %vm3919_vm0, %v3918_v5  ;;  %3731 = vmatprep.mubr.msk.f32.mxu0 %vm3919_vm0, %v3918_v5 }
 0x7f7   : > { %3734 = vmatprep.subr.mxu1 %v3918_v5  ;;  %3739 = vmatprep.subr.mxu0 %v3918_v5 }
 0x7f8   : > { %3727 = vmatmul.mubr.msk.f32.vlgmr.msra.gmra.mrb[24].mxu1 %vm639_vm10, %v2577_v2  ;;  %3732 = vmatmul.mubr.msk.f32.vlgmr.msra.gmra.mrb[24].mxu0 %vm639_vm10, %v2578_v37 }
 0x7f9   : > { %3735 = vmatpush3.msra.mxu1 %v3892_v38  ;;  %3740 = vmatpush3.msra.mxu0 %v3893_v40 }
 0x7fa   : > { %3736 = vmatprep.mubr.msk.f32.mxu1 %vm3919_vm0, %v3918_v5  ;;  %3741 = vmatprep.mubr.msk.f32.mxu0 %vm3919_vm0, %v3918_v5  ;;  %vm2380_vm0 = vcmask 228352  }
 0x7fb   : > { %v2381_v1 = vsel %vm2380_vm0, %v4171_v39, %v2354_v10 }
 0x7fc   : > { %3737 = vmatmul.mubr.msk.f32.vlgmr.msra.gmra.mrb[26].mxu1 %vm639_vm10, %v2579_v27  ;;  %3742 = vmatmul.mubr.msk.f32.vlgmr.msra.gmra.mrb[26].mxu0 %vm639_vm10, %v2580_v45 }
 0x839   : > { %v1180_v57 = vpop.f32.mrb[8].mxu0 }
 0x83a   : > { %v3653_v30 = vpop.f32.mrb[9].mxu0  ;;  %2357 = vrot.lane.b32.xlu0 %v1180_v57, %s3943_s14 }
 0x83d   : > { %v1409_v50 = vpop.f32.mrb[10].mxu0 }
 0x83e   : > { %2361 = vrot.lane.b32.xlu1 %v1409_v50, %s3956_s9  ;;  %v3663_v3 = vpop.f32.mrb[11].mxu0 }
 0x842   : > { %v1661_v55 = vpop.f32.mrb[12].mxu0 }
 0x843   : > { %2365 = vrot.lane.b32.xlu0 %v1661_v55, %s3946_s17  ;;  %v3673_v43 = vpop.f32.mrb[13].mxu0 }
 0x846   : > { %v1890_v0 = vpop.f32.mrb[14].mxu0 }
 0x847   : > { %2369 = vrot.lane.b32.xlu1 %v1890_v0, %s3927_s27  ;;  %v3683_v5 = vpop.f32.mrb[15].mxu0  ;;  %s3958_s27 = smov 64  }
 0x8ac   : > { %v2358_v11 = vpop.permute.xlu0 %2357 }
 0x8ad   : > { %v2383_v47 = vsel %vm2382_vm2, %v2381_v1, %v2358_v11 }
 0x8b0   : > { %v2362_v52 = vpop.permute.xlu1 %2361 }
 0x8b1   : > { %v2385_v15 = vsel %vm2384_vm3, %v2383_v47, %v2362_v52 }
 0x8b5   : > { %v4686_v25 = vpop.permute.xlu0 %2365 }
 0x8b6   : > { %v2387_v44 = vsel %vm2386_vm4, %v2385_v15, %v4686_v25 }
 0x8b7   : > { %3344 = vst [vmem:[%s4684_s8] sm:$0xff] %v2387_v44 }
 0x8b9   : > { %v2119_v54 = vpop.f32.mrb[16].mxu0 }
 0x8ba   : > { %2373 = vrot.lane.b32.xlu0 %v2119_v54, %s3940_s11  ;;  %v3693_v21 = vpop.f32.mrb[17].mxu0 }
 0x8be   : > { %v2348_v39 = vpop.f32.mrb[18].mxu0 }
 0x8bf   : > { %2377 = vrot.lane.b32.xlu1 %v2348_v39, %s3957_s18  ;;  %v3703_v48 = vpop.f32.mrb[19].mxu0 }
 0x8c3   : > { %v2650_v35 = vpop.f32.mrb[20].mxu1  ;;  %v2723_v9 = vpop.f32.mrb[20].mxu0 }
 0x8c4   : > { %v3708_v46 = vpop.f32.mrb[21].mxu1  ;;  %v3713_v23 = vpop.f32.mrb[21].mxu0 }
 0x8c7   : > { %v2796_v19 = vpop.f32.mrb[22].mxu1  ;;  %v2869_v62 = vpop.f32.mrb[22].mxu0 }
 0x8c8   : > { %v3165_v51 = vcombine.low %v2650_v35, %v2796_v19  ;;  %v3166_v12 = vcombine.high %v2650_v35, %v2796_v19  ;;  %v3181_v13 = vcombine.low %v2723_v9, %v2869_v62  ;;  %v3182_v14 = vcombine.high %v2723_v9, %v2869_v62  ;;  %v3718_v24 = vpop.f32.mrb[23].mxu1  ;;  %v3723_v31 = vpop.f32.mrb[23].mxu0 }
 0x8ca   : > { %v3173_v7 = vrot.slane %v3165_v51, %v4610_v8  ;;  %v3180_v4 = vrot.slane %v3166_v12, %v4610_v8  ;;  %v3189_v16 = vrot.slane %v3181_v13, %v4610_v8  ;;  %v3196_v18 = vrot.slane %v3182_v14, %v4610_v8 }
 0x8cb   : > { %v2942_v41 = vpop.f32.mrb[24].mxu1  ;;  %v3015_v28 = vpop.f32.mrb[24].mxu0 }
 0x8cc   : > { %v3229_v17 = vcombine.low %v3173_v7, %v3189_v16  ;;  %v3230_v26 = vcombine.high %v3173_v7, %v3189_v16  ;;  %v3245_v29 = vcombine.low %v3180_v4, %v3196_v18  ;;  %v3246_v58 = vcombine.high %v3180_v4, %v3196_v18  ;;  %v3728_v22 = vpop.f32.mrb[25].mxu1  ;;  %v3733_v6 = vpop.f32.mrb[25].mxu0 }
 0x8ce   : > { %v3237_v27 = vrot.slane %v3229_v17, %v4619_v56  ;;  %v3244_v45 = vrot.slane %v3230_v26, %v4619_v56  ;;  %v3253_v57 = vrot.slane %v3245_v29, %v4619_v56 }
 0x8cf   : > { %v3088_v49 = vpop.f32.mrb[26].mxu1  ;;  %v3161_v32 = vpop.f32.mrb[26].mxu0 }
 0x8d0   : > { %v3197_v53 = vcombine.low %v2942_v41, %v3088_v49  ;;  %v3198_v59 = vcombine.high %v2942_v41, %v3088_v49  ;;  %v3213_v63 = vcombine.low %v3015_v28, %v3161_v32  ;;  %v3214_v34 = vcombine.high %v3015_v28, %v3161_v32  ;;  %v3738_v33 = vpop.f32.mrb[27].mxu1  ;;  %v3743_v60 = vpop.f32.mrb[27].mxu0 }
 0x8d2   : > { %v3205_v42 = vrot.slane %v3197_v53, %v4610_v8  ;;  %v3212_v61 = vrot.slane %v3198_v59, %v4610_v8  ;;  %v3221_v36 = vrot.slane %v3213_v63, %v4610_v8  ;;  %v3228_v2 = vrot.slane %v3214_v34, %v4610_v8 }
 0x8d3   : > { %v3260_v8 = vrot.slane %v3246_v58, %v4619_v56 }
 0x8d4   : > { %v3261_v37 = vcombine.low %v3205_v42, %v3221_v36  ;;  %v3262_v20 = vcombine.high %v3205_v42, %v3221_v36  ;;  %v3277_v38 = vcombine.low %v3212_v61, %v3228_v2  ;;  %v3278_v40 = vcombine.high %v3212_v61, %v3228_v2 }
 0x8d6   : > { %v3269_v30 = vrot.slane %v3261_v37, %v4619_v56  ;;  %v3276_v50 = vrot.slane %v3262_v20, %v4619_v56  ;;  %v3285_v3 = vrot.slane %v3277_v38, %v4619_v56  ;;  %v3292_v55 = vrot.slane %v3278_v40, %v4619_v56  ;;  %v2370_v56 = vpop.permute.xlu1 %2369 }
 0x8d7   : > { %v2388_v44 = vsel %vm1423_vm11, %v4686_v25, %v2370_v56 }
 0x8d8   : > { %v3295_v43 = vcombine.low %v3244_v45, %v3276_v50  ;;  %v3294_v0 = vcombine.high %v3237_v27, %v3269_v30  ;;  %v3298_v5 = vcombine.high %v3253_v57, %v3285_v3  ;;  %v3296_v10 = vcombine.high %v3244_v45, %v3276_v50 }
 0x8d9   : > { %v3300_v11 = vcombine.high %v3260_v8, %v3292_v55  ;;  %v3299_v52 = vcombine.low %v3260_v8, %v3292_v55  ;;  %v3293_v1 = vcombine.low %v3237_v27, %v3269_v30  ;;  %v3297_v47 = vcombine.low %v3253_v57, %v3285_v3 }
 0x8da   : > { %3306 = vrot.lane.b32.xlu1 %v3295_v43, %s3958_s27  ;;  %3302 = vrot.lane.b32.xlu0 %v3294_v0, %s3939_s10 }
 0x8de   : > { %3314 = vrot.lane.b32.xlu1 %v3298_v5, %s3939_s10  ;;  %3310 = vrot.lane.b32.xlu0 %v3296_v10, %s3948_s23 }
 0x8e2   : > { %3322 = vrot.lane.b32.xlu1 %v3300_v11, %s3948_s23  ;;  %3318 = vrot.lane.b32.xlu0 %v3299_v52, %s3958_s27 }
 0x92c   : > { %v2374_v15 = vpop.permute.xlu0 %2373 }
 0x92d   : > { %v2390_v54 = vsel %vm2389_vm14, %v2388_v44, %v2374_v15 }
 0x931   : > { %v2378_v21 = vpop.permute.xlu1 %2377 }
 0x932   : > { %v2392_v39 = vsel %vm2391_vm5, %v2390_v54, %v2378_v21 }
 0x94c   : > { %v3307_v48 = vpop.permute.xlu1 %3306  ;;  %v3303_v35 = vpop.permute.xlu0 %3302 }
 0x94d   : > { %v3325_v9 = vsel %vm349_vm1, %v3293_v1, %v3303_v35 }
 0x94e   : > { %v3327_v19 = vsel %vm3326_vm6, %v3325_v9, %v3307_v48 }
 0x950   : > { %v3315_v46 = vpop.permute.xlu1 %3314  ;;  %v3311_v23 = vpop.permute.xlu0 %3310 }
 0x951   : > { %v3329_v62 = vsel %vm3328_vm7, %v3327_v19, %v3311_v23  ;;  %v3330_v25 = vsel %vm349_vm1, %v3297_v47, %v3315_v46 }
 0x952   : > { %3335 = vrot.lane.b32.xlu0 %v3329_v62, %s3948_s23 }
 0x954   : > { %v3323_v51 = vpop.permute.xlu1 %3322  ;;  %v3319_v12 = vpop.permute.xlu0 %3318 }
 0x955   : > { %v3331_v13 = vsel %vm3326_vm6, %v3330_v25, %v3319_v12 }
 0x956   : > { %v3332_v14 = vsel %vm3328_vm7, %v3331_v13, %v3323_v51 }
 0x957   : > { %3337 = vrot.lane.b32.xlu1 %v3332_v14, %s3948_s23 }
 0x9c4   : > { %v3336_v24 = vpop.permute.xlu0 %3335 }
 0x9c5   : > { %v3343_v31 = vsel %vm3328_vm7, %v2392_v39, %v3336_v24 }
 0x9c6   : > { %3345 = vst [vmem:[%s4684_s8 + $0x8] sm:$0xff] %v3343_v31 }
 0x9c9   : > { %v3338_v7 = vpop.permute.xlu1 %3337 }
 0x9ca   : > { %v3339_v4 = vsel %vm3328_vm7, %v3336_v24, %v3338_v7  ;;  %3347 = vst.msk [vmem:[%s4684_s8 + $0x18] sm:$0xff] %vm3328_vm7, %v3338_v7 }
 0x9cb   : > { %3346 = vst [vmem:[%s4684_s8 + $0x10] sm:$0xff] %v3339_v4 }
 0x9cc PF: > { %s15_s20 = sadd.s32 1, %s3916_s20   ;;  %s4741_s18 = smov %s3912_s19 }
 0x9cd   : > { %p12_p5 = scmp.ge.s32.totalorder %s15_s20, 4   ;;  %s4742_s19 = smov %s4744_s21 }
 0x9cf   :  { %14 = sbr.rel (!%p12_p5) target bundleno = 2 (0x2), region = 79 }

// kernel: ipa_transformer_forward.11
= control target key start
LH: loop header
LB: loop body
LE: loop exit
PB: predicated region body
PF: predicated region fallthrough
CT: control target
= control target key end

     0   :  { %vm55_vm0 = vcmask 261120   ;;  %vm521_vm1 = vcmask 48128   ;;  %s850_s0 = inlined_call_operand.vmem [shape: f32[16,32], index: 0, kind: input, shape index: {}]   ;;  %s851_s1 = inlined_call_operand.vmem [shape: f32[16,32], index: 1, kind: input, shape index: {}]   ;;  %s852_s4 = inlined_call_operand.vmem [shape: f32[32,32], index: 4, kind: input, shape index: {}]   ;;  %s853_s6 = inlined_call_operand.vmem [shape: f32[32,32], index: 6, kind: input, shape index: {}]   ;;  %s854_s2 = inlined_call_operand.vmem [shape: f32[1,32], index: 2, kind: input, shape index: {}]   ;;  %s855_s3 = inlined_call_operand.vmem [shape: f32[1,32], index: 3, kind: input, shape index: {}]   ;;  %s856_s8 = inlined_call_operand.vmem [shape: f32[32,32], index: 8, kind: input, shape index: {}]   ;;  %s857_s5 = inlined_call_operand.vmem [shape: f32[1,32], index: 5, kind: input, shape index: {}]   ;;  %s858_s7 = inlined_call_operand.vmem [shape: f32[1,32], index: 7, kind: input, shape index: {}]   ;;  %s859_s9 = inlined_call_operand.vmem [shape: f32[1,32], index: 9, kind: input, shape index: {}]   ;;  %s860_s12 = inlined_call_operand.vmem [shape: f32[32,6], index: 12, kind: input, shape index: {}]   ;;  %s861_s10 = inlined_call_operand.vmem [shape: f32[1,32], index: 10, kind: input, shape index: {}]   ;;  %s862_s11 = inlined_call_operand.vmem [shape: f32[1,32], index: 11, kind: input, shape index: {}]   ;;  %s863_s14 = inlined_call_operand.vmem [shape: f32[16,32], index: 14, kind: output, shape index: {0}]   ;;  %s864_s13 = inlined_call_operand.vmem [shape: f32[1,6], index: 13, kind: input, shape index: {}]   ;;  %s865_s15 = inlined_call_operand.vmem [shape: f32[16,6], index: 15, kind: output, shape index: {1}]  }
   0x1   :  { %v49_v0 = vld [vmem:[%s850_s0] sm:$0xff]  ;;  %v50_v2 = vld [vmem:[%s850_s0 + $0x8] sm:$0xff]  ;;  %v103_v20 = vld [vmem:[%s852_s4 + $0x10] sm:$0xff] }
   0x2   :  { %v51_v1 = vld [vmem:[%s851_s1] sm:$0xff]  ;;  %v52_v4 = vld [vmem:[%s851_s1 + $0x8] sm:$0xff]  ;;  %v104_v22 = vld [vmem:[%s852_s4 + $0x18] sm:$0xff] }
   0x3   :  { %v53_v3 = vadd.f32 %v51_v1, %v49_v0  ;;  %v54_v5 = vadd.f32 %v52_v4, %v50_v2  ;;  %v101_v18 = vld [vmem:[%s852_s4] sm:$0xff]  ;;  %v102_v19 = vld [vmem:[%s852_s4 + $0x8] sm:$0xff]  ;;  %v620_v23 = vpack.c.bf16 %v104_v22, %v103_v20  ;;  %v197_v43 = vld [vmem:[%s853_s6 + $0x10] sm:$0xff] }
   0x4   :  { %v616_v21 = vpack.c.bf16 %v102_v19, %v101_v18  ;;  %v195_v24 = vld [vmem:[%s853_s6] sm:$0xff]  ;;  %v196_v25 = vld [vmem:[%s853_s6 + $0x8] sm:$0xff]  ;;  %v198_v44 = vld [vmem:[%s853_s6 + $0x18] sm:$0xff] }
   0x5   :  { %v56_v6 = vsel %vm55_vm0, %v53_v3, 0.0  ;;  %v59_v7 = vsel %vm55_vm0, %v54_v5, 0.0  ;;  %v624_v26 = vpack.c.bf16 %v196_v25, %v195_v24  ;;  %v532_v34 = vld [vmem:[%s854_s2] ss:$0 sm:$0xff]  ;;  %v628_v45 = vpack.c.bf16 %v198_v44, %v197_v43  ;;  %v290_v47 = vld [vmem:[%s856_s8 + $0x8] sm:$0xff]  ;;  %v291_v56 = vld [vmem:[%s856_s8 + $0x10] sm:$0xff] }
   0x6   :  { %57 = vadd.xlane.f32.xlu0 %v56_v6  ;;  %617 = vmatprep.subr.bf16.mxu0 %v616_v21  ;;  %v533_v36 = vld [vmem:[%s855_s3] ss:$0 sm:$0xff]  ;;  %v292_v57 = vld [vmem:[%s856_s8 + $0x18] sm:$0xff]  ;;  %v430_v22 = vld [vmem:[%s860_s12 + $0x8] sm:$0xff] }
   0x7   :  { %619 = vmatpush3.bf16.msra.mxu0 %v616_v21  ;;  %625 = vmatprep.subr.bf16.mxu1 %v624_v26  ;;  %v289_v46 = vld [vmem:[%s856_s8] sm:$0xff]  ;;  %v636_v58 = vpack.c.bf16 %v292_v57, %v291_v56  ;;  %v431_v24 = vld [vmem:[%s860_s12 + $0x10] sm:$0xff]  ;;  %v432_v25 = vld [vmem:[%s860_s12 + $0x18] sm:$0xff] }
   0x8   :  { %621 = vmatprep.subr.bf16.mxu0 %v620_v23  ;;  %627 = vmatpush3.bf16.msra.mxu1 %v624_v26  ;;  %v632_v48 = vpack.c.bf16 %v290_v47, %v289_v46  ;;  %v534_v49 = vld [vmem:[%s857_s5] ss:$0 sm:$0xff]  ;;  %v644_v26 = vpack.c.bf16 %v432_v25, %v431_v24 }
   0x9   :  { %629 = vmatprep.subr.bf16.mxu1 %v628_v45  ;;  %v537_v59 = vld [vmem:[%s858_s7] ss:$0 sm:$0xff] }
   0xa   :  { %60 = vadd.xlane.f32.xlu0 %v59_v7  ;;  %v540_v2 = vld [vmem:[%s859_s9] ss:$0 sm:$0xff] }
   0xb   :  { %623 = vmatpush3.bf16.msra.mxu0 %v620_v23  ;;  %v429_v21 = vld [vmem:[%s860_s12] sm:$0xff] }
   0xc   :  { %631 = vmatpush3.bf16.msra.mxu1 %v628_v45  ;;  %633 = vmatprep.subr.bf16.mxu0 %v632_v48  ;;  %v640_v23 = vpack.c.bf16 %v430_v22, %v429_v21  ;;  %v545_v43 = vld [vmem:[%s864_s13] ss:$0 sm:$0xff] }
   0xe   :  { %641 = vmatprep.subr.bf16.mxu1 %v640_v23 }
  0x93   :  { %v58_v8 = vpop.xlane.xlu0 %57 }
  0x94   :  { %v63_v9 = vmul.f32 0.03125, %v58_v8 }
  0x96   :  { %v65_v10 = vsub.f32 %v53_v3, %v63_v9 }
  0x97   :  { %v61_v11 = vpop.xlane.xlu0 %60 }
  0x98   :  { %v64_v12 = vmul.f32 0.03125, %v61_v11  ;;  %v67_v13 = vmul.f32 %v65_v10, %v65_v10 }
  0x9a   :  { %v66_v14 = vsub.f32 %v54_v5, %v64_v12  ;;  %v69_v15 = vsel %vm55_vm0, %v67_v13, 0.0 }
  0x9b   :  { %70 = vadd.xlane.f32.xlu1 %v69_v15 }
  0x9c   :  { %v68_v16 = vmul.f32 %v66_v14, %v66_v14 }
  0x9e   :  { %v72_v17 = vsel %vm55_vm0, %v68_v16, 0.0 }
  0x9f   :  { %73 = vadd.xlane.f32.xlu1 %v72_v17 }
 0x128   :  { %v71_v27 = vpop.xlane.xlu1 %70 }
 0x129   :  { %v75_v28 = vmul.f32 0.03125, %v71_v27 }
 0x12b   :  { %v77_v29 = vadd.f32 1e-05, %v75_v28 }
 0x12c   :  { %v74_v30 = vpop.xlane.xlu1 %73 }
 0x12d   :  { %648 = vrsqrt.f32 %v77_v29  ;;  %v76_v31 = vmul.f32 0.03125, %v74_v30 }
 0x12f   :  { %v78_v32 = vadd.f32 1e-05, %v76_v31 }
 0x131   :  { %650 = vrsqrt.f32 %v78_v32 }
 0x137   :  { %v649_v33 = vpop.eup %648 }
 0x138   :  { %v81_v35 = vmul.f32 %v649_v33, %v65_v10 }
 0x13a   :  { %v90_v37 = vmul.f32 %v532_v34, %v81_v35 }
 0x13b   :  { %v651_v38 = vpop.eup %650 }
 0x13c   :  { %v82_v39 = vmul.f32 %v651_v38, %v66_v14  ;;  %v99_v40 = vadd.f32 %v533_v36, %v90_v37  ;;  %v544_v38 = vld [vmem:[%s862_s11] ss:$0 sm:$0xff] }
 0x13e   :  { %v91_v41 = vmul.f32 %v532_v34, %v82_v39  ;;  %580 = vmatprep.mubr.msk.f32.mxu0 %vm55_vm0, %v99_v40  ;;  %v543_v34 = vld [vmem:[%s861_s10] ss:$0 sm:$0xff] }
 0x140   :  { %v100_v42 = vadd.f32 %v533_v36, %v91_v41 }
 0x142   :  { %581 = vmatmul.mubr.msk.f32.vlgmr.msra.gmra.mrb[0].mxu0 %vm55_vm0, %v100_v42 }
 0x143   :  { %635 = vmatpush3.bf16.msra.mxu0 %v632_v48 }
 0x144   :  { %637 = vmatprep.subr.bf16.mxu0 %v636_v58 }
 0x147   :  { %639 = vmatpush3.bf16.msra.mxu0 %v636_v58 }
 0x215   :  { %v582_v50 = vpop.f32.mrb[0].mxu0 }
 0x216   :  { %v190_v51 = vadd.f32 %v582_v50, %v534_v49  ;;  %v184_v52 = vpop.f32.mrb[1].mxu0 }
 0x217   :  { %v185_v53 = vadd.f32 %v534_v49, %v184_v52 }
 0x218   :  { %v194_v55 = vmax.f32 %v190_v51, 0.0 }
 0x219   :  { %v193_v54 = vmax.f32 %v185_v53, 0.0 }
 0x21b   :  { %591 = vmatprep.mubr.msk.f32.mxu1 %vm55_vm0, %v193_v54 }
 0x21c   :  { %592 = vmatmul.mubr.msk.f32.vlgmr.msra.gmra.mrb[0].mxu1 %vm55_vm0, %v194_v55 }
 0x21d   :  { %643 = vmatpush3.bf16.msra.mxu1 %v640_v23 }
 0x21e   :  { %645 = vmatprep.subr.bf16.mxu1 %v644_v26 }
 0x221   :  { %647 = vmatpush3.bf16.msra.mxu1 %v644_v26 }
 0x2ef   :  { %v593_v60 = vpop.f32.mrb[0].mxu1 }
 0x2f0   :  { %v284_v61 = vadd.f32 %v593_v60, %v537_v59  ;;  %v278_v62 = vpop.f32.mrb[1].mxu1 }
 0x2f1   :  { %v279_v63 = vadd.f32 %v537_v59, %v278_v62 }
 0x2f2   :  { %v288_v1 = vmax.f32 %v284_v61, 0.0 }
 0x2f3   :  { %v287_v0 = vmax.f32 %v279_v63, 0.0 }
 0x2f5   :  { %602 = vmatprep.mubr.msk.f32.mxu0 %vm55_vm0, %v287_v0 }
 0x2f6   :  { %603 = vmatmul.mubr.msk.f32.vlgmr.msra.gmra.mrb[2].mxu0 %vm55_vm0, %v288_v1 }
 0x3c9   :  { %v604_v3 = vpop.f32.mrb[2].mxu0 }
 0x3ca   :  { %v378_v4 = vadd.f32 %v604_v3, %v540_v2  ;;  %v372_v5 = vpop.f32.mrb[3].mxu0 }
 0x3cb   :  { %v373_v6 = vadd.f32 %v540_v2, %v372_v5 }
 0x3cc   :  { %v382_v7 = vadd.f32 %v378_v4, %v100_v42 }
 0x3cd   :  { %v381_v8 = vadd.f32 %v373_v6, %v99_v40 }
 0x3ce   :  { %v386_v9 = vsel %vm55_vm0, %v382_v7, 0.0 }
 0x3cf   :  { %387 = vadd.xlane.f32.xlu1 %v386_v9  ;;  %v383_v10 = vsel %vm55_vm0, %v381_v8, 0.0 }
 0x3d0   :  { %384 = vadd.xlane.f32.xlu0 %v383_v10 }
 0x45c   :  { %v388_v11 = vpop.xlane.xlu1 %387 }
 0x45d   :  { %v390_v12 = vmul.f32 0.03125, %v388_v11  ;;  %v385_v13 = vpop.xlane.xlu0 %384 }
 0x45e   :  { %v389_v14 = vmul.f32 0.03125, %v385_v13 }
 0x45f   :  { %v392_v15 = vsub.f32 %v382_v7, %v390_v12 }
 0x460   :  { %v391_v16 = vsub.f32 %v381_v8, %v389_v14 }
 0x461   :  { %v394_v17 = vmul.f32 %v392_v15, %v392_v15 }
 0x462   :  { %v393_v18 = vmul.f32 %v391_v16, %v391_v16 }
 0x463   :  { %v398_v19 = vsel %vm55_vm0, %v394_v17, 0.0 }
 0x464   :  { %399 = vadd.xlane.f32.xlu1 %v398_v19  ;;  %v395_v20 = vsel %vm55_vm0, %v393_v18, 0.0 }
 0x465   :  { %396 = vadd.xlane.f32.xlu0 %v395_v20 }
 0x4f1   :  { %v400_v27 = vpop.xlane.xlu1 %399 }
 0x4f2   :  { %v402_v28 = vmul.f32 0.03125, %v400_v27  ;;  %v397_v29 = vpop.xlane.xlu0 %396 }
 0x4f3   :  { %v401_v30 = vmul.f32 0.03125, %v397_v29 }
 0x4f4   :  { %v404_v31 = vadd.f32 1e-05, %v402_v28 }
 0x4f5   :  { %v403_v32 = vadd.f32 1e-05, %v401_v30 }
 0x4f6   :  { %652 = vrsqrt.f32 %v404_v31 }
 0x4f7   :  { %654 = vrsqrt.f32 %v403_v32 }
 0x500   :  { %v653_v33 = vpop.eup %652 }
 0x501   :  { %v655_v35 = vpop.eup %654  ;;  %v408_v36 = vmul.f32 %v653_v33, %v392_v15 }
 0x502   :  { %v407_v37 = vmul.f32 %v655_v35, %v391_v16 }
 0x503   :  { %v417_v39 = vmul.f32 %v543_v34, %v408_v36 }
 0x504   :  { %v416_v40 = vmul.f32 %v543_v34, %v407_v37 }
 0x505   :  { %v426_v41 = vadd.f32 %v544_v38, %v417_v39 }
 0x506   :  { %v425_v42 = vadd.f32 %v544_v38, %v416_v40 }
 0x507   :  { %428 = vst.msk [vmem:[%s863_s14 + $0x8] sm:$0xff] %vm55_vm0, %v426_v41 }
 0x508   :  { %427 = vst.msk [vmem:[%s863_s14] sm:$0xff] %vm55_vm0, %v425_v42  ;;  %613 = vmatprep.mubr.msk.f32.mxu1 %vm55_vm0, %v425_v42 }
 0x509   :  { %614 = vmatmul.mubr.msk.f32.vlgmr.msra.gmra.mrb[2].mxu1 %vm55_vm0, %v426_v41 }
 0x5dc   :  { %v615_v44 = vpop.f32.mrb[2].mxu1 }
 0x5dd   :  { %v518_v45 = vadd.f32 %v615_v44, %v545_v43  ;;  %v512_v46 = vpop.f32.mrb[3].mxu1 }
 0x5de   :  { %v513_v47 = vadd.f32 %v545_v43, %v512_v46 }
 0x5df   :  { %523 = vst.msk [vmem:[%s865_s15 + $0x8] sm:$0xff] %vm521_vm1, %v518_v45 }
 0x5e0   :  { %522 = vst.msk [vmem:[%s865_s15] sm:$0xff] %vm521_vm1, %v513_v47 }

// kernel: ipa_transformer_forward.12
= control target key start
LH: loop header
LB: loop body
LE: loop exit
PB: predicated region body
PF: predicated region fallthrough
CT: control target
= control target key end

     0   :  { %v326_v3 = vmov 0.0   ;;  %vm37_vm0 = vcmask 261120   ;;  %s464_s1 = inlined_call_operand.vmem [shape: f32[32,672], index: 1, kind: input, shape index: {}]   ;;  %s465_s0 = inlined_call_operand.vmem [shape: f32[16,32], index: 0, kind: input, shape index: {}]   ;;  %s466_s2 = inlined_call_operand.vmem [shape: f32[16,672], index: 2, kind: output, shape index: {}]  }
   0x1   :  { %v14_v0 = vld [vmem:[%s464_s1 + $0x8] sm:$0xff]  ;;  %v20_v1 = vld [vmem:[%s464_s1 + $0x38] sm:$0xff]  ;;  %108 = vmatprep.mubr.f32.mxu0 %v326_v3  ;;  %185 = vmatprep.mubr.f32.mxu1 %v326_v3  ;;  %v13_v6 = vld [vmem:[%s464_s1] sm:$0xff] }
   0x2   :  { %v16_v2 = vld [vmem:[%s464_s1 + $0x18] sm:$0xff]  ;;  %v297_v4 = vpack.c.bf16 %v20_v1, %v14_v0  ;;  %v22_v5 = vld [vmem:[%s464_s1 + $0x48] sm:$0xff]  ;;  %v19_v7 = vld [vmem:[%s464_s1 + $0x30] sm:$0xff] }
   0x3   :  { %v305_v8 = vpack.c.bf16 %v22_v5, %v16_v2  ;;  %v299_v9 = vpack.c.bf16 %v19_v7, %v13_v6  ;;  %v15_v10 = vld [vmem:[%s464_s1 + $0x10] sm:$0xff]  ;;  %v21_v11 = vld [vmem:[%s464_s1 + $0x40] sm:$0xff]  ;;  %v26_v12 = vld [vmem:[%s464_s1 + $0x68] sm:$0xff] }
   0x4   :  { %298 = vmatprep.subr.bf16.mxu0 %v297_v4  ;;  %v307_v13 = vpack.c.bf16 %v21_v11, %v15_v10  ;;  %v32_v14 = vld [vmem:[%s464_s1 + $0x98] sm:$0xff]  ;;  %v34_v16 = vld [vmem:[%s464_s1 + $0xa8] sm:$0xff]  ;;  %v25_v19 = vld [vmem:[%s464_s1 + $0x60] sm:$0xff] }
   0x5   :  { %v28_v15 = vld [vmem:[%s464_s1 + $0x78] sm:$0xff]  ;;  %306 = vmatprep.subr.bf16.mxu1 %v305_v8  ;;  %300 = vmatpush1.bf16.msra.mxu0 %v299_v9  ;;  %v301_v17 = vpack.c.bf16 %v32_v14, %v26_v12  ;;  %v31_v20 = vld [vmem:[%s464_s1 + $0x90] sm:$0xff]  ;;  %v33_v23 = vld [vmem:[%s464_s1 + $0xa0] sm:$0xff] }
   0x6   :  { %v309_v18 = vpack.c.bf16 %v34_v16, %v28_v15  ;;  %v27_v21 = vld [vmem:[%s464_s1 + $0x70] sm:$0xff]  ;;  %308 = vmatpush1.bf16.msra.mxu1 %v307_v13  ;;  %v303_v22 = vpack.c.bf16 %v31_v20, %v25_v19  ;;  %v18_v24 = vld [vmem:[%s464_s1 + $0x28] sm:$0xff]  ;;  %v24_v26 = vld [vmem:[%s464_s1 + $0x58] sm:$0xff] }
   0x7   :  { %302 = vmatprep.subr.bf16.mxu0 %v301_v17  ;;  %v311_v25 = vpack.c.bf16 %v33_v23, %v27_v21  ;;  %v17_v27 = vld [vmem:[%s464_s1 + $0x20] sm:$0xff]  ;;  %v23_v28 = vld [vmem:[%s464_s1 + $0x50] sm:$0xff]  ;;  %v313_v29 = vpack.c.bf16 %v24_v26, %v18_v24  ;;  %v30_v30 = vld [vmem:[%s464_s1 + $0x88] sm:$0xff] }
   0x8   :  { %310 = vmatprep.subr.bf16.mxu1 %v309_v18  ;;  %v36_v31 = vld [vmem:[%s464_s1 + $0xb8] sm:$0xff]  ;;  %v11_v32 = vld [vmem:[%s465_s0] sm:$0xff]  ;;  %v315_v33 = vpack.c.bf16 %v23_v28, %v17_v27  ;;  %v35_v35 = vld [vmem:[%s464_s1 + $0xb0] sm:$0xff] }
   0x9   :  { %304 = vmatpush1.bf16.msra.mxu0 %v303_v22  ;;  %v29_v34 = vld [vmem:[%s464_s1 + $0x80] sm:$0xff]  ;;  %v317_v36 = vpack.c.bf16 %v36_v31, %v30_v30  ;;  %v12_v37 = vld [vmem:[%s465_s0 + $0x8] sm:$0xff] }
   0xa   :  { %312 = vmatpush1.bf16.msra.mxu1 %v311_v25  ;;  %314 = vmatprep.subr.bf16.mxu0 %v313_v29  ;;  %v319_v38 = vpack.c.bf16 %v35_v35, %v29_v34 }
   0xb   :  { %321 = vmatprep.subr.bf16.mxu1 %v313_v29 }
   0xc   :  { %291 = vmatmul.mubr.msk.f32.vlgmr.msra.gmra.mrb[0].mxu0 %vm37_vm0, %v11_v32 }
   0xd   :  { %293 = vmatmul.mubr.msk.f32.vlgmr.msra.gmra.mrb[0].mxu1 %vm37_vm0, %v11_v32  ;;  %316 = vmatpush1.bf16.msra.mxu0 %v315_v33 }
   0xe   :  { %323 = vmatpush1.bf16.msra.mxu1 %v315_v33  ;;  %114 = vmatprep.mubr.f32.mxu0 %v326_v3 }
   0xf   :  { %191 = vmatprep.mubr.f32.mxu1 %v326_v3  ;;  %318 = vmatprep.subr.bf16.mxu0 %v317_v36 }
  0x10   :  { %292 = vmatmul.mubr.msk.f32.gmra.mrb[2].mxu0 %vm37_vm0, %v12_v37  ;;  %322 = vmatprep.subr.bf16.mxu1 %v317_v36 }
  0x11   :  { %294 = vmatmul.mubr.msk.f32.gmra.mrb[2].mxu1 %vm37_vm0, %v12_v37  ;;  %320 = vmatpush1.bf16.msra.mxu0 %v319_v38 }
  0x12   :  { %324 = vmatpush1.bf16.msra.mxu1 %v319_v38  ;;  %262 = vmatprep.mubr.f32.mxu0 %v326_v3 }
  0x13   :  { %268 = vmatprep.mubr.f32.mxu1 %v326_v3 }
  0x14   :  { %295 = vmatmul.mubr.msk.f32.vlgmr.msra.gmra.mrb[4].mxu0 %vm37_vm0, %v11_v32 }
  0x15   :  { %296 = vmatmul.mubr.msk.f32.vlgmr.msra.gmra.mrb[4].mxu1 %vm37_vm0, %v12_v37 }
  0xdf   :  { %v110_v39 = vpop.f32.mrb[0].mxu0 }
  0xe0   :  { %275 = vst [vmem:[%s466_s2] sm:$0xff] %v110_v39  ;;  %v187_v40 = vpop.f32.mrb[0].mxu1  ;;  %v112_v41 = vpop.f32.mrb[1].mxu0 }
  0xe1   :  { %277 = vst [vmem:[%s466_s2 + $0x10] sm:$0xff] %v187_v40  ;;  %276 = vst [vmem:[%s466_s2 + $0x8] sm:$0xff] %v112_v41  ;;  %v189_v42 = vpop.f32.mrb[1].mxu1 }
  0xe2   :  { %278 = vst [vmem:[%s466_s2 + $0x18] sm:$0xff] %v189_v42 }
  0xe3   :  { %v116_v43 = vpop.f32.mrb[2].mxu0 }
  0xe4   :  { %281 = vst [vmem:[%s466_s2 + $0x30] sm:$0xff] %v116_v43  ;;  %v193_v44 = vpop.f32.mrb[2].mxu1  ;;  %v118_v45 = vpop.f32.mrb[3].mxu0 }
  0xe5   :  { %283 = vst [vmem:[%s466_s2 + $0x40] sm:$0xff] %v193_v44  ;;  %282 = vst [vmem:[%s466_s2 + $0x38] sm:$0xff] %v118_v45  ;;  %v195_v46 = vpop.f32.mrb[3].mxu1 }
  0xe6   :  { %284 = vst [vmem:[%s466_s2 + $0x48] sm:$0xff] %v195_v46 }
  0xe7   :  { %v264_v47 = vpop.f32.mrb[4].mxu0 }
  0xe8   :  { %279 = vst [vmem:[%s466_s2 + $0x20] sm:$0xff] %v264_v47  ;;  %v270_v48 = vpop.f32.mrb[4].mxu1  ;;  %v266_v49 = vpop.f32.mrb[5].mxu0 }
  0xe9   :  { %285 = vst [vmem:[%s466_s2 + $0x50] sm:$0xff] %v270_v48  ;;  %280 = vst.msk [vmem:[%s466_s2 + $0x28] sm:$0xff] %vm37_vm0, %v266_v49  ;;  %v272_v50 = vpop.f32.mrb[5].mxu1 }
  0xea   :  { %286 = vst.msk [vmem:[%s466_s2 + $0x58] sm:$0xff] %vm37_vm0, %v272_v50 }

// kernel: ipa_transformer_forward.15
= control target key start
LH: loop header
LB: loop body
LE: loop exit
PB: predicated region body
PF: predicated region fallthrough
CT: control target
= control target key end

     0   :  { %vm56_vm0 = vcmask 261120   ;;  %s899_s0 = inlined_call_operand.vmem [shape: f32[16,32], index: 0, kind: input, shape index: {}]   ;;  %s900_s1 = inlined_call_operand.vmem [shape: f32[16,32], index: 1, kind: input, shape index: {}]   ;;  %s901_s2 = inlined_call_operand.vmem [shape: f32[1,32], index: 2, kind: input, shape index: {}]   ;;  %s902_s3 = inlined_call_operand.vmem [shape: f32[1,32], index: 3, kind: input, shape index: {}]   ;;  %s903_s4 = inlined_call_operand.vmem [shape: f32[32,32], index: 4, kind: input, shape index: {}]   ;;  %s904_s5 = inlined_call_operand.vmem [shape: f32[1,32], index: 5, kind: input, shape index: {}]   ;;  %s905_s6 = inlined_call_operand.vmem [shape: f32[32,32], index: 6, kind: input, shape index: {}]   ;;  %s906_s7 = inlined_call_operand.vmem [shape: f32[1,32], index: 7, kind: input, shape index: {}]   ;;  %s907_s8 = inlined_call_operand.vmem [shape: f32[32,32], index: 8, kind: input, shape index: {}]   ;;  %s908_s9 = inlined_call_operand.vmem [shape: f32[1,32], index: 9, kind: input, shape index: {}]   ;;  %s909_s10 = inlined_call_operand.vmem [shape: f32[1,32], index: 10, kind: input, shape index: {}]   ;;  %s910_s11 = inlined_call_operand.vmem [shape: f32[1,32], index: 11, kind: input, shape index: {}]   ;;  %s911_s12 = inlined_call_operand.vmem [shape: f32[32,6], index: 12, kind: input, shape index: {}]   ;;  %s912_s13 = inlined_call_operand.vmem [shape: f32[1,6], index: 13, kind: input, shape index: {}]   ;;  %s913_s14 = inlined_call_operand.hbm [shape: f32[16,32], index: 14, kind: output, shape index: {0}]   ;;  %s914_s15 = inlined_call_operand.vmem [shape: f32[16,6], index: 15, kind: output, shape index: {1}]  }
   0x1   :  { %v50_v0 = vld [vmem:[%s899_s0] sm:$0xff]  ;;  %v51_v2 = vld [vmem:[%s899_s0 + $0x8] sm:$0xff] }
   0x2   :  { %v52_v1 = vld [vmem:[%s900_s1] sm:$0xff]  ;;  %v53_v4 = vld [vmem:[%s900_s1 + $0x8] sm:$0xff] }
   0x3   :  { %v54_v3 = vadd.f32 %v52_v1, %v50_v0 }
   0x4   :  { %21 = vsyncpa [#allocation3], 0  ;;  %v55_v5 = vadd.f32 %v53_v4, %v51_v2  ;;  %v102_v18 = vld [vmem:[%s903_s4] sm:$0xff]  ;;  %v103_v19 = vld [vmem:[%s903_s4 + $0x8] sm:$0xff] }
   0x5   :  { %v57_v6 = vsel %vm56_vm0, %v54_v3, 0.0  ;;  %v104_v20 = vld [vmem:[%s903_s4 + $0x10] sm:$0xff]  ;;  %v629_v21 = vpack.c.bf16 %v103_v19, %v102_v18  ;;  %v105_v22 = vld [vmem:[%s903_s4 + $0x18] sm:$0xff]  ;;  %v196_v24 = vld [vmem:[%s905_s6] sm:$0xff] }
   0x6   :  { %58 = vadd.xlane.f32.xlu0 %v57_v6  ;;  %v60_v7 = vsel %vm56_vm0, %v55_v5, 0.0  ;;  %v633_v23 = vpack.c.bf16 %v105_v22, %v104_v20  ;;  %v197_v25 = vld [vmem:[%s905_s6 + $0x8] sm:$0xff]  ;;  %v545_v34 = vld [vmem:[%s901_s2] ss:$0 sm:$0xff]  ;;  %v198_v43 = vld [vmem:[%s905_s6 + $0x10] sm:$0xff] }
   0x7   :  { %630 = vmatprep.subr.bf16.mxu0 %v629_v21  ;;  %v637_v26 = vpack.c.bf16 %v197_v25, %v196_v24  ;;  %v546_v36 = vld [vmem:[%s902_s3] ss:$0 sm:$0xff]  ;;  %v199_v44 = vld [vmem:[%s905_s6 + $0x18] sm:$0xff]  ;;  %v291_v47 = vld [vmem:[%s907_s8 + $0x8] sm:$0xff] }
   0x8   :  { %632 = vmatpush3.bf16.msra.mxu0 %v629_v21  ;;  %v641_v45 = vpack.c.bf16 %v199_v44, %v198_v43  ;;  %v290_v46 = vld [vmem:[%s907_s8] sm:$0xff]  ;;  %v292_v56 = vld [vmem:[%s907_s8 + $0x10] sm:$0xff]  ;;  %v293_v57 = vld [vmem:[%s907_s8 + $0x18] sm:$0xff] }
   0x9   :  { %634 = vmatprep.subr.bf16.mxu0 %v633_v23  ;;  %638 = vmatprep.subr.bf16.mxu1 %v637_v26  ;;  %v645_v48 = vpack.c.bf16 %v291_v47, %v290_v46  ;;  %v547_v49 = vld [vmem:[%s904_s5] ss:$0 sm:$0xff]  ;;  %v649_v58 = vpack.c.bf16 %v293_v57, %v292_v56  ;;  %v431_v22 = vld [vmem:[%s911_s12 + $0x8] sm:$0xff]  ;;  %v432_v24 = vld [vmem:[%s911_s12 + $0x10] sm:$0xff] }
   0xa   :  { %61 = vadd.xlane.f32.xlu0 %v60_v7  ;;  %640 = vmatpush3.bf16.msra.mxu1 %v637_v26  ;;  %v550_v59 = vld [vmem:[%s906_s7] ss:$0 sm:$0xff]  ;;  %v433_v25 = vld [vmem:[%s911_s12 + $0x18] sm:$0xff] }
   0xb   :  { %642 = vmatprep.subr.bf16.mxu1 %v641_v45  ;;  %v553_v2 = vld [vmem:[%s908_s9] ss:$0 sm:$0xff]  ;;  %v657_v26 = vpack.c.bf16 %v433_v25, %v432_v24 }
   0xc   :  { %636 = vmatpush3.bf16.msra.mxu0 %v633_v23  ;;  %v430_v21 = vld [vmem:[%s911_s12] sm:$0xff] }
   0xd   :  { %646 = vmatprep.subr.bf16.mxu0 %v645_v48  ;;  %v653_v23 = vpack.c.bf16 %v431_v22, %v430_v21 }
   0xe   :  { %644 = vmatpush3.bf16.msra.mxu1 %v641_v45 }
   0xf   :  { %654 = vmatprep.subr.bf16.mxu1 %v653_v23 }
  0x93   :  { %v59_v8 = vpop.xlane.xlu0 %58 }
  0x94   :  { %v64_v9 = vmul.f32 0.03125, %v59_v8 }
  0x96   :  { %v66_v10 = vsub.f32 %v54_v3, %v64_v9 }
  0x97   :  { %v62_v11 = vpop.xlane.xlu0 %61 }
  0x98   :  { %v65_v12 = vmul.f32 0.03125, %v62_v11  ;;  %v68_v13 = vmul.f32 %v66_v10, %v66_v10 }
  0x9a   :  { %v67_v14 = vsub.f32 %v55_v5, %v65_v12  ;;  %v70_v15 = vsel %vm56_vm0, %v68_v13, 0.0 }
  0x9b   :  { %71 = vadd.xlane.f32.xlu1 %v70_v15 }
  0x9c   :  { %v69_v16 = vmul.f32 %v67_v14, %v67_v14 }
  0x9e   :  { %v73_v17 = vsel %vm56_vm0, %v69_v16, 0.0 }
  0x9f   :  { %74 = vadd.xlane.f32.xlu1 %v73_v17 }
 0x128   :  { %v72_v27 = vpop.xlane.xlu1 %71 }
 0x129   :  { %v76_v28 = vmul.f32 0.03125, %v72_v27 }
 0x12b   :  { %v78_v29 = vadd.f32 1e-05, %v76_v28 }
 0x12c   :  { %v75_v30 = vpop.xlane.xlu1 %74 }
 0x12d   :  { %664 = vrsqrt.f32 %v78_v29  ;;  %v77_v31 = vmul.f32 0.03125, %v75_v30 }
 0x12f   :  { %v79_v32 = vadd.f32 1e-05, %v77_v31 }
 0x131   :  { %666 = vrsqrt.f32 %v79_v32 }
 0x137   :  { %v665_v33 = vpop.eup %664 }
 0x138   :  { %v82_v35 = vmul.f32 %v665_v33, %v66_v10 }
 0x13a   :  { %v91_v37 = vmul.f32 %v545_v34, %v82_v35 }
 0x13b   :  { %v667_v38 = vpop.eup %666 }
 0x13c   :  { %v83_v39 = vmul.f32 %v667_v38, %v67_v14  ;;  %v100_v40 = vadd.f32 %v546_v36, %v91_v37  ;;  %v557_v38 = vld [vmem:[%s910_s11] ss:$0 sm:$0xff] }
 0x13e   :  { %v92_v41 = vmul.f32 %v545_v34, %v83_v39  ;;  %593 = vmatprep.mubr.msk.f32.mxu0 %vm56_vm0, %v100_v40  ;;  %v556_v34 = vld [vmem:[%s909_s10] ss:$0 sm:$0xff]  ;;  %s696_s10 = smov [#allocation2]  }
 0x13f   :  { %s530_s3 = sshll.u32 %s696_s10, 4  ;;  %s531_s3 = int_to_ptr.vmem [resolvable:$true] %s530_s3 }
 0x140   :  { %v101_v42 = vadd.f32 %v546_v36, %v92_v41  ;;  %s672_s1 = scalar_lea.vmem %s531_s3, 256  ;;  %p677_p1 = scmp.lt.s32.totalorder %s531_s3, %s531_s3 }
 0x141   :  { %p673_p0 = scmp.ne.s32.totalorder %s531_s3, %s672_s1  ;;  %p678_p2 = scmp.lt.s32.totalorder %s672_s1, %s672_s1 }
 0x142   :  { %594 = vmatmul.mubr.msk.f32.vlgmr.msra.gmra.mrb[0].mxu0 %vm56_vm0, %v101_v42 }
 0x143   :  { %648 = vmatpush3.bf16.msra.mxu0 %v645_v48  ;;  %p679_p3 = por %p678_p2, %p677_p1 }
 0x144   :  { %650 = vmatprep.subr.bf16.mxu0 %v649_v58 }
 0x145   :  { %p680_p4 = pnand %p679_p3, %p673_p0 }
 0x147   :  { %652 = vmatpush3.bf16.msra.mxu0 %v649_v58 }
 0x215   :  { %v595_v50 = vpop.f32.mrb[0].mxu0 }
 0x216   :  { %v191_v51 = vadd.f32 %v595_v50, %v547_v49  ;;  %v185_v52 = vpop.f32.mrb[1].mxu0 }
 0x217   :  { %v186_v53 = vadd.f32 %v547_v49, %v185_v52 }
 0x218   :  { %v195_v55 = vmax.f32 %v191_v51, 0.0 }
 0x219   :  { %v194_v54 = vmax.f32 %v186_v53, 0.0 }
 0x21b   :  { %604 = vmatprep.mubr.msk.f32.mxu1 %vm56_vm0, %v194_v54 }
 0x21c   :  { %605 = vmatmul.mubr.msk.f32.vlgmr.msra.gmra.mrb[0].mxu1 %vm56_vm0, %v195_v55 }
 0x21d   :  { %656 = vmatpush3.bf16.msra.mxu1 %v653_v23 }
 0x21e   :  { %658 = vmatprep.subr.bf16.mxu1 %v657_v26 }
 0x221   :  { %660 = vmatpush3.bf16.msra.mxu1 %v657_v26 }
 0x2ef   :  { %v606_v60 = vpop.f32.mrb[0].mxu1 }
 0x2f0   :  { %v285_v61 = vadd.f32 %v606_v60, %v550_v59  ;;  %v279_v62 = vpop.f32.mrb[1].mxu1 }
 0x2f1   :  { %v280_v63 = vadd.f32 %v550_v59, %v279_v62 }
 0x2f2   :  { %v289_v1 = vmax.f32 %v285_v61, 0.0 }
 0x2f3   :  { %v288_v0 = vmax.f32 %v280_v63, 0.0 }
 0x2f5   :  { %615 = vmatprep.mubr.msk.f32.mxu0 %vm56_vm0, %v288_v0 }
 0x2f6   :  { %616 = vmatmul.mubr.msk.f32.vlgmr.msra.gmra.mrb[2].mxu0 %vm56_vm0, %v289_v1 }
 0x3c9   :  { %v617_v3 = vpop.f32.mrb[2].mxu0 }
 0x3ca   :  { %v379_v4 = vadd.f32 %v617_v3, %v553_v2  ;;  %v373_v5 = vpop.f32.mrb[3].mxu0 }
 0x3cb   :  { %v374_v6 = vadd.f32 %v553_v2, %v373_v5 }
 0x3cc   :  { %v383_v7 = vadd.f32 %v379_v4, %v101_v42 }
 0x3cd   :  { %v382_v8 = vadd.f32 %v374_v6, %v100_v40 }
 0x3ce   :  { %v387_v9 = vsel %vm56_vm0, %v383_v7, 0.0 }
 0x3cf   :  { %388 = vadd.xlane.f32.xlu1 %v387_v9  ;;  %v384_v10 = vsel %vm56_vm0, %v382_v8, 0.0 }
 0x3d0   :  { %385 = vadd.xlane.f32.xlu0 %v384_v10 }
 0x45c   :  { %v389_v11 = vpop.xlane.xlu1 %388 }
 0x45d   :  { %v391_v12 = vmul.f32 0.03125, %v389_v11  ;;  %v386_v13 = vpop.xlane.xlu0 %385 }
 0x45e   :  { %v390_v14 = vmul.f32 0.03125, %v386_v13 }
 0x45f   :  { %v393_v15 = vsub.f32 %v383_v7, %v391_v12 }
 0x460   :  { %v392_v16 = vsub.f32 %v382_v8, %v390_v14 }
 0x461   :  { %v395_v17 = vmul.f32 %v393_v15, %v393_v15 }
 0x462   :  { %v394_v18 = vmul.f32 %v392_v16, %v392_v16 }
 0x463   :  { %v399_v19 = vsel %vm56_vm0, %v395_v17, 0.0 }
 0x464   :  { %400 = vadd.xlane.f32.xlu1 %v399_v19  ;;  %v396_v20 = vsel %vm56_vm0, %v394_v18, 0.0 }
 0x465   :  { %397 = vadd.xlane.f32.xlu0 %v396_v20 }
 0x4f1   :  { %v401_v27 = vpop.xlane.xlu1 %400 }
 0x4f2   :  { %v403_v28 = vmul.f32 0.03125, %v401_v27  ;;  %v398_v29 = vpop.xlane.xlu0 %397 }
 0x4f3   :  { %v402_v30 = vmul.f32 0.03125, %v398_v29 }
 0x4f4   :  { %v405_v31 = vadd.f32 1e-05, %v403_v28 }
 0x4f5   :  { %v404_v32 = vadd.f32 1e-05, %v402_v30 }
 0x4f6   :  { %668 = vrsqrt.f32 %v405_v31 }
 0x4f7   :  { %670 = vrsqrt.f32 %v404_v32 }
 0x500   :  { %v669_v33 = vpop.eup %668 }
 0x501   :  { %v671_v35 = vpop.eup %670  ;;  %v409_v36 = vmul.f32 %v669_v33, %v393_v15 }
 0x502   :  { %v408_v37 = vmul.f32 %v671_v35, %v392_v16 }
 0x503   :  { %v418_v39 = vmul.f32 %v556_v34, %v409_v36 }
 0x504   :  { %v417_v40 = vmul.f32 %v556_v34, %v408_v37 }
 0x505   :  { %v427_v41 = vadd.f32 %v557_v38, %v418_v39 }
 0x506   :  { %v426_v42 = vadd.f32 %v557_v38, %v417_v40 }
 0x507   :  { %429 = vst.msk [vmem:[#allocation2 + $0x8] sm:$0xff] %vm56_vm0, %v427_v41 }
 0x508   :  { %626 = vmatprep.mubr.msk.f32.mxu1 %vm56_vm0, %v426_v42  ;;  %428 = vst.msk [vmem:[#allocation2] sm:$0xff] %vm56_vm0, %v426_v42 }
 0x509   :  { %627 = vmatmul.mubr.msk.f32.vlgmr.msra.gmra.mrb[2].mxu1 %vm56_vm0, %v427_v41 }
 0x50a   :  { %683 = shalt.err (!%p680_p4)
}
 0x50b   :  { %s684_s27 = scalar_lea.hbm %s913_s14, 256 }
 0x50c   :  { %p685_p5 = scmp.ne.s32.totalorder %s913_s14, %s684_s27  ;;  %p688_p6 = scmp.lt.u32.totalorder %s684_s27, %s913_s14 }
 0x50e   :  { %p690_p7 = pnand %p688_p6, %p685_p5 }
 0x510   :  { %693 = shalt.err (!%p690_p7)
}
 0x511   :  { %s697_s16 = smov 128   ;;  %s698_s17 = smov 8   ;;  %v558_v43 = vld [vmem:[%s912_s13] ss:$0 sm:$0xff]  ;;  %vm522_vm1 = vcmask 48128  }
 0x512   :  { %536 = dma.vmem_to_hbm [thread:$0]  %s531_s3, 256, %s913_s14, [#allocation3], %s697_s16, %s697_s16, %s698_s17  }
 0x5dc   :  { %v628_v44 = vpop.f32.mrb[2].mxu1 }
 0x5dd   :  { %v519_v45 = vadd.f32 %v628_v44, %v558_v43  ;;  %v513_v46 = vpop.f32.mrb[3].mxu1 }
 0x5de   :  { %v514_v47 = vadd.f32 %v558_v43, %v513_v46 }
 0x5df   :  { %524 = vst.msk [vmem:[%s914_s15 + $0x8] sm:$0xff] %vm522_vm1, %v519_v45 }
 0x5e0   :  { %523 = vst.msk [vmem:[%s914_s15] sm:$0xff] %vm522_vm1, %v514_v47 }
 0x5e1   :  { %694 = dma.done.wait [#allocation3], 256  }
 0x5e2   :  { %695 = vsyncadd [#allocation3], 4294967040 }
 0x5e3   :  { %544 = vsyncpa [#allocation3], 1 }

</bundles_post_ra>
